<compile_context>
chip_gen: v6e
topology: v6e:2x2x1
jax: 0.10.0
libtpu: 0.0.40
codegen_flags: <defaults>
</compile_context>

<pallas_src>
import jax
import jax.numpy as jnp
from jax.experimental import pallas as pl
from jax.experimental.pallas import tpu as pltpu


_VMEM_LIMIT = 32 * 1024 * 1024  # >= actual live blocks (~15 MB worst); v7x-safe.


# ---------------------------------------------------------------------------
# Pallas kernels
# ---------------------------------------------------------------------------

def _conv_gemm_relu_kernel(x_ref, w_ref, b_ref, o_ref):
    # x: (tm, 128) bf16 (8 im2col rows packed per GEMM row),
    # w: (128, 256) bf16 block-diagonal, b: (1, 256) f32, o: (tm, 256) bf16.
    acc = jnp.dot(x_ref[...], w_ref[...], preferred_element_type=jnp.float32)
    o_ref[...] = jnp.maximum(acc + b_ref[...], 0.0).astype(o_ref.dtype)


def _conv2_relu_pool_kernel(x_ref, w_ref, b_ref, o_ref):
    # x: (4, tm, 576) bf16 window-major im2col (2 output rows packed per GEMM row),
    # w: (576, 128) bf16 block-diagonal, b: (1, 128) f32.
    # One long GEMM over all 4 pool-window positions, then window-max + bias + ReLU.
    tm = o_ref.shape[0]
    n = o_ref.shape[1]
    k = x_ref.shape[-1]
    x = x_ref[...].reshape(4 * tm, k)                      # leading-dim merge (free)
    z = jnp.dot(x, w_ref[...], preferred_element_type=jnp.float32)
    z = z.reshape(4, tm, n)
    m = jnp.maximum(jnp.maximum(z[0], z[1]), jnp.maximum(z[2], z[3]))
    o_ref[...] = jnp.maximum(m + b_ref[...], 0.0).astype(o_ref.dtype)


def _fc_head_kernel(x_ref, w1_ref, b1_ref, w2_ref, b2_ref, o_ref):
    # Whole-K fc1 + ReLU + fc2 (N padded to 128, padded logits carry -1e30 bias)
    # + log_softmax, one row tile per grid step.
    h = jnp.dot(x_ref[...], w1_ref[...], preferred_element_type=jnp.float32)
    h = jnp.maximum(h + b1_ref[...], 0.0)
    z = jnp.dot(h.astype(w2_ref.dtype), w2_ref[...],
                preferred_element_type=jnp.float32) + b2_ref[...]
    m = jnp.max(z, axis=-1, keepdims=True)
    e = jnp.exp(z - m)
    lse = jnp.log(jnp.sum(e, axis=-1, keepdims=True)) + m
    o_ref[...] = (z - lse).astype(o_ref.dtype)


# ---------------------------------------------------------------------------
# pallas_call wrappers
# ---------------------------------------------------------------------------

def conv_gemm_relu(x, w, b, *, tm):
    """y = relu(x @ w + b) on row-packed im2col; x rows are a multiple of tm."""
    M, K = x.shape
    _, N = w.shape
    assert M % tm == 0
    ce = pl.CostEstimate(flops=2 * M * K * N, transcendentals=0,
                         bytes_accessed=2 * (M * K + K * N + M * N) + 4 * N)
    return pl.pallas_call(
        _conv_gemm_relu_kernel,
        out_shape=jax.ShapeDtypeStruct((M, N), jnp.bfloat16),
        grid=(M // tm,),
        in_specs=[
            pl.BlockSpec((tm, K), lambda i: (i, 0)),
            pl.BlockSpec((K, N), lambda i: (0, 0)),
            pl.BlockSpec((1, N), lambda i: (0, 0)),
        ],
        out_specs=pl.BlockSpec((tm, N), lambda i: (i, 0)),
        compiler_params=pltpu.CompilerParams(
            dimension_semantics=("parallel",),
            vmem_limit_bytes=_VMEM_LIMIT,
        ),
        cost_estimate=ce,
    )(x, w, b)


def conv2_relu_pool(p2w, w, b, *, tm):
    """Fused conv2-GEMM + 2x2 max-pool + ReLU on window-major packed im2col."""
    _, M, K = p2w.shape
    _, N = w.shape
    assert M % tm == 0
    ce = pl.CostEstimate(flops=2 * 4 * M * K * N, transcendentals=0,
                         bytes_accessed=2 * (4 * M * K + K * N + M * N) + 4 * N)
    return pl.pallas_call(
        _conv2_relu_pool_kernel,
        out_shape=jax.ShapeDtypeStruct((M, N), jnp.bfloat16),
        grid=(M // tm,),
        in_specs=[
            pl.BlockSpec((4, tm, K), lambda i: (0, i, 0)),
            pl.BlockSpec((K, N), lambda i: (0, 0)),
            pl.BlockSpec((1, N), lambda i: (0, 0)),
        ],
        out_specs=pl.BlockSpec((tm, N), lambda i: (i, 0)),
        compiler_params=pltpu.CompilerParams(
            dimension_semantics=("parallel",),
            vmem_limit_bytes=_VMEM_LIMIT,
        ),
        cost_estimate=ce,
    )(p2w, w, b)


def fc_head(flat, w1, b1, w2, b2, *, tmb):
    """Fused fc1 + ReLU + fc2 + log_softmax; row-parallel grid, whole-K fc1."""
    Mb, K = flat.shape
    _, N1 = w1.shape       # 128
    _, N2 = w2.shape       # 128 (padded from 10)
    assert Mb % tmb == 0
    ce = pl.CostEstimate(
        flops=2 * Mb * K * N1 + 2 * Mb * N1 * N2,
        transcendentals=Mb * N2,
        bytes_accessed=2 * (Mb * K + K * N1 + N1 * N2) + 4 * (Mb * N2 + N1 + N2))
    return pl.pallas_call(
        _fc_head_kernel,
        out_shape=jax.ShapeDtypeStruct((Mb, N2), jnp.float32),
        grid=(Mb // tmb,),
        in_specs=[
            pl.BlockSpec((tmb, K), lambda i: (i, 0)),
            pl.BlockSpec((K, N1), lambda i: (0, 0)),
            pl.BlockSpec((1, N1), lambda i: (0, 0)),
            pl.BlockSpec((N1, N2), lambda i: (0, 0)),
            pl.BlockSpec((1, N2), lambda i: (0, 0)),
        ],
        out_specs=pl.BlockSpec((tmb, N2), lambda i: (i, 0)),
        compiler_params=pltpu.CompilerParams(
            dimension_semantics=("parallel",),
            vmem_limit_bytes=_VMEM_LIMIT,
        ),
        cost_estimate=ce,
    )(flat, w1, b1, w2, b2)


# ---------------------------------------------------------------------------
# Glue: im2col, parameter packing, full forward pass
# ---------------------------------------------------------------------------

def _round_up(x, m):
    return ((x + m - 1) // m) * m


def _im2col_3x3(x_nhwc):
    """3x3 / stride-1 / valid patches -> (B, H-2, W-2, 9*C); (kpos, c) column order."""
    B, H, W, C = x_nhwc.shape
    Ho, Wo = H - 2, W - 2
    cols = [x_nhwc[:, i:i + Ho, j:j + Wo, :] for i in range(3) for j in range(3)]
    return jnp.concatenate(cols, axis=-1)


def init_params(key):
    """Synthetic parameters with MnistModel's PyTorch shapes, repacked for the kernels."""
    ks = jax.random.split(key, 8)
    w1_pt = jax.random.normal(ks[0], (32, 1, 3, 3), jnp.float32) * 0.10   # conv1.weight
    b1 = jax.random.normal(ks[1], (32,), jnp.float32) * 0.10              # conv1.bias
    w2_pt = jax.random.normal(ks[2], (64, 32, 3, 3), jnp.float32) * 0.05  # conv2.weight
    b2 = jax.random.normal(ks[3], (64,), jnp.float32) * 0.05              # conv2.bias
    wfc1_pt = jax.random.normal(ks[4], (128, 9216), jnp.float32) * 0.01   # fc1.weight
    bfc1 = jax.random.normal(ks[5], (128,), jnp.float32) * 0.01           # fc1.bias
    wfc2_pt = jax.random.normal(ks[6], (10, 128), jnp.float32) * 0.05     # fc2.weight
    bfc2 = jax.random.normal(ks[7], (10,), jnp.float32) * 0.05            # fc2.bias

    # conv1: (O,I,KH,KW) -> (KH*KW*I, O) = (9, 32), pad K to 16, then replicate 8x
    # block-diagonally so 8 im2col rows are processed per 128-lane GEMM row and the
    # output is a lane-dense 256-wide store (memory order unchanged).
    w1 = jnp.transpose(w1_pt, (2, 3, 1, 0)).reshape(9, 32)
    w1 = jnp.pad(w1, ((0, 16 - 9), (0, 0)))
    w1 = jnp.kron(jnp.eye(8, dtype=jnp.float32), w1).astype(jnp.bfloat16)   # (128, 256)
    b1p = jnp.tile(b1.reshape(1, 32), (1, 8))                               # (1, 256)

    # conv2: (288, 64), replicate 2x block-diagonally -> 2 output rows per GEMM row,
    # lane-dense (·,128) stores with memory order preserved for the flatten.
    w2 = jnp.transpose(w2_pt, (2, 3, 1, 0)).reshape(288, 64)
    w2 = jnp.kron(jnp.eye(2, dtype=jnp.float32), w2).astype(jnp.bfloat16)   # (576, 128)
    b2p = jnp.tile(b2.reshape(1, 64), (1, 2))                               # (1, 128)

    # fc1: PyTorch flatten order is (c, p, q); our pooled activations flatten as
    # (p, q, c), so permute wfc1's input rows once at init (removes runtime transpose).
    wfc1 = (wfc1_pt.reshape(128, 64, 12, 12)
            .transpose(2, 3, 1, 0)
            .reshape(9216, 128)
            .astype(jnp.bfloat16))

    # fc2: (10, 128) -> (128, 10), pad N to 128 lanes; padded logits get -1e30 bias so
    # they never affect the log_softmax of the first 10 columns (f32 path required).
    wfc2 = jnp.pad(wfc2_pt.T, ((0, 0), (0, 118))).astype(jnp.bfloat16)
    bfc2p = jnp.concatenate([bfc2, jnp.full((118,), -1e30, jnp.float32)]).reshape(1, 128)

    return dict(
        w1=w1, b1=b1p,
        w2=w2, b2=b2p,
        wfc1=wfc1, bfc1=bfc1.reshape(1, 128),
        wfc2=wfc2, bfc2=bfc2p,
    )


def mnist_forward(x_nchw, params):
    """Forward pass of MnistModel. x_nchw: (B, 1, 28, 28) float32 -> (B, 10) log-probs."""
    B = x_nchw.shape[0]
    TM1 = 256   # packed rows (= 2048 unpacked im2col rows) per conv1 tile
    TM2 = 256   # packed rows (= 512 unpacked pooled rows)   per conv2 tile
    TMB = 256   # fc-head row tile

    x = jnp.transpose(x_nchw, (0, 2, 3, 1)).astype(jnp.bfloat16)      # NCHW -> NHWC

    # ---- conv1 (1->32, 3x3, valid) + ReLU: row-packed im2col GEMM -----------------
    M1 = B * 26 * 26
    p1 = _im2col_3x3(x).reshape(M1, 9)
    p1 = jnp.pad(p1, ((0, 0), (0, 16 - 9)))                           # K 9 -> 16
    M1_packed = -(-M1 // 8)                                           # ceil(M1/8)
    tm1 = min(TM1, _round_up(M1_packed, 16))                          # batch-aware tile
    M1pp = _round_up(M1_packed, tm1)
    p1 = jnp.pad(p1, ((0, 8 * M1pp - M1), (0, 0))).reshape(M1pp, 128)
    y1 = conv_gemm_relu(p1, params["w1"], params["b1"], tm=tm1)       # (M1pp, 256) bf16
    y1 = y1.reshape(8 * M1pp, 32)[:M1].reshape(B, 26, 26, 32)

    # ---- conv2 (32->64, 3x3, valid) + ReLU + max_pool2d(2), fused ------------------
    # Window-major im2col: axis 0 enumerates the 4 positions of each 2x2 pool window.
    # TODO(synk): build these patches inside the kernel from y1 to kill the ~8x
    # expanded HBM round-trip at large batch.
    p2 = _im2col_3x3(y1)                                              # (B, 24, 24, 288)
    p2w = (p2.reshape(B, 12, 2, 12, 2, 288)
           .transpose(2, 4, 0, 1, 3, 5)
           .reshape(4, B * 144, 288))
    Mp_packed = B * 72                                                # 2 rows per GEMM row
    tm2 = min(TM2, _round_up(Mp_packed, 16))                          # batch-aware tile
    Mpp_packed = _round_up(Mp_packed, tm2)
    p2w = jnp.pad(p2w, ((0, 0), (0, 2 * Mpp_packed - B * 144), (0, 0)))
    p2w = p2w.reshape(4, Mpp_packed, 576)
    pooled = conv2_relu_pool(p2w, params["w2"], params["b2"], tm=tm2)  # (Mpp_packed, 128)

    # dropout1(0.25): identity (inference / eval semantics).
    # TODO(synk): training-mode dropout masking (torch.nn.Dropout in train mode) not implemented.

    # Flatten in (p, q, c) order; wfc1's rows were permuted at init to match
    # torch.flatten(x, 1) semantics exactly.
    flat = pooled[:Mp_packed].reshape(B, 9216)                        # (B, 9216) bf16
    Mb = _round_up(B, 16)
    if Mb > TMB:
        Mb = _round_up(Mb, TMB)
    tmb = min(Mb, TMB)
    flat = jnp.pad(flat, ((0, Mb - B), (0, 0)))

    # dropout2(0.5): identity (inference / eval semantics).

    # fc1 + ReLU + fc2 + log_softmax(dim=1) fused, row-parallel, whole-K fc1.
    out = fc_head(flat, params["wfc1"], params["bfc1"],
                  params["wfc2"], params["bfc2"], tmb=tmb)            # (Mb, 128) f32
    return out[:B, :10]


if __name__ == "__main__":
    key = jax.random.PRNGKey(0)
    pkey, xkey = jax.random.split(key)
    params = init_params(pkey)

    # fc1 expects 9216 = 64 * 12 * 12 features, which pins the input to 28x28x1 (MNIST).
    x = jax.random.normal(xkey, (2, 1, 28, 28), dtype=jnp.float32)

    out = jax.jit(mnist_forward)(x, params)
    out = jax.block_until_ready(out)
    assert out.shape == (2, 10) and out.dtype == jnp.float32
    # log_softmax rows should (approximately) exponentiate-and-sum to 1.
    assert jnp.allclose(jnp.sum(jnp.exp(out), axis=1), 1.0, atol=1e-3)
    print("KERNEL_OK")
</pallas_src>

<mosaic_0001>
module attributes {stable_mosaic.version = 11 : i64} {
  func.func @_conv_gemm_relu_kernel(%arg0: i32, %arg1: memref<176x128xbf16, #tpu.memory_space<vmem>>, %arg2: memref<128x256xbf16, #tpu.memory_space<vmem>>, %arg3: memref<1x256xf32, #tpu.memory_space<vmem>>, %arg4: memref<176x256xbf16, #tpu.memory_space<vmem>>) attributes {dimension_semantics = [#tpu.dimension_semantics<parallel>], iteration_bounds = array<i64: 1>, scalar_prefetch = 0 : i64, scratch_operands = 0 : i64, tpu.core_type = #tpu.core_type<tc>, window_params = [{transform_indices = @transform_0, window_bounds = array<i64: 176, 128>}, {pipeline_mode = #tpu.pipeline_mode<synchronous>, transform_indices = @transform_1, window_bounds = array<i64: 128, 256>}, {pipeline_mode = #tpu.pipeline_mode<synchronous>, transform_indices = @transform_2, window_bounds = array<i64: 1, 256>}, {transform_indices = @transform_3, window_bounds = array<i64: 176, 256>}]} {
    %c0 = arith.constant 0 : index
    %c0_0 = arith.constant 0 : index
    %0 = vector.load %arg1[%c0, %c0_0] : memref<176x128xbf16, #tpu.memory_space<vmem>>, vector<176x128xbf16>
    %c0_1 = arith.constant 0 : index
    %c0_2 = arith.constant 0 : index
    %1 = vector.load %arg2[%c0_1, %c0_2] : memref<128x256xbf16, #tpu.memory_space<vmem>>, vector<128x256xbf16>
    %cst = arith.constant dense<0.000000e+00> : vector<176x256xf32>
    %2 = tpu.matmul %0, %1, %cst {dimension_numbers = #tpu.dot_dimension_numbers<[1], [0], [0], [1], [0, 0, 1, 1], [], []>} : vector<176x128xbf16>, vector<128x256xbf16>, vector<176x256xf32> -> vector<176x256xf32>
    %c0_3 = arith.constant 0 : index
    %c0_4 = arith.constant 0 : index
    %3 = vector.load %arg3[%c0_3, %c0_4] : memref<1x256xf32, #tpu.memory_space<vmem>>, vector<1x256xf32>
    %4 = vector.broadcast %3 : vector<1x256xf32> to vector<176x256xf32>
    %5 = arith.addf %2, %4 : vector<176x256xf32>
    %cst_5 = arith.constant 0.000000e+00 : f32
    %6 = vector.broadcast %cst_5 : f32 to vector<176x256xf32>
    %7 = arith.maximumf %5, %6 : vector<176x256xf32>
    %8 = arith.truncf %7 : vector<176x256xf32> to vector<176x256xbf16>
    %c0_6 = arith.constant 0 : index
    %c0_7 = arith.constant 0 : index
    %9 = vector.load %arg4[%c0_6, %c0_7] : memref<176x256xbf16, #tpu.memory_space<vmem>>, vector<176x256xbf16>
    tpu.vector_store %arg4[%c0_6, %c0_7], %8 {strides = array<i32>} : memref<176x256xbf16, #tpu.memory_space<vmem>>, vector<176x256xbf16>,
    return
  }
  func.func @transform_0(%arg0: i32) -> (i32, i32) {
    %c0_i32 = arith.constant 0 : i32
    %c0_i32_0 = arith.constant 0 : i32
    return %arg0, %c0_i32 : i32, i32
  }
  func.func @transform_1(%arg0: i32) -> (i32, i32) {
    %c0_i32 = arith.constant 0 : i32
    %c0_i32_0 = arith.constant 0 : i32
    %c0_i32_1 = arith.constant 0 : i32
    return %c0_i32, %c0_i32_0 : i32, i32
  }
  func.func @transform_2(%arg0: i32) -> (i32, i32) {
    %c0_i32 = arith.constant 0 : i32
    %c0_i32_0 = arith.constant 0 : i32
    %c0_i32_1 = arith.constant 0 : i32
    return %c0_i32, %c0_i32_0 : i32, i32
  }
  func.func @transform_3(%arg0: i32) -> (i32, i32) {
    %c0_i32 = arith.constant 0 : i32
    %c0_i32_0 = arith.constant 0 : i32
    return %arg0, %c0_i32 : i32, i32
  }
}

module attributes {stable_mosaic.version = 11 : i64} {
  func.func @_conv2_relu_pool_kernel(%arg0: i32, %arg1: memref<4x144x576xbf16, #tpu.memory_space<vmem>>, %arg2: memref<576x128xbf16, #tpu.memory_space<vmem>>, %arg3: memref<1x128xf32, #tpu.memory_space<vmem>>, %arg4: memref<144x128xbf16, #tpu.memory_space<vmem>>) attributes {dimension_semantics = [#tpu.dimension_semantics<parallel>], iteration_bounds = array<i64: 1>, scalar_prefetch = 0 : i64, scratch_operands = 0 : i64, tpu.core_type = #tpu.core_type<tc>, window_params = [{transform_indices = @transform_0, window_bounds = array<i64: 4, 144, 576>}, {pipeline_mode = #tpu.pipeline_mode<synchronous>, transform_indices = @transform_1, window_bounds = array<i64: 576, 128>}, {pipeline_mode = #tpu.pipeline_mode<synchronous>, transform_indices = @transform_2, window_bounds = array<i64: 1, 128>}, {transform_indices = @transform_3, window_bounds = array<i64: 144, 128>}]} {
    %c0 = arith.constant 0 : index
    %c0_0 = arith.constant 0 : index
    %c0_1 = arith.constant 0 : index
    %0 = vector.load %arg1[%c0, %c0_0, %c0_1] : memref<4x144x576xbf16, #tpu.memory_space<vmem>>, vector<4x144x576xbf16>
    %1 = vector.shape_cast %0 : vector<4x144x576xbf16> to vector<576x576xbf16>
    %c0_2 = arith.constant 0 : index
    %c0_3 = arith.constant 0 : index
    %2 = vector.load %arg2[%c0_2, %c0_3] : memref<576x128xbf16, #tpu.memory_space<vmem>>, vector<576x128xbf16>
    %cst = arith.constant dense<0.000000e+00> : vector<576x128xf32>
    %3 = tpu.matmul %1, %2, %cst {dimension_numbers = #tpu.dot_dimension_numbers<[1], [0], [0], [1], [0, 0, 1, 1], [], []>} : vector<576x576xbf16>, vector<576x128xbf16>, vector<576x128xf32> -> vector<576x128xf32>
    %4 = vector.shape_cast %3 : vector<576x128xf32> to vector<4x144x128xf32>
    %5 = vector.extract_strided_slice %4 {offsets = [0, 0, 0], sizes = [1, 144, 128], strides = [1, 1, 1]} : vector<4x144x128xf32> to vector<1x144x128xf32>
    %6 = vector.shape_cast %5 : vector<1x144x128xf32> to vector<144x128xf32>
    %7 = vector.extract_strided_slice %4 {offsets = [1, 0, 0], sizes = [1, 144, 128], strides = [1, 1, 1]} : vector<4x144x128xf32> to vector<1x144x128xf32>
    %8 = vector.shape_cast %7 : vector<1x144x128xf32> to vector<144x128xf32>
    %9 = arith.maximumf %6, %8 : vector<144x128xf32>
    %10 = vector.extract_strided_slice %4 {offsets = [2, 0, 0], sizes = [1, 144, 128], strides = [1, 1, 1]} : vector<4x144x128xf32> to vector<1x144x128xf32>
    %11 = vector.shape_cast %10 : vector<1x144x128xf32> to vector<144x128xf32>
    %12 = vector.extract_strided_slice %4 {offsets = [3, 0, 0], sizes = [1, 144, 128], strides = [1, 1, 1]} : vector<4x144x128xf32> to vector<1x144x128xf32>
    %13 = vector.shape_cast %12 : vector<1x144x128xf32> to vector<144x128xf32>
    %14 = arith.maximumf %11, %13 : vector<144x128xf32>
    %15 = arith.maximumf %9, %14 : vector<144x128xf32>
    %c0_4 = arith.constant 0 : index
    %c0_5 = arith.constant 0 : index
    %16 = vector.load %arg3[%c0_4, %c0_5] : memref<1x128xf32, #tpu.memory_space<vmem>>, vector<1x128xf32>
    %17 = vector.broadcast %16 : vector<1x128xf32> to vector<144x128xf32>
    %18 = arith.addf %15, %17 : vector<144x128xf32>
    %cst_6 = arith.constant 0.000000e+00 : f32
    %19 = vector.broadcast %cst_6 : f32 to vector<144x128xf32>
    %20 = arith.maximumf %18, %19 : vector<144x128xf32>
    %21 = arith.truncf %20 : vector<144x128xf32> to vector<144x128xbf16>
    %c0_7 = arith.constant 0 : index
    %c0_8 = arith.constant 0 : index
    %22 = vector.load %arg4[%c0_7, %c0_8] : memref<144x128xbf16, #tpu.memory_space<vmem>>, vector<144x128xbf16>
    tpu.vector_store %arg4[%c0_7, %c0_8], %21 {strides = array<i32>} : memref<144x128xbf16, #tpu.memory_space<vmem>>, vector<144x128xbf16>,
    return
  }
  func.func @transform_0(%arg0: i32) -> (i32, i32, i32) {
    %c0_i32 = arith.constant 0 : i32
    %c0_i32_0 = arith.constant 0 : i32
    %c0_i32_1 = arith.constant 0 : i32
    return %c0_i32, %arg0, %c0_i32_0 : i32, i32, i32
  }
  func.func @transform_1(%arg0: i32) -> (i32, i32) {
    %c0_i32 = arith.constant 0 : i32
    %c0_i32_0 = arith.constant 0 : i32
    %c0_i32_1 = arith.constant 0 : i32
    return %c0_i32, %c0_i32_0 : i32, i32
  }
  func.func @transform_2(%arg0: i32) -> (i32, i32) {
    %c0_i32 = arith.constant 0 : i32
    %c0_i32_0 = arith.constant 0 : i32
    %c0_i32_1 = arith.constant 0 : i32
    return %c0_i32, %c0_i32_0 : i32, i32
  }
  func.func @transform_3(%arg0: i32) -> (i32, i32) {
    %c0_i32 = arith.constant 0 : i32
    %c0_i32_0 = arith.constant 0 : i32
    return %arg0, %c0_i32 : i32, i32
  }
}

module attributes {stable_mosaic.version = 11 : i64} {
  func.func @_fc_head_kernel(%arg0: i32, %arg1: memref<16x9216xbf16, #tpu.memory_space<vmem>>, %arg2: memref<9216x128xbf16, #tpu.memory_space<vmem>>, %arg3: memref<1x128xf32, #tpu.memory_space<vmem>>, %arg4: memref<128x128xbf16, #tpu.memory_space<vmem>>, %arg5: memref<1x128xf32, #tpu.memory_space<vmem>>, %arg6: memref<16x128xf32, #tpu.memory_space<vmem>>) attributes {dimension_semantics = [#tpu.dimension_semantics<parallel>], iteration_bounds = array<i64: 1>, scalar_prefetch = 0 : i64, scratch_operands = 0 : i64, tpu.core_type = #tpu.core_type<tc>, window_params = [{transform_indices = @transform_0, window_bounds = array<i64: 16, 9216>}, {pipeline_mode = #tpu.pipeline_mode<synchronous>, transform_indices = @transform_1, window_bounds = array<i64: 9216, 128>}, {pipeline_mode = #tpu.pipeline_mode<synchronous>, transform_indices = @transform_2, window_bounds = array<i64: 1, 128>}, {pipeline_mode = #tpu.pipeline_mode<synchronous>, transform_indices = @transform_3, window_bounds = array<i64: 128, 128>}, {pipeline_mode = #tpu.pipeline_mode<synchronous>, transform_indices = @transform_4, window_bounds = array<i64: 1, 128>}, {transform_indices = @transform_5, window_bounds = array<i64: 16, 128>}]} {
    %c0 = arith.constant 0 : index
    %c0_0 = arith.constant 0 : index
    %0 = vector.load %arg1[%c0, %c0_0] : memref<16x9216xbf16, #tpu.memory_space<vmem>>, vector<16x9216xbf16>
    %c0_1 = arith.constant 0 : index
    %c0_2 = arith.constant 0 : index
    %1 = vector.load %arg2[%c0_1, %c0_2] : memref<9216x128xbf16, #tpu.memory_space<vmem>>, vector<9216x128xbf16>
    %cst = arith.constant dense<0.000000e+00> : vector<16x128xf32>
    %2 = tpu.matmul %0, %1, %cst {dimension_numbers = #tpu.dot_dimension_numbers<[1], [0], [0], [1], [0, 0, 1, 1], [], []>} : vector<16x9216xbf16>, vector<9216x128xbf16>, vector<16x128xf32> -> vector<16x128xf32>
    %c0_3 = arith.constant 0 : index
    %c0_4 = arith.constant 0 : index
    %3 = vector.load %arg3[%c0_3, %c0_4] : memref<1x128xf32, #tpu.memory_space<vmem>>, vector<1x128xf32>
    %4 = vector.broadcast %3 : vector<1x128xf32> to vector<16x128xf32>
    %5 = arith.addf %2, %4 : vector<16x128xf32>
    %cst_5 = arith.constant 0.000000e+00 : f32
    %6 = vector.broadcast %cst_5 : f32 to vector<16x128xf32>
    %7 = arith.maximumf %5, %6 : vector<16x128xf32>
    %8 = arith.truncf %7 : vector<16x128xf32> to vector<16x128xbf16>
    %c0_6 = arith.constant 0 : index
    %c0_7 = arith.constant 0 : index
    %9 = vector.load %arg4[%c0_6, %c0_7] : memref<128x128xbf16, #tpu.memory_space<vmem>>, vector<128x128xbf16>
    %cst_8 = arith.constant dense<0.000000e+00> : vector<16x128xf32>
    %10 = tpu.matmul %8, %9, %cst_8 {dimension_numbers = #tpu.dot_dimension_numbers<[1], [0], [0], [1], [0, 0, 1, 1], [], []>} : vector<16x128xbf16>, vector<128x128xbf16>, vector<16x128xf32> -> vector<16x128xf32>
    %c0_9 = arith.constant 0 : index
    %c0_10 = arith.constant 0 : index
    %11 = vector.load %arg5[%c0_9, %c0_10] : memref<1x128xf32, #tpu.memory_space<vmem>>, vector<1x128xf32>
    %12 = vector.broadcast %11 : vector<1x128xf32> to vector<16x128xf32>
    %13 = arith.addf %10, %12 : vector<16x128xf32>
    %cst_11 = arith.constant dense<0xFF800000> : vector<16xf32>
    %14 = vector.multi_reduction <maximumf>, %13, %cst_11 [1] : vector<16x128xf32> to vector<16xf32>
    %15 = vector.shape_cast %14 : vector<16xf32> to vector<16x1xf32>
    %16 = vector.broadcast %15 : vector<16x1xf32> to vector<16x128xf32>
    %17 = arith.subf %13, %16 : vector<16x128xf32>
    %18 = math.exp %17 : vector<16x128xf32>
    %cst_12 = arith.constant dense<0.000000e+00> : vector<16xf32>
    %19 = vector.multi_reduction <add>, %18, %cst_12 [1] : vector<16x128xf32> to vector<16xf32>
    %20 = vector.shape_cast %19 : vector<16xf32> to vector<16x1xf32>
    %21 = math.log %20 : vector<16x1xf32>
    %22 = arith.addf %21, %15 : vector<16x1xf32>
    %23 = vector.broadcast %22 : vector<16x1xf32> to vector<16x128xf32>
    %24 = arith.subf %13, %23 : vector<16x128xf32>
    %c0_13 = arith.constant 0 : index
    %c0_14 = arith.constant 0 : index
    %25 = vector.load %arg6[%c0_13, %c0_14] : memref<16x128xf32, #tpu.memory_space<vmem>>, vector<16x128xf32>
    tpu.vector_store %arg6[%c0_13, %c0_14], %24 {strides = array<i32>} : memref<16x128xf32, #tpu.memory_space<vmem>>, vector<16x128xf32>,
    return
  }
  func.func @transform_0(%arg0: i32) -> (i32, i32) {
    %c0_i32 = arith.constant 0 : i32
    %c0_i32_0 = arith.constant 0 : i32
    return %arg0, %c0_i32 : i32, i32
  }
  func.func @transform_1(%arg0: i32) -> (i32, i32) {
    %c0_i32 = arith.constant 0 : i32
    %c0_i32_0 = arith.constant 0 : i32
    %c0_i32_1 = arith.constant 0 : i32
    return %c0_i32, %c0_i32_0 : i32, i32
  }
  func.func @transform_2(%arg0: i32) -> (i32, i32) {
    %c0_i32 = arith.constant 0 : i32
    %c0_i32_0 = arith.constant 0 : i32
    %c0_i32_1 = arith.constant 0 : i32
    return %c0_i32, %c0_i32_0 : i32, i32
  }
  func.func @transform_3(%arg0: i32) -> (i32, i32) {
    %c0_i32 = arith.constant 0 : i32
    %c0_i32_0 = arith.constant 0 : i32
    %c0_i32_1 = arith.constant 0 : i32
    return %c0_i32, %c0_i32_0 : i32, i32
  }
  func.func @transform_4(%arg0: i32) -> (i32, i32) {
    %c0_i32 = arith.constant 0 : i32
    %c0_i32_0 = arith.constant 0 : i32
    %c0_i32_1 = arith.constant 0 : i32
    return %c0_i32, %c0_i32_0 : i32, i32
  }
  func.func @transform_5(%arg0: i32) -> (i32, i32) {
    %c0_i32 = arith.constant 0 : i32
    %c0_i32_0 = arith.constant 0 : i32
    return %arg0, %c0_i32 : i32, i32
  }
}

</mosaic_0001>

<bundles_post_ra>
// kernel: mnist_forward.3
= control target key start
LH: loop header
LB: loop body
LE: loop exit
PB: predicated region body
PF: predicated region fallthrough
CT: control target
= control target key end

     0   :  { %8 = vsyncpa [#allocation3], 0  ;;  %s715_s12 = smov [#allocation2]   ;;  %s946_s0 = inlined_call_operand.vmem [shape: bf16[176,128], index: 0, kind: input, shape index: {}]   ;;  %s947_s1 = inlined_call_operand.vmem [shape: bf16[128,256], index: 1, kind: input, shape index: {}]   ;;  %s948_s2 = inlined_call_operand.hbm [shape: f32[1,256], index: 2, kind: input, shape index: {}]   ;;  %s949_s3 = inlined_call_operand.vmem [shape: bf16[176,256], index: 3, kind: output, shape index: {}]  }
   0x1   :  { %s19_s13 = sshll.u32 %s715_s12, 4  ;;  %s20_s13 = int_to_ptr.vmem [resolvable:$true] %s19_s13 }
   0x2   :  { %s701_s14 = scalar_lea.vmem %s20_s13, 32  ;;  %p706_p1 = scmp.lt.s32.totalorder %s20_s13, %s20_s13 }
   0x3   :  { %p702_p0 = scmp.ne.s32.totalorder %s20_s13, %s701_s14  ;;  %p707_p2 = scmp.lt.s32.totalorder %s701_s14, %s701_s14 }
   0x5   :  { %p708_p3 = por %p707_p2, %p706_p1 }
   0x7   :  { %p709_p4 = pnand %p708_p3, %p702_p0 }
   0x9   :  { %712 = shalt.err (!%p709_p4)
}
   0xa   :  { %22 = dma.hbm_to_vmem [thread:$0]  %s948_s2, 32, %s20_s13, [#allocation3]  }
   0xb   :  { %713 = dma.done.wait [#allocation3], 32  }
   0xc   :  { %714 = vsyncadd [#allocation3], 4294967264  ;;  %v716_v0 = vmov 0   ;;  %v658_v1 = vld [vmem:[%s947_s1 + $0x74] ss:$8 sps:$4 sm:$0xff]   ;;  %v682_v17 = vld [vmem:[%s946_s0] sm:$0xff]   ;;  %v67_v28 = vlaneseq }
   0xd   :  { %255 = vmatprep.mubr.bf16.mxu0 %v716_v0  ;;  %315 = vmatprep.mubr.bf16.mxu1 %v716_v0  ;;  %v660_v2 = vld [vmem:[%s947_s1 + $0x70] ss:$8 sps:$4 sm:$0xff]   ;;  %v661_v3 = vld [vmem:[%s947_s1 + $0x64] ss:$8 sps:$4 sm:$0xff]   ;;  %v663_v4 = vld [vmem:[%s947_s1 + $0x60] ss:$8 sps:$4 sm:$0xff]  }
   0xe   :  { %223 = vmatprep.subr.bf16.mxu0 %v658_v1  ;;  %640 = vmatprep.subr.bf16.mxu1 %v658_v1  ;;  %v664_v5 = vld [vmem:[%s947_s1 + $0x54] ss:$8 sps:$4 sm:$0xff]   ;;  %v666_v6 = vld [vmem:[%s947_s1 + $0x50] ss:$8 sps:$4 sm:$0xff]   ;;  %v667_v7 = vld [vmem:[%s947_s1 + $0x44] ss:$8 sps:$4 sm:$0xff]  }
   0xf   :  { %224 = vmatpush1.bf16.msra.mxu0 %v660_v2  ;;  %648 = vmatpush1.bf16.msra.mxu1 %v660_v2  ;;  %v669_v8 = vld [vmem:[%s947_s1 + $0x40] ss:$8 sps:$4 sm:$0xff]   ;;  %v670_v9 = vld [vmem:[%s947_s1 + $0x34] ss:$8 sps:$4 sm:$0xff]   ;;  %v672_v10 = vld [vmem:[%s947_s1 + $0x30] ss:$8 sps:$4 sm:$0xff]  }
  0x10   :  { %225 = vmatprep.subr.bf16.mxu0 %v661_v3  ;;  %641 = vmatprep.subr.bf16.mxu1 %v661_v3  ;;  %v673_v11 = vld [vmem:[%s947_s1 + $0x24] ss:$8 sps:$4 sm:$0xff]   ;;  %v675_v12 = vld [vmem:[%s947_s1 + $0x20] ss:$8 sps:$4 sm:$0xff]   ;;  %v676_v13 = vld [vmem:[%s947_s1 + $0x14] ss:$8 sps:$4 sm:$0xff]  }
  0x11   :  { %v678_v14 = vld [vmem:[%s947_s1 + $0x10] ss:$8 sps:$4 sm:$0xff]   ;;  %v679_v15 = vld [vmem:[%s947_s1 + $0x4] ss:$8 sps:$4 sm:$0xff]   ;;  %v681_v16 = vld [vmem:[%s947_s1] ss:$8 sps:$4 sm:$0xff]  }
  0x12   :  { %v683_v18 = vld [vmem:[%s946_s0 + $0x30] sm:$0xff]   ;;  %v684_v19 = vld [vmem:[%s946_s0 + $0x8] sm:$0xff]   ;;  %v685_v20 = vld [vmem:[%s946_s0 + $0x38] sm:$0xff]   ;;  %v68_v29 = vshrl.u32 %v67_v28, 7 }
  0x13   :  { %226 = vmatpush1.bf16.msra.mxu0 %v663_v4  ;;  %649 = vmatpush1.bf16.msra.mxu1 %v663_v4  ;;  %v686_v21 = vld [vmem:[%s946_s0 + $0x10] sm:$0xff]   ;;  %v687_v22 = vld [vmem:[%s946_s0 + $0x40] sm:$0xff]   ;;  %v688_v23 = vld [vmem:[%s946_s0 + $0x18] sm:$0xff]  }
  0x14   :  { %227 = vmatprep.subr.bf16.mxu0 %v664_v5  ;;  %642 = vmatprep.subr.bf16.mxu1 %v664_v5  ;;  %v689_v24 = vld [vmem:[%s946_s0 + $0x48] sm:$0xff]   ;;  %v690_v25 = vld [vmem:[%s946_s0 + $0x20] sm:$0xff]   ;;  %v691_v26 = vld [vmem:[%s946_s0 + $0x50] sm:$0xff]   ;;  %v69_v30 = vsub.s32 0, %v68_v29  ;;  %v73_v32 = vsub.s32 1, %v68_v29 }
  0x15   :  { %v692_v27 = vld [vmem:[%s946_s0 + $0x28] sm:$0xff]   ;;  %v65_v31 = vld [vmem:[#allocation2] sm:$0x3] }
  0x16   :  { %v832_v33 = vrot.slane %v65_v31, %v69_v30  ;;  %v834_v34 = vrot.slane %v65_v31, %v73_v32 }
  0x17   :  { %228 = vmatpush1.bf16.msra.mxu0 %v666_v6  ;;  %650 = vmatpush1.bf16.msra.mxu1 %v666_v6 }
  0x18   :  { %229 = vmatprep.subr.bf16.mxu0 %v667_v7  ;;  %643 = vmatprep.subr.bf16.mxu1 %v667_v7 }
  0x1b   :  { %230 = vmatpush1.bf16.msra.mxu0 %v669_v8  ;;  %651 = vmatpush1.bf16.msra.mxu1 %v669_v8 }
  0x1c   :  { %231 = vmatprep.subr.bf16.mxu0 %v670_v9  ;;  %644 = vmatprep.subr.bf16.mxu1 %v670_v9 }
  0x1f   :  { %232 = vmatpush1.bf16.msra.mxu0 %v672_v10  ;;  %652 = vmatpush1.bf16.msra.mxu1 %v672_v10 }
  0x20   :  { %233 = vmatprep.subr.bf16.mxu0 %v673_v11  ;;  %645 = vmatprep.subr.bf16.mxu1 %v673_v11 }
  0x23   :  { %234 = vmatpush1.bf16.msra.mxu0 %v675_v12  ;;  %653 = vmatpush1.bf16.msra.mxu1 %v675_v12 }
  0x24   :  { %235 = vmatprep.subr.bf16.mxu0 %v676_v13  ;;  %646 = vmatprep.subr.bf16.mxu1 %v676_v13 }
  0x27   :  { %236 = vmatpush1.bf16.msra.mxu0 %v678_v14  ;;  %654 = vmatpush1.bf16.msra.mxu1 %v678_v14 }
  0x28   :  { %237 = vmatprep.subr.bf16.mxu0 %v679_v15  ;;  %647 = vmatprep.subr.bf16.mxu1 %v679_v15 }
  0x2b   :  { %238 = vmatpush1.bf16.msra.mxu0 %v681_v16  ;;  %655 = vmatpush1.bf16.msra.mxu1 %v681_v16 }
  0x2e   :  { %256 = vmatmul.mubr.bf16.vlgmr.msra.gmra.mxu0 %v682_v17  ;;  %316 = vmatmul.mubr.bf16.vlgmr.msra.gmra.mxu1 %v683_v18 }
  0x2f   :  { %265 = vmatprep.mubr.bf16.mxu0 %v716_v0  ;;  %325 = vmatprep.mubr.bf16.mxu1 %v716_v0 }
  0x36   :  { %266 = vmatmul.mubr.bf16.gmra.mxu0 %v684_v19  ;;  %326 = vmatmul.mubr.bf16.gmra.mxu1 %v685_v20 }
  0x37   :  { %275 = vmatprep.mubr.bf16.mxu0 %v716_v0  ;;  %335 = vmatprep.mubr.bf16.mxu1 %v716_v0 }
  0x3e   :  { %276 = vmatmul.mubr.bf16.gmra.mxu0 %v686_v21  ;;  %336 = vmatmul.mubr.bf16.gmra.mxu1 %v687_v22 }
  0x3f   :  { %285 = vmatprep.mubr.bf16.mxu0 %v716_v0  ;;  %345 = vmatprep.mubr.bf16.mxu1 %v716_v0 }
  0x46   :  { %286 = vmatmul.mubr.bf16.gmra.mxu0 %v688_v23  ;;  %346 = vmatmul.mubr.bf16.gmra.mxu1 %v689_v24 }
  0x47   :  { %295 = vmatprep.mubr.bf16.mxu0 %v716_v0  ;;  %355 = vmatprep.mubr.bf16.mxu1 %v716_v0 }
  0x4e   :  { %296 = vmatmul.mubr.bf16.gmra.mxu0 %v690_v25  ;;  %356 = vmatmul.mubr.bf16.gmra.mxu1 %v691_v26 }
  0x4f   :  { %305 = vmatprep.mubr.bf16.mxu0 %v716_v0 }
  0x56   :  { %306 = vmatmul.mubr.bf16.gmra.mxu0 %v692_v27 }
  0xee   :  { %v257_v35 = vpop.f32.mrf.mxu0  ;;  %v317_v36 = vpop.f32.mrf.mxu1 }
  0xef   :  { %v258_v37 = vadd.f32 %v257_v35, %v832_v33  ;;  %v318_v38 = vadd.f32 %v317_v36, %v832_v33 }
  0xf0   :  { %v259_v39 = vpop.f32.mrf.mxu0  ;;  %v319_v40 = vpop.f32.mrf.mxu1 }
  0xf1   :  { %v260_v41 = vadd.f32 %v259_v39, %v834_v34  ;;  %v390_v42 = vmax.f32 %v318_v38, 0.0  ;;  %v320_v43 = vadd.f32 %v319_v40, %v834_v34  ;;  %v366_v44 = vmax.f32 %v258_v37, 0.0 }
  0xf2   :  { %v261_v45 = vpop.f32.mrf.mxu0  ;;  %v321_v46 = vpop.f32.mrf.mxu1 }
  0xf3   :  { %v367_v47 = vmax.f32 %v260_v41, 0.0  ;;  %v262_v48 = vadd.f32 %v261_v45, %v832_v33  ;;  %v391_v49 = vmax.f32 %v320_v43, 0.0  ;;  %v322_v50 = vadd.f32 %v321_v46, %v832_v33 }
  0xf4   :  { %v263_v51 = vpop.f32.mrf.mxu0  ;;  %v323_v52 = vpop.f32.mrf.mxu1 }
  0xf5   :  { %v618_v53 = vpack.c.bf16 %v367_v47, %v366_v44  ;;  %v630_v54 = vpack.c.bf16 %v391_v49, %v390_v42  ;;  %v264_v55 = vadd.f32 %v263_v51, %v834_v34  ;;  %v392_v56 = vmax.f32 %v322_v50, 0.0 }
  0xf6   :  { %v267_v57 = vpop.f32.mrf.mxu0  ;;  %v324_v58 = vadd.f32 %v323_v52, %v834_v34  ;;  %v327_v59 = vpop.f32.mrf.mxu1  ;;  %v368_v60 = vmax.f32 %v262_v48, 0.0 }
  0xf7   :  { %542 = vst [vmem:[%s949_s3] sm:$0xff] %v618_v53  ;;  %554 = vst [vmem:[%s949_s3 + $0x60] sm:$0xff] %v630_v54  ;;  %v369_v61 = vmax.f32 %v264_v55, 0.0  ;;  %v268_v62 = vadd.f32 %v267_v57, %v832_v33  ;;  %v328_v63 = vadd.f32 %v327_v59, %v832_v33 }
  0xf8   :  { %v393_v0 = vmax.f32 %v324_v58, 0.0  ;;  %v269_v1 = vpop.f32.mrf.mxu0  ;;  %v329_v2 = vpop.f32.mrf.mxu1 }
  0xf9   :  { %v619_v3 = vpack.c.bf16 %v369_v61, %v368_v60  ;;  %v270_v4 = vadd.f32 %v269_v1, %v834_v34  ;;  %v394_v6 = vmax.f32 %v328_v63, 0.0  ;;  %v330_v8 = vadd.f32 %v329_v2, %v834_v34 }
  0xfa   :  { %v631_v5 = vpack.c.bf16 %v393_v0, %v392_v56  ;;  %v271_v7 = vpop.f32.mrf.mxu0  ;;  %v331_v9 = vpop.f32.mrf.mxu1  ;;  %v370_v10 = vmax.f32 %v268_v62, 0.0 }
  0xfb   :  { %543 = vst [vmem:[%s949_s3 + $0x8] sm:$0xff] %v619_v3  ;;  %v371_v11 = vmax.f32 %v270_v4, 0.0  ;;  %v272_v12 = vadd.f32 %v271_v7, %v832_v33  ;;  %v332_v13 = vadd.f32 %v331_v9, %v832_v33  ;;  %v395_v14 = vmax.f32 %v330_v8, 0.0 }
  0xfc   :  { %555 = vst [vmem:[%s949_s3 + $0x68] sm:$0xff] %v631_v5  ;;  %v273_v15 = vpop.f32.mrf.mxu0  ;;  %v333_v16 = vpop.f32.mrf.mxu1 }
  0xfd   :  { %v620_v17 = vpack.c.bf16 %v371_v11, %v370_v10  ;;  %v274_v18 = vadd.f32 %v273_v15, %v834_v34  ;;  %v632_v19 = vpack.c.bf16 %v395_v14, %v394_v6  ;;  %v396_v20 = vmax.f32 %v332_v13, 0.0 }
  0xfe   :  { %v277_v21 = vpop.f32.mrf.mxu0  ;;  %v334_v22 = vadd.f32 %v333_v16, %v834_v34  ;;  %v337_v23 = vpop.f32.mrf.mxu1  ;;  %v372_v24 = vmax.f32 %v272_v12, 0.0 }
  0xff   :  { %544 = vst [vmem:[%s949_s3 + $0x10] sm:$0xff] %v620_v17  ;;  %v373_v25 = vmax.f32 %v274_v18, 0.0  ;;  %v278_v26 = vadd.f32 %v277_v21, %v832_v33  ;;  %v338_v27 = vadd.f32 %v337_v23, %v832_v33  ;;  %556 = vst [vmem:[%s949_s3 + $0x70] sm:$0xff] %v632_v19 }
 0x100   :  { %v397_v28 = vmax.f32 %v334_v22, 0.0  ;;  %v279_v29 = vpop.f32.mrf.mxu0  ;;  %v339_v30 = vpop.f32.mrf.mxu1 }
 0x101   :  { %v621_v31 = vpack.c.bf16 %v373_v25, %v372_v24  ;;  %v280_v32 = vadd.f32 %v279_v29, %v834_v34  ;;  %v398_v36 = vmax.f32 %v338_v27, 0.0  ;;  %v340_v38 = vadd.f32 %v339_v30, %v834_v34 }
 0x102   :  { %v633_v35 = vpack.c.bf16 %v397_v28, %v396_v20  ;;  %v281_v37 = vpop.f32.mrf.mxu0  ;;  %v341_v39 = vpop.f32.mrf.mxu1  ;;  %v374_v40 = vmax.f32 %v278_v26, 0.0 }
 0x103   :  { %545 = vst [vmem:[%s949_s3 + $0x18] sm:$0xff] %v621_v31  ;;  %v375_v41 = vmax.f32 %v280_v32, 0.0  ;;  %v282_v42 = vadd.f32 %v281_v37, %v832_v33  ;;  %v342_v43 = vadd.f32 %v341_v39, %v832_v33  ;;  %v399_v44 = vmax.f32 %v340_v38, 0.0 }
 0x104   :  { %557 = vst [vmem:[%s949_s3 + $0x78] sm:$0xff] %v633_v35  ;;  %v283_v45 = vpop.f32.mrf.mxu0  ;;  %v343_v46 = vpop.f32.mrf.mxu1 }
 0x105   :  { %v622_v47 = vpack.c.bf16 %v375_v41, %v374_v40  ;;  %v284_v48 = vadd.f32 %v283_v45, %v834_v34  ;;  %v634_v49 = vpack.c.bf16 %v399_v44, %v398_v36  ;;  %v400_v50 = vmax.f32 %v342_v43, 0.0 }
 0x106   :  { %v287_v51 = vpop.f32.mrf.mxu0  ;;  %v344_v52 = vadd.f32 %v343_v46, %v834_v34  ;;  %v347_v53 = vpop.f32.mrf.mxu1  ;;  %v376_v54 = vmax.f32 %v282_v42, 0.0 }
 0x107   :  { %546 = vst [vmem:[%s949_s3 + $0x20] sm:$0xff] %v622_v47  ;;  %v377_v55 = vmax.f32 %v284_v48, 0.0  ;;  %v288_v56 = vadd.f32 %v287_v51, %v832_v33  ;;  %v348_v57 = vadd.f32 %v347_v53, %v832_v33  ;;  %558 = vst [vmem:[%s949_s3 + $0x80] sm:$0xff] %v634_v49 }
 0x108   :  { %v401_v58 = vmax.f32 %v344_v52, 0.0  ;;  %v289_v59 = vpop.f32.mrf.mxu0  ;;  %v349_v60 = vpop.f32.mrf.mxu1 }
 0x109   :  { %v623_v61 = vpack.c.bf16 %v377_v55, %v376_v54  ;;  %v290_v62 = vadd.f32 %v289_v59, %v834_v34  ;;  %v402_v0 = vmax.f32 %v348_v57, 0.0  ;;  %v350_v2 = vadd.f32 %v349_v60, %v834_v34 }
 0x10a   :  { %v635_v63 = vpack.c.bf16 %v401_v58, %v400_v50  ;;  %v291_v1 = vpop.f32.mrf.mxu0  ;;  %v351_v3 = vpop.f32.mrf.mxu1  ;;  %v378_v4 = vmax.f32 %v288_v56, 0.0 }
 0x10b   :  { %547 = vst [vmem:[%s949_s3 + $0x28] sm:$0xff] %v623_v61  ;;  %v379_v5 = vmax.f32 %v290_v62, 0.0  ;;  %v292_v6 = vadd.f32 %v291_v1, %v832_v33  ;;  %v352_v7 = vadd.f32 %v351_v3, %v832_v33  ;;  %v403_v8 = vmax.f32 %v350_v2, 0.0 }
 0x10c   :  { %559 = vst [vmem:[%s949_s3 + $0x88] sm:$0xff] %v635_v63  ;;  %v293_v9 = vpop.f32.mrf.mxu0  ;;  %v353_v10 = vpop.f32.mrf.mxu1 }
 0x10d   :  { %v624_v11 = vpack.c.bf16 %v379_v5, %v378_v4  ;;  %v294_v12 = vadd.f32 %v293_v9, %v834_v34  ;;  %v636_v13 = vpack.c.bf16 %v403_v8, %v402_v0  ;;  %v404_v14 = vmax.f32 %v352_v7, 0.0 }
 0x10e   :  { %v297_v15 = vpop.f32.mrf.mxu0  ;;  %v354_v16 = vadd.f32 %v353_v10, %v834_v34  ;;  %v357_v17 = vpop.f32.mrf.mxu1  ;;  %v380_v18 = vmax.f32 %v292_v6, 0.0 }
 0x10f   :  { %548 = vst [vmem:[%s949_s3 + $0x30] sm:$0xff] %v624_v11  ;;  %v381_v19 = vmax.f32 %v294_v12, 0.0  ;;  %v298_v20 = vadd.f32 %v297_v15, %v832_v33  ;;  %v358_v21 = vadd.f32 %v357_v17, %v832_v33  ;;  %560 = vst [vmem:[%s949_s3 + $0x90] sm:$0xff] %v636_v13 }
 0x110   :  { %v405_v22 = vmax.f32 %v354_v16, 0.0  ;;  %v299_v23 = vpop.f32.mrf.mxu0  ;;  %v359_v24 = vpop.f32.mrf.mxu1 }
 0x111   :  { %v625_v25 = vpack.c.bf16 %v381_v19, %v380_v18  ;;  %v300_v26 = vadd.f32 %v299_v23, %v834_v34  ;;  %v406_v28 = vmax.f32 %v358_v21, 0.0  ;;  %v360_v30 = vadd.f32 %v359_v24, %v834_v34 }
 0x112   :  { %v637_v27 = vpack.c.bf16 %v405_v22, %v404_v14  ;;  %v301_v29 = vpop.f32.mrf.mxu0  ;;  %v361_v31 = vpop.f32.mrf.mxu1  ;;  %v382_v32 = vmax.f32 %v298_v20, 0.0 }
 0x113   :  { %549 = vst [vmem:[%s949_s3 + $0x38] sm:$0xff] %v625_v25  ;;  %v383_v35 = vmax.f32 %v300_v26, 0.0  ;;  %v302_v36 = vadd.f32 %v301_v29, %v832_v33  ;;  %v362_v37 = vadd.f32 %v361_v31, %v832_v33  ;;  %v407_v38 = vmax.f32 %v360_v30, 0.0 }
 0x114   :  { %561 = vst [vmem:[%s949_s3 + $0x98] sm:$0xff] %v637_v27  ;;  %v303_v39 = vpop.f32.mrf.mxu0  ;;  %v363_v40 = vpop.f32.mrf.mxu1 }
 0x115   :  { %v626_v41 = vpack.c.bf16 %v383_v35, %v382_v32  ;;  %v304_v42 = vadd.f32 %v303_v39, %v834_v34  ;;  %v638_v43 = vpack.c.bf16 %v407_v38, %v406_v28  ;;  %v408_v44 = vmax.f32 %v362_v37, 0.0 }
 0x116   :  { %v307_v45 = vpop.f32.mrf.mxu0  ;;  %v364_v46 = vadd.f32 %v363_v40, %v834_v34  ;;  %v384_v47 = vmax.f32 %v302_v36, 0.0 }
 0x117   :  { %550 = vst [vmem:[%s949_s3 + $0x40] sm:$0xff] %v626_v41  ;;  %v385_v48 = vmax.f32 %v304_v42, 0.0  ;;  %v308_v49 = vadd.f32 %v307_v45, %v832_v33  ;;  %562 = vst [vmem:[%s949_s3 + $0xa0] sm:$0xff] %v638_v43 }
 0x118   :  { %v409_v50 = vmax.f32 %v364_v46, 0.0  ;;  %v309_v51 = vpop.f32.mrf.mxu0 }
 0x119   :  { %v627_v52 = vpack.c.bf16 %v385_v48, %v384_v47  ;;  %v310_v53 = vadd.f32 %v309_v51, %v834_v34  ;;  %v386_v56 = vmax.f32 %v308_v49, 0.0 }
 0x11a   :  { %v639_v54 = vpack.c.bf16 %v409_v50, %v408_v44  ;;  %v311_v55 = vpop.f32.mrf.mxu0 }
 0x11b   :  { %551 = vst [vmem:[%s949_s3 + $0x48] sm:$0xff] %v627_v52  ;;  %v387_v57 = vmax.f32 %v310_v53, 0.0  ;;  %v312_v58 = vadd.f32 %v311_v55, %v832_v33 }
 0x11c   :  { %563 = vst [vmem:[%s949_s3 + $0xa8] sm:$0xff] %v639_v54  ;;  %v313_v59 = vpop.f32.mrf.mxu0 }
 0x11d   :  { %v628_v60 = vpack.c.bf16 %v387_v57, %v386_v56  ;;  %v314_v61 = vadd.f32 %v313_v59, %v834_v34  ;;  %v388_v62 = vmax.f32 %v312_v58, 0.0 }
 0x11f   :  { %552 = vst [vmem:[%s949_s3 + $0x50] sm:$0xff] %v628_v60  ;;  %v389_v63 = vmax.f32 %v314_v61, 0.0 }
 0x121   :  { %v629_v0 = vpack.c.bf16 %v389_v63, %v388_v62 }
 0x123   :  { %553 = vst [vmem:[%s949_s3 + $0x58] sm:$0xff] %v629_v0 }
 0x124   :  { %568 = vsyncpa [#allocation3], 1 }

// kernel: mnist_forward.4
= control target key start
LH: loop header
LB: loop body
LE: loop exit
PB: predicated region body
PF: predicated region fallthrough
CT: control target
= control target key end

     0   :  { %v3465_v0 = vmov 0   ;;  %vm1419_vm0 = vcmask 523264   ;;  %s4868_s1 = inlined_call_operand.vmem [shape: bf16[576,128], index: 1, kind: input, shape index: {}]   ;;  %s4869_s0 = inlined_call_operand.vmem [shape: bf16[4,144,576], index: 0, kind: input, shape index: {}]   ;;  %s4870_s2 = inlined_call_operand.vmem [shape: f32[1,128], index: 2, kind: input, shape index: {}]   ;;  %s4871_s3 = inlined_call_operand.vmem [shape: bf16[144,128], index: 3, kind: output, shape index: {}]  }
   0x1   :  { %1528 = vmatprep.subr.bf16.mxu0 %v3465_v0  ;;  %3144 = vmatprep.subr.bf16.mxu1 %v3465_v0  ;;  %v3177_v1 = vld [vmem:[%s4868_s1 + $0x38] sm:$0xff]   ;;  %v3178_v2 = vld [vmem:[%s4868_s1 + $0x30] sm:$0xff]   ;;  %v3179_v3 = vld [vmem:[%s4868_s1 + $0x28] sm:$0xff]  }
   0x2   :  { %1529 = vmatpush1.bf16.msra.mxu0 %v3177_v1  ;;  %3160 = vmatpush1.bf16.msra.mxu1 %v3177_v1  ;;  %v3180_v4 = vld [vmem:[%s4868_s1 + $0x20] sm:$0xff]   ;;  %v3181_v5 = vld [vmem:[%s4868_s1 + $0x18] sm:$0xff]   ;;  %v3182_v7 = vld [vmem:[%s4868_s1 + $0x10] sm:$0xff]  }
   0x3   :  { %1530 = vmatprep.subr.bf16.mxu0 %v3465_v0  ;;  %3145 = vmatprep.subr.bf16.mxu1 %v3465_v0  ;;  %v3195_v6 = vld [vmem:[%s4869_s0 + $0x4] ss:$20 sps:$4 sm:$0xff]   ;;  %v3198_v8 = vld [vmem:[%s4869_s0 + $0x43c] ss:$20 sps:$4 sm:$0xff]   ;;  %v3183_v9 = vld [vmem:[%s4868_s1 + $0x8] sm:$0xff]  }
   0x4   :  { %1560 = vmatprep.mubr.bf16.mxu0 %v3195_v6  ;;  %1776 = vmatprep.mubr.bf16.mxu1 %v3198_v8  ;;  %v3184_v10 = vld [vmem:[%s4868_s1] sm:$0xff]   ;;  %v3185_v11 = vld [vmem:[%s4868_s1 + $0x78] sm:$0xff]   ;;  %v3186_v12 = vld [vmem:[%s4868_s1 + $0x70] sm:$0xff]  }
   0x5   :  { %v3187_v13 = vld [vmem:[%s4868_s1 + $0x68] sm:$0xff]   ;;  %v3188_v14 = vld [vmem:[%s4868_s1 + $0x60] sm:$0xff]   ;;  %v3189_v15 = vld [vmem:[%s4868_s1 + $0x58] sm:$0xff]  }
   0x6   :  { %1531 = vmatpush1.bf16.msra.mxu0 %v3178_v2  ;;  %3161 = vmatpush1.bf16.msra.mxu1 %v3178_v2  ;;  %v3190_v16 = vld [vmem:[%s4868_s1 + $0x50] sm:$0xff]   ;;  %v3191_v17 = vld [vmem:[%s4868_s1 + $0x48] sm:$0xff]   ;;  %v3192_v18 = vld [vmem:[%s4868_s1 + $0x40] sm:$0xff]  }
   0x7   :  { %1532 = vmatprep.subr.bf16.mxu0 %v3465_v0  ;;  %3146 = vmatprep.subr.bf16.mxu1 %v3465_v0  ;;  %v3199_v19 = vld [vmem:[%s4868_s1 + $0x118] sm:$0xff]   ;;  %v3193_v20 = vld [vmem:[%s4869_s0] ss:$20 sps:$4 sm:$0xff]   ;;  %v3208_v29 = vld [vmem:[%s4868_s1 + $0xa8] sm:$0xff]  }
   0x8   :  { %v3196_v21 = vld [vmem:[%s4869_s0 + $0x438] ss:$20 sps:$4 sm:$0xff]   ;;  %v3248_v25 = vld [vmem:[%s4868_s1 + $0x110] sm:$0xff]   ;;  %v3206_v27 = vld [vmem:[%s4869_s0 + $0x28] ss:$20 sps:$4 sm:$0xff]  }
   0x9   :  { %v3200_v22 = vld [vmem:[%s4868_s1 + $0xb8] sm:$0xff]   ;;  %v3202_v23 = vld [vmem:[%s4869_s0 + $0x2c] ss:$20 sps:$4 sm:$0xff]   ;;  %v3201_v26 = vld [vmem:[%s4868_s1 + $0xb0] sm:$0xff]  }
   0xa   :  { %1533 = vmatpush1.bf16.msra.mxu0 %v3179_v3  ;;  %3162 = vmatpush1.bf16.msra.mxu1 %v3179_v3  ;;  %v3204_v24 = vld [vmem:[%s4869_s0 + $0x464] ss:$20 sps:$4 sm:$0xff]   ;;  %v3207_v28 = vld [vmem:[%s4869_s0 + $0x460] ss:$20 sps:$4 sm:$0xff]   ;;  %v3295_v32 = vld [vmem:[%s4868_s1 + $0x108] sm:$0xff]  }
   0xb   :  { %1534 = vmatprep.subr.bf16.mxu0 %v3465_v0  ;;  %3147 = vmatprep.subr.bf16.mxu1 %v3465_v0  ;;  %v3209_v30 = vld [vmem:[%s4869_s0 + $0x54] ss:$20 sps:$4 sm:$0xff]   ;;  %v3211_v31 = vld [vmem:[%s4869_s0 + $0x48c] ss:$20 sps:$4 sm:$0xff]   ;;  %v3214_v34 = vld [vmem:[%s4869_s0 + $0x50] ss:$20 sps:$4 sm:$0xff]  }
   0xc   :  { %v3213_v33 = vld [vmem:[%s4868_s1 + $0xa0] sm:$0xff]   ;;  %v3215_v35 = vld [vmem:[%s4869_s0 + $0x488] ss:$20 sps:$4 sm:$0xff]   ;;  %v3223_v39 = vld [vmem:[%s4868_s1 + $0x90] sm:$0xff]  }
   0xd   :  { %v3216_v36 = vld [vmem:[%s4868_s1 + $0x98] sm:$0xff]   ;;  %v3219_v38 = vld [vmem:[%s4869_s0 + $0x4b4] ss:$20 sps:$4 sm:$0xff]   ;;  %v3222_v41 = vld [vmem:[%s4869_s0 + $0x4b0] ss:$20 sps:$4 sm:$0xff]  }
   0xe   :  { %1535 = vmatpush1.bf16.msra.mxu0 %v3180_v4  ;;  %3163 = vmatpush1.bf16.msra.mxu1 %v3180_v4  ;;  %v3217_v37 = vld [vmem:[%s4869_s0 + $0x7c] ss:$20 sps:$4 sm:$0xff]   ;;  %v3221_v40 = vld [vmem:[%s4869_s0 + $0x78] ss:$20 sps:$4 sm:$0xff]   ;;  %v3231_v45 = vld [vmem:[%s4868_s1 + $0x80] sm:$0xff]  }
   0xf   :  { %1536 = vmatprep.subr.bf16.mxu0 %v3465_v0  ;;  %3148 = vmatprep.subr.bf16.mxu1 %v3465_v0  ;;  %v3224_v42 = vld [vmem:[%s4868_s1 + $0x88] sm:$0xff]   ;;  %v3225_v43 = vld [vmem:[%s4869_s0 + $0xa4] ss:$20 sps:$4 sm:$0xff]   ;;  %v3227_v44 = vld [vmem:[%s4869_s0 + $0x4dc] ss:$20 sps:$4 sm:$0xff]  }
  0x10   :  { %v3229_v46 = vld [vmem:[%s4869_s0 + $0xa0] ss:$20 sps:$4 sm:$0xff]   ;;  %v3230_v47 = vld [vmem:[%s4869_s0 + $0x4d8] ss:$20 sps:$4 sm:$0xff]   ;;  %v3237_v53 = vld [vmem:[%s4869_s0 + $0xc8] ss:$20 sps:$4 sm:$0xff]  }
  0x11   :  { %v3232_v48 = vld [vmem:[%s4868_s1 + $0xf8] sm:$0xff]   ;;  %v3233_v49 = vld [vmem:[%s4869_s0 + $0xcc] ss:$20 sps:$4 sm:$0xff]   ;;  %v3239_v52 = vld [vmem:[%s4868_s1 + $0xf0] sm:$0xff]  }
  0x12   :  { %1537 = vmatpush1.bf16.msra.mxu0 %v3181_v5  ;;  %3164 = vmatpush1.bf16.msra.mxu1 %v3181_v5  ;;  %v3235_v50 = vld [vmem:[%s4869_s0 + $0x504] ss:$20 sps:$4 sm:$0xff]   ;;  %v3238_v54 = vld [vmem:[%s4869_s0 + $0x500] ss:$20 sps:$4 sm:$0xff]   ;;  %v3240_v55 = vld [vmem:[%s4868_s1 + $0xe8] sm:$0xff]  }
  0x13   :  { %1538 = vmatprep.subr.bf16.mxu0 %v3465_v0  ;;  %3149 = vmatprep.subr.bf16.mxu1 %v3465_v0  ;;  %v3338_v51 = vld [vmem:[%s4868_s1 + $0x100] sm:$0xff]   ;;  %v3241_v56 = vld [vmem:[%s4869_s0 + $0xf4] ss:$20 sps:$4 sm:$0xff]   ;;  %v3249_v61 = vld [vmem:[%s4869_s0 + $0x11c] ss:$20 sps:$4 sm:$0xff]  }
  0x14   :  { %v3243_v57 = vld [vmem:[%s4869_s0 + $0x52c] ss:$20 sps:$4 sm:$0xff]   ;;  %v3245_v59 = vld [vmem:[%s4869_s0 + $0xf0] ss:$20 sps:$4 sm:$0xff]   ;;  %v3246_v60 = vld [vmem:[%s4869_s0 + $0x528] ss:$20 sps:$4 sm:$0xff]  }
  0x15   :  { %v3247_v58 = vld [vmem:[%s4868_s1 + $0xe0] sm:$0xff]   ;;  %v3251_v62 = vld [vmem:[%s4869_s0 + $0x554] ss:$20 sps:$4 sm:$0xff]   ;;  %v3253_v63 = vld [vmem:[%s4868_s1 + $0xd8] sm:$0xff]  }
  0x16   :  { %1539 = vmatpush1.bf16.msra.mxu0 %v3182_v7  ;;  %3165 = vmatpush1.bf16.msra.mxu1 %v3182_v7  ;;  %v3256_v1 = vld [vmem:[%s4868_s1 + $0xd0] sm:$0xff]   ;;  %v3254_v2 = vld [vmem:[%s4869_s0 + $0x118] ss:$20 sps:$4 sm:$0xff]   ;;  %v3264_v7 = vld [vmem:[%s4868_s1 + $0xc0] sm:$0xff]  }
  0x17   :  { %1540 = vmatprep.subr.bf16.mxu0 %v3465_v0  ;;  %3150 = vmatprep.subr.bf16.mxu1 %v3465_v0  ;;  %v3255_v3 = vld [vmem:[%s4869_s0 + $0x550] ss:$20 sps:$4 sm:$0xff]   ;;  %v3263_v6 = vld [vmem:[%s4868_s1 + $0xc8] sm:$0xff]   ;;  %v3261_v8 = vld [vmem:[%s4869_s0 + $0x140] ss:$20 sps:$4 sm:$0xff]  }
  0x18   :  { %v3257_v4 = vld [vmem:[%s4869_s0 + $0x144] ss:$20 sps:$4 sm:$0xff]   ;;  %v3259_v5 = vld [vmem:[%s4869_s0 + $0x57c] ss:$20 sps:$4 sm:$0xff]  }
  0x1a   :  { %1541 = vmatpush1.bf16.msra.mxu0 %v3183_v9  ;;  %3166 = vmatpush1.bf16.msra.mxu1 %v3183_v9  ;;  %v3262_v9 = vld [vmem:[%s4869_s0 + $0x578] ss:$20 sps:$4 sm:$0xff]  }
  0x1b   :  { %1542 = vmatprep.subr.bf16.mxu0 %v3465_v0  ;;  %3151 = vmatprep.subr.bf16.mxu1 %v3465_v0 }
  0x1e   :  { %1543 = vmatpush1.bf16.msra.mxu0 %v3184_v10  ;;  %3167 = vmatpush1.bf16.msra.mxu1 %v3184_v10  ;;  %v3265_v10 = vld [vmem:[%s4869_s0 + $0x16c] ss:$20 sps:$4 sm:$0xff]  }
  0x1f   :  { %1544 = vmatprep.subr.bf16.mxu0 %v3465_v0  ;;  %3152 = vmatprep.subr.bf16.mxu1 %v3465_v0 }
  0x22   :  { %1545 = vmatpush2.bf16.msra.mxu0 %v3185_v11  ;;  %3168 = vmatpush2.bf16.msra.mxu1 %v3185_v11  ;;  %v3269_v11 = vld [vmem:[%s4869_s0 + $0xc] ss:$20 sps:$4 sm:$0xff]  }
  0x23   :  { %1546 = vmatprep.subr.bf16.mxu0 %v3465_v0  ;;  %3153 = vmatprep.subr.bf16.mxu1 %v3465_v0 }
  0x26   :  { %1547 = vmatpush2.bf16.msra.mxu0 %v3186_v12  ;;  %3169 = vmatpush2.bf16.msra.mxu1 %v3186_v12  ;;  %v3267_v12 = vld [vmem:[%s4869_s0 + $0x8] ss:$20 sps:$4 sm:$0xff]  }
  0x27   :  { %1548 = vmatprep.subr.bf16.mxu0 %v3465_v0  ;;  %3154 = vmatprep.subr.bf16.mxu1 %v3465_v0 }
  0x2a   :  { %1549 = vmatpush2.bf16.msra.mxu0 %v3187_v13  ;;  %3170 = vmatpush2.bf16.msra.mxu1 %v3187_v13  ;;  %v3271_v13 = vld [vmem:[%s4869_s0 + $0x194] ss:$20 sps:$4 sm:$0xff]  }
  0x2b   :  { %1550 = vmatprep.subr.bf16.mxu0 %v3465_v0  ;;  %3155 = vmatprep.subr.bf16.mxu1 %v3465_v0 }
  0x2e   :  { %1551 = vmatpush2.bf16.msra.mxu0 %v3188_v14  ;;  %3171 = vmatpush2.bf16.msra.mxu1 %v3188_v14  ;;  %v3273_v14 = vld [vmem:[%s4869_s0 + $0x34] ss:$20 sps:$4 sm:$0xff]  }
  0x2f   :  { %1552 = vmatprep.subr.bf16.mxu0 %v3465_v0  ;;  %3156 = vmatprep.subr.bf16.mxu1 %v3465_v0 }
  0x32   :  { %1553 = vmatpush2.bf16.msra.mxu0 %v3189_v15  ;;  %3172 = vmatpush2.bf16.msra.mxu1 %v3189_v15  ;;  %v3275_v15 = vld [vmem:[%s4869_s0 + $0x190] ss:$20 sps:$4 sm:$0xff]  }
  0x33   :  { %1554 = vmatprep.subr.bf16.mxu0 %v3465_v0  ;;  %3157 = vmatprep.subr.bf16.mxu1 %v3465_v0 }
  0x36   :  { %1555 = vmatpush2.bf16.msra.mxu0 %v3190_v16  ;;  %3173 = vmatpush2.bf16.msra.mxu1 %v3190_v16  ;;  %v3276_v16 = vld [vmem:[%s4869_s0 + $0x30] ss:$20 sps:$4 sm:$0xff]  }
  0x37   :  { %1556 = vmatprep.subr.bf16.mxu0 %v3465_v0  ;;  %3158 = vmatprep.subr.bf16.mxu1 %v3465_v0 }
  0x3a   :  { %1557 = vmatpush2.bf16.msra.mxu0 %v3191_v17  ;;  %3174 = vmatpush2.bf16.msra.mxu1 %v3191_v17  ;;  %v3277_v17 = vld [vmem:[%s4869_s0 + $0x1bc] ss:$20 sps:$4 sm:$0xff]  }
  0x3b   :  { %1558 = vmatprep.subr.bf16.mxu0 %v3465_v0  ;;  %3159 = vmatprep.subr.bf16.mxu1 %v3465_v0 }
  0x3e   :  { %1559 = vmatpush2.bf16.msra.mxu0 %v3192_v18  ;;  %3175 = vmatpush2.bf16.msra.mxu1 %v3192_v18  ;;  %v3279_v18 = vld [vmem:[%s4869_s0 + $0x5c] ss:$20 sps:$4 sm:$0xff]  }
  0x3f   :  { %1849 = vmatprep.subr.bf16.mxu1 %v3465_v0  ;;  %3064 = vmatprep.subr.bf16.mxu0 %v3199_v19 }
  0x41   :  { %1561 = vmatmul.mubr.bf16.vlgmr.msra.gmra.mxu0 %v3193_v20  ;;  %1777 = vmatmul.mubr.bf16.vlgmr.msra.gmra.mxu1 %v3196_v21  ;;  %v3282_v20 = vld [vmem:[%s4869_s0 + $0x58] ss:$20 sps:$4 sm:$0xff]  }
  0x42   :  { %1850 = vmatpush1.bf16.msra.mxu1 %v3200_v22  ;;  %3065 = vmatpush3.bf16.msra.mxu0 %v3199_v19  ;;  %v3281_v19 = vld [vmem:[%s4869_s0 + $0x1b8] ss:$20 sps:$4 sm:$0xff]  }
  0x43   :  { %1851 = vmatprep.subr.bf16.mxu1 %v3465_v0  ;;  %1568 = vmatprep.mubr.bf16.mxu0 %v3202_v23  ;;  %v3283_v21 = vld [vmem:[%s4869_s0 + $0x1e4] ss:$20 sps:$4 sm:$0xff]   ;;  %v3287_v23 = vld [vmem:[%s4869_s0 + $0x1e0] ss:$20 sps:$4 sm:$0xff]  }
  0x44   :  { %1784 = vmatprep.mubr.bf16.mxu1 %v3204_v24  ;;  %3066 = vmatprep.subr.bf16.mxu0 %v3248_v25  ;;  %v3285_v22 = vld [vmem:[%s4869_s0 + $0x84] ss:$20 sps:$4 sm:$0xff]   ;;  %v3288_v24 = vld [vmem:[%s4869_s0 + $0x80] ss:$20 sps:$4 sm:$0xff]  }
  0x46   :  { %1852 = vmatpush1.bf16.msra.mxu1 %v3201_v26  ;;  %3067 = vmatpush3.bf16.msra.mxu0 %v3248_v25  ;;  %v3289_v25 = vld [vmem:[%s4869_s0 + $0x20c] ss:$20 sps:$4 sm:$0xff]  }
  0x47   :  { %1853 = vmatprep.subr.bf16.mxu1 %v3465_v0  ;;  %3068 = vmatprep.subr.bf16.mxu0 %v3295_v32  ;;  %v3291_v26 = vld [vmem:[%s4869_s0 + $0xac] ss:$20 sps:$4 sm:$0xff]  }
  0x49   :  { %1569 = vmatmul.mubr.bf16.gmra.mxu0 %v3206_v27  ;;  %1785 = vmatmul.mubr.bf16.gmra.mxu1 %v3207_v28  ;;  %v3293_v27 = vld [vmem:[%s4869_s0 + $0x208] ss:$20 sps:$4 sm:$0xff]  }
  0x4a   :  { %1854 = vmatpush1.bf16.msra.mxu1 %v3208_v29  ;;  %1576 = vmatprep.mubr.bf16.mxu0 %v3209_v30  ;;  %v3294_v28 = vld [vmem:[%s4869_s0 + $0xa8] ss:$20 sps:$4 sm:$0xff]  }
  0x4b   :  { %1855 = vmatprep.subr.bf16.mxu1 %v3465_v0  ;;  %1792 = vmatprep.mubr.bf16.mxu1 %v3211_v31  ;;  %v3296_v29 = vld [vmem:[%s4869_s0 + $0x234] ss:$20 sps:$4 sm:$0xff]   ;;  %v3300_v31 = vld [vmem:[%s4869_s0 + $0x230] ss:$20 sps:$4 sm:$0xff]  }
  0x4c   :  { %3069 = vmatpush3.bf16.msra.mxu0 %v3295_v32  ;;  %v3298_v30 = vld [vmem:[%s4869_s0 + $0xd4] ss:$20 sps:$4 sm:$0xff]   ;;  %v3301_v32 = vld [vmem:[%s4869_s0 + $0xd0] ss:$20 sps:$4 sm:$0xff]  }
  0x4d   :  { %3070 = vmatprep.subr.bf16.mxu0 %v3338_v51 }
  0x4e   :  { %1856 = vmatpush1.bf16.msra.mxu1 %v3213_v33  ;;  %v3302_v33 = vld [vmem:[%s4869_s0 + $0x25c] ss:$20 sps:$4 sm:$0xff]  }
  0x4f   :  { %1857 = vmatprep.subr.bf16.mxu1 %v3465_v0 }
  0x50   :  { %3071 = vmatpush3.bf16.msra.mxu0 %v3338_v51  ;;  %v3330_v51 = vld [vmem:[%s4869_s0 + $0x2f8] ss:$20 sps:$4 sm:$0xff]  }
  0x51   :  { %1577 = vmatmul.mubr.bf16.gmra.mxu0 %v3214_v34  ;;  %1793 = vmatmul.mubr.bf16.gmra.mxu1 %v3215_v35  ;;  %v3304_v34 = vld [vmem:[%s4869_s0 + $0xfc] ss:$20 sps:$4 sm:$0xff]   ;;  %v3306_v35 = vld [vmem:[%s4869_s0 + $0x258] ss:$20 sps:$4 sm:$0xff]  }
  0x52   :  { %1858 = vmatpush1.bf16.msra.mxu1 %v3216_v36  ;;  %1584 = vmatprep.mubr.bf16.mxu0 %v3217_v37  ;;  %v3307_v36 = vld [vmem:[%s4869_s0 + $0xf8] ss:$20 sps:$4 sm:$0xff]  }
  0x53   :  { %1800 = vmatprep.mubr.bf16.mxu1 %v3219_v38  ;;  %1859 = vmatprep.subr.bf16.mxu1 %v3465_v0  ;;  %v3308_v37 = vld [vmem:[%s4869_s0 + $0x284] ss:$20 sps:$4 sm:$0xff]  }
  0x54   :  { %v3310_v38 = vld [vmem:[%s4869_s0 + $0x124] ss:$20 sps:$4 sm:$0xff]  }
  0x56   :  { %1860 = vmatpush1.bf16.msra.mxu1 %v3223_v39  ;;  %v3312_v39 = vld [vmem:[%s4869_s0 + $0x280] ss:$20 sps:$4 sm:$0xff]  }
  0x57   :  { %1861 = vmatprep.subr.bf16.mxu1 %v3465_v0 }
  0x59   :  { %1585 = vmatmul.mubr.bf16.gmra.mxu0 %v3221_v40  ;;  %1801 = vmatmul.mubr.bf16.gmra.mxu1 %v3222_v41  ;;  %v3313_v40 = vld [vmem:[%s4869_s0 + $0x120] ss:$20 sps:$4 sm:$0xff]  }
  0x5a   :  { %1862 = vmatpush1.bf16.msra.mxu1 %v3224_v42  ;;  %1592 = vmatprep.mubr.bf16.mxu0 %v3225_v43  ;;  %v3314_v41 = vld [vmem:[%s4869_s0 + $0x2ac] ss:$20 sps:$4 sm:$0xff]   ;;  %v3318_v43 = vld [vmem:[%s4869_s0 + $0x2a8] ss:$20 sps:$4 sm:$0xff]  }
  0x5b   :  { %1808 = vmatprep.mubr.bf16.mxu1 %v3227_v44  ;;  %1863 = vmatprep.subr.bf16.mxu1 %v3465_v0  ;;  %v3316_v42 = vld [vmem:[%s4869_s0 + $0x14c] ss:$20 sps:$4 sm:$0xff]   ;;  %v3319_v44 = vld [vmem:[%s4869_s0 + $0x148] ss:$20 sps:$4 sm:$0xff]  }
  0x5e   :  { %1864 = vmatpush1.bf16.msra.mxu1 %v3231_v45  ;;  %v3320_v45 = vld [vmem:[%s4869_s0 + $0x2d4] ss:$20 sps:$4 sm:$0xff]  }
  0x5f   :  { %1865 = vmatprep.subr.bf16.mxu1 %v3465_v0 }
  0x61   :  { %1593 = vmatmul.mubr.bf16.gmra.mxu0 %v3229_v46  ;;  %1809 = vmatmul.mubr.bf16.gmra.mxu1 %v3230_v47  ;;  %v3322_v46 = vld [vmem:[%s4869_s0 + $0x174] ss:$20 sps:$4 sm:$0xff]   ;;  %v3324_v47 = vld [vmem:[%s4869_s0 + $0x2d0] ss:$20 sps:$4 sm:$0xff]  }
  0x62   :  { %1866 = vmatpush2.bf16.msra.mxu1 %v3232_v48  ;;  %1600 = vmatprep.mubr.bf16.mxu0 %v3233_v49  ;;  %v3325_v48 = vld [vmem:[%s4869_s0 + $0x170] ss:$20 sps:$4 sm:$0xff]  }
  0x63   :  { %1816 = vmatprep.mubr.bf16.mxu1 %v3235_v50  ;;  %1867 = vmatprep.subr.bf16.mxu1 %v3465_v0  ;;  %v3326_v49 = vld [vmem:[%s4869_s0 + $0x2fc] ss:$20 sps:$4 sm:$0xff]  }
  0x64   :  { %v3328_v50 = vld [vmem:[%s4869_s0 + $0x19c] ss:$20 sps:$4 sm:$0xff]  }
  0x66   :  { %1868 = vmatpush2.bf16.msra.mxu1 %v3239_v52  ;;  %v3331_v52 = vld [vmem:[%s4869_s0 + $0x198] ss:$20 sps:$4 sm:$0xff]  }
  0x67   :  { %1869 = vmatprep.subr.bf16.mxu1 %v3465_v0 }
  0x69   :  { %1601 = vmatmul.mubr.bf16.gmra.mxu0 %v3237_v53  ;;  %1817 = vmatmul.mubr.bf16.gmra.mxu1 %v3238_v54  ;;  %v3332_v53 = vld [vmem:[%s4869_s0 + $0x324] ss:$20 sps:$4 sm:$0xff]  }
  0x6a   :  { %1870 = vmatpush2.bf16.msra.mxu1 %v3240_v55  ;;  %1608 = vmatprep.mubr.bf16.mxu0 %v3241_v56  ;;  %v3334_v54 = vld [vmem:[%s4869_s0 + $0x1c4] ss:$20 sps:$4 sm:$0xff]   ;;  %v3336_v55 = vld [vmem:[%s4869_s0 + $0x320] ss:$20 sps:$4 sm:$0xff]  }
  0x6b   :  { %1824 = vmatprep.mubr.bf16.mxu1 %v3243_v57  ;;  %1871 = vmatprep.subr.bf16.mxu1 %v3465_v0  ;;  %v3337_v56 = vld [vmem:[%s4869_s0 + $0x1c0] ss:$20 sps:$4 sm:$0xff]  }
  0x6c   :  { %v3339_v57 = vld [vmem:[%s4869_s0 + $0x34c] ss:$20 sps:$4 sm:$0xff]  }
  0x6e   :  { %1872 = vmatpush2.bf16.msra.mxu1 %v3247_v58  ;;  %v3341_v58 = vld [vmem:[%s4869_s0 + $0x1ec] ss:$20 sps:$4 sm:$0xff]  }
  0x6f   :  { %1873 = vmatprep.subr.bf16.mxu1 %v3465_v0 }
  0x71   :  { %1609 = vmatmul.mubr.bf16.gmra.mxu0 %v3245_v59  ;;  %1825 = vmatmul.mubr.bf16.gmra.mxu1 %v3246_v60  ;;  %v3343_v59 = vld [vmem:[%s4869_s0 + $0x348] ss:$20 sps:$4 sm:$0xff]  }
  0x72   :  { %1616 = vmatprep.mubr.bf16.mxu0 %v3249_v61  ;;  %1832 = vmatprep.mubr.bf16.mxu1 %v3251_v62  ;;  %v3344_v60 = vld [vmem:[%s4869_s0 + $0x1e8] ss:$20 sps:$4 sm:$0xff]  }
  0x73   :  { %1874 = vmatpush2.bf16.msra.mxu1 %v3253_v63  ;;  %v3345_v61 = vld [vmem:[%s4869_s0 + $0x374] ss:$20 sps:$4 sm:$0xff]   ;;  %v3349_v63 = vld [vmem:[%s4869_s0 + $0x370] ss:$20 sps:$4 sm:$0xff]  }
  0x74   :  { %1875 = vmatprep.subr.bf16.mxu1 %v3465_v0  ;;  %v3347_v62 = vld [vmem:[%s4869_s0 + $0x214] ss:$20 sps:$4 sm:$0xff]  }
  0x77   :  { %1876 = vmatpush2.bf16.msra.mxu1 %v3256_v1  ;;  %v3350_v1 = vld [vmem:[%s4869_s0 + $0x210] ss:$20 sps:$4 sm:$0xff]  }
  0x78   :  { %1877 = vmatprep.subr.bf16.mxu1 %v3465_v0 }
  0x79   :  { %1617 = vmatmul.mubr.bf16.gmra.mxu0 %v3254_v2  ;;  %1833 = vmatmul.mubr.bf16.gmra.mxu1 %v3255_v3  ;;  %v3351_v2 = vld [vmem:[%s4869_s0 + $0x39c] ss:$20 sps:$4 sm:$0xff]  }
  0x7a   :  { %1624 = vmatprep.mubr.bf16.mxu0 %v3257_v4  ;;  %1840 = vmatprep.mubr.bf16.mxu1 %v3259_v5  ;;  %v3353_v3 = vld [vmem:[%s4869_s0 + $0x23c] ss:$20 sps:$4 sm:$0xff]   ;;  %v3355_v4 = vld [vmem:[%s4869_s0 + $0x398] ss:$20 sps:$4 sm:$0xff]  }
  0x7b   :  { %1878 = vmatpush2.bf16.msra.mxu1 %v3263_v6  ;;  %v3356_v5 = vld [vmem:[%s4869_s0 + $0x238] ss:$20 sps:$4 sm:$0xff]  }
  0x7c   :  { %1879 = vmatprep.subr.bf16.mxu1 %v3465_v0  ;;  %v3270_v0 = vld [vmem:[%s4869_s0 + $0x168] ss:$20 sps:$4 sm:$0xff]   ;;  %v3357_v6 = vld [vmem:[%s4869_s0 + $0x3c4] ss:$20 sps:$4 sm:$0xff]  }
  0x7f   :  { %1880 = vmatpush2.bf16.msra.mxu1 %v3264_v7  ;;  %v3359_v7 = vld [vmem:[%s4869_s0 + $0x264] ss:$20 sps:$4 sm:$0xff]  }
  0x81   :  { %1625 = vmatmul.mubr.bf16.gmra.mxu0 %v3261_v8  ;;  %1841 = vmatmul.mubr.bf16.gmra.mxu1 %v3262_v9  ;;  %v3361_v8 = vld [vmem:[%s4869_s0 + $0x3c0] ss:$20 sps:$4 sm:$0xff]  }
  0x82   :  { %1632 = vmatprep.mubr.bf16.mxu0 %v3265_v10  ;;  %1881 = vmatprep.mubr.bf16.mxu1 %v3269_v11  ;;  %v3362_v9 = vld [vmem:[%s4869_s0 + $0x260] ss:$20 sps:$4 sm:$0xff]  }
  0x83   :  { %v3363_v10 = vld [vmem:[%s4869_s0 + $0x3ec] ss:$20 sps:$4 sm:$0xff]  }
  0x84   :  { %v3365_v11 = vld [vmem:[%s4869_s0 + $0x28c] ss:$20 sps:$4 sm:$0xff]  }
  0x89   :  { %1633 = vmatmul.mubr.bf16.gmra.mxu0 %v3270_v0  ;;  %1882 = vmatmul.mubr.bf16.vlgmr.msra.gmra.mxu1 %v3267_v12 }
  0x8a   :  { %1640 = vmatprep.mubr.bf16.mxu0 %v3271_v13  ;;  %1889 = vmatprep.mubr.bf16.mxu1 %v3273_v14 }
  0x91   :  { %1641 = vmatmul.mubr.bf16.gmra.mxu0 %v3275_v15  ;;  %1890 = vmatmul.mubr.bf16.gmra.mxu1 %v3276_v16 }
  0x92   :  { %1648 = vmatprep.mubr.bf16.mxu0 %v3277_v17  ;;  %1897 = vmatprep.mubr.bf16.mxu1 %v3279_v18  ;;  %v3367_v17 = vld [vmem:[%s4869_s0 + $0x3e8] ss:$20 sps:$4 sm:$0xff]  }
  0x93   :  { %v3368_v18 = vld [vmem:[%s4869_s0 + $0x288] ss:$20 sps:$4 sm:$0xff]  }
  0x99   :  { %1649 = vmatmul.mubr.bf16.gmra.mxu0 %v3281_v19  ;;  %1898 = vmatmul.mubr.bf16.gmra.mxu1 %v3282_v20  ;;  %v3369_v19 = vld [vmem:[%s4869_s0 + $0x414] ss:$20 sps:$4 sm:$0xff]  }
  0x9a   :  { %1656 = vmatprep.mubr.bf16.mxu0 %v3283_v21  ;;  %1905 = vmatprep.mubr.bf16.mxu1 %v3285_v22  ;;  %v3371_v20 = vld [vmem:[%s4869_s0 + $0x2b4] ss:$20 sps:$4 sm:$0xff]  }
  0xa1   :  { %1657 = vmatmul.mubr.bf16.gmra.mxu0 %v3287_v23  ;;  %1906 = vmatmul.mubr.bf16.gmra.mxu1 %v3288_v24 }
  0xa2   :  { %1664 = vmatprep.mubr.bf16.mxu0 %v3289_v25  ;;  %1913 = vmatprep.mubr.bf16.mxu1 %v3291_v26 }
  0xa9   :  { %1665 = vmatmul.mubr.bf16.gmra.mxu0 %v3293_v27  ;;  %1914 = vmatmul.mubr.bf16.gmra.mxu1 %v3294_v28 }
  0xaa   :  { %1672 = vmatprep.mubr.bf16.mxu0 %v3296_v29  ;;  %1921 = vmatprep.mubr.bf16.mxu1 %v3298_v30  ;;  %v3373_v29 = vld [vmem:[%s4869_s0 + $0x410] ss:$20 sps:$4 sm:$0xff]  }
  0xab   :  { %v3374_v30 = vld [vmem:[%s4869_s0 + $0x2b0] ss:$20 sps:$4 sm:$0xff]  }
  0xb1   :  { %1673 = vmatmul.mubr.bf16.gmra.mxu0 %v3300_v31  ;;  %1922 = vmatmul.mubr.bf16.gmra.mxu1 %v3301_v32  ;;  %v3375_v31 = vld [vmem:[%s4869_s0 + $0x2dc] ss:$20 sps:$4 sm:$0xff]  }
  0xb2   :  { %1680 = vmatprep.mubr.bf16.mxu0 %v3302_v33  ;;  %1929 = vmatprep.mubr.bf16.mxu1 %v3304_v34  ;;  %v3377_v32 = vld [vmem:[%s4869_s0 + $0x10] ss:$20 sps:$4 sm:$0xff]  }
  0xb9   :  { %1681 = vmatmul.mubr.bf16.gmra.mxu0 %v3306_v35  ;;  %1930 = vmatmul.mubr.bf16.gmra.mxu1 %v3307_v36 }
  0xba   :  { %1688 = vmatprep.mubr.bf16.mxu0 %v3308_v37  ;;  %1937 = vmatprep.mubr.bf16.mxu1 %v3310_v38 }
  0xc1   :  { %1689 = vmatmul.mubr.bf16.gmra.mxu0 %v3312_v39  ;;  %1938 = vmatmul.mubr.bf16.gmra.mxu1 %v3313_v40 }
  0xc2   :  { %1696 = vmatprep.mubr.bf16.mxu0 %v3314_v41  ;;  %1945 = vmatprep.mubr.bf16.mxu1 %v3316_v42  ;;  %v3378_v41 = vld [vmem:[%s4869_s0 + $0x2d8] ss:$20 sps:$4 sm:$0xff]  }
  0xc3   :  { %v3379_v42 = vld [vmem:[%s4869_s0 + $0x38] ss:$20 sps:$4 sm:$0xff]  }
  0xc9   :  { %1697 = vmatmul.mubr.bf16.gmra.mxu0 %v3318_v43  ;;  %1946 = vmatmul.mubr.bf16.gmra.mxu1 %v3319_v44  ;;  %v3382_v43 = vld [vmem:[%s4869_s0 + $0x304] ss:$20 sps:$4 sm:$0xff]   ;;  %v3383_v44 = vld [vmem:[%s4869_s0 + $0x60] ss:$20 sps:$4 sm:$0xff]  }
  0xca   :  { %1704 = vmatprep.mubr.bf16.mxu0 %v3320_v45  ;;  %1953 = vmatprep.mubr.bf16.mxu1 %v3322_v46 }
  0xd1   :  { %1705 = vmatmul.mubr.bf16.gmra.mxu0 %v3324_v47  ;;  %1954 = vmatmul.mubr.bf16.gmra.mxu1 %v3325_v48 }
  0xd2   :  { %1712 = vmatprep.mubr.bf16.mxu0 %v3326_v49  ;;  %1961 = vmatprep.mubr.bf16.mxu1 %v3328_v50 }
  0xd9   :  { %1713 = vmatmul.mubr.bf16.gmra.mxu0 %v3330_v51  ;;  %1962 = vmatmul.mubr.bf16.gmra.mxu1 %v3331_v52 }
  0xda   :  { %1720 = vmatprep.mubr.bf16.mxu0 %v3332_v53  ;;  %1969 = vmatprep.mubr.bf16.mxu1 %v3334_v54  ;;  %v3380_v53 = vld [vmem:[%s4869_s0 + $0x300] ss:$20 sps:$4 sm:$0xff]   ;;  %v3384_v54 = vld [vmem:[%s4869_s0 + $0x88] ss:$20 sps:$4 sm:$0xff]  }
  0xe1   :  { %1721 = vmatmul.mubr.bf16.gmra.mxu0 %v3336_v55  ;;  %1970 = vmatmul.mubr.bf16.gmra.mxu1 %v3337_v56  ;;  %v3387_v55 = vld [vmem:[%s4869_s0 + $0x32c] ss:$20 sps:$4 sm:$0xff]   ;;  %v3388_v56 = vld [vmem:[%s4869_s0 + $0xb0] ss:$20 sps:$4 sm:$0xff]  }
  0xe2   :  { %1728 = vmatprep.mubr.bf16.mxu0 %v3339_v57  ;;  %1977 = vmatprep.mubr.bf16.mxu1 %v3341_v58 }
  0xe9   :  { %1729 = vmatmul.mubr.bf16.gmra.mxu0 %v3343_v59  ;;  %1978 = vmatmul.mubr.bf16.gmra.mxu1 %v3344_v60 }
  0xea   :  { %1736 = vmatprep.mubr.bf16.mxu0 %v3345_v61  ;;  %1985 = vmatprep.mubr.bf16.mxu1 %v3347_v62 }
  0xf1   :  { %1737 = vmatmul.mubr.bf16.gmra.mxu0 %v3349_v63  ;;  %1986 = vmatmul.mubr.bf16.gmra.mxu1 %v3350_v1 }
  0xf2   :  { %1744 = vmatprep.mubr.bf16.mxu0 %v3351_v2  ;;  %1993 = vmatprep.mubr.bf16.mxu1 %v3353_v3  ;;  %v3385_v2 = vld [vmem:[%s4869_s0 + $0x328] ss:$20 sps:$4 sm:$0xff]   ;;  %v3389_v3 = vld [vmem:[%s4869_s0 + $0xd8] ss:$20 sps:$4 sm:$0xff]  }
  0xf9   :  { %1745 = vmatmul.mubr.bf16.gmra.mxu0 %v3355_v4  ;;  %1994 = vmatmul.mubr.bf16.gmra.mxu1 %v3356_v5  ;;  %v3392_v4 = vld [vmem:[%s4869_s0 + $0x354] ss:$20 sps:$4 sm:$0xff]  }
  0xfa   :  { %1752 = vmatprep.mubr.bf16.mxu0 %v3357_v6  ;;  %2001 = vmatprep.mubr.bf16.mxu1 %v3359_v7  ;;  %v3393_v5 = vld [vmem:[%s4869_s0 + $0x100] ss:$20 sps:$4 sm:$0xff]  }
 0x101   :  { %v3948_v12 = vpop.f32.mrf.mxu0  ;;  %1753 = vmatmul.mubr.bf16.gmra.mxu0 %v3361_v8  ;;  %v3950_v0 = vpop.f32.mrf.mxu1  ;;  %2002 = vmatmul.mubr.bf16.gmra.mxu1 %v3362_v9 }
 0x102   :  { %4892 = vst [vmem:[#allocation2_spill] sm:$0xff] %v3950_v0  ;;  %1760 = vmatprep.mubr.bf16.mxu0 %v3363_v10  ;;  %2009 = vmatprep.mubr.bf16.mxu1 %v3365_v11 }
 0x103   :  { %v1564_v13 = vpop.f32.mrf.mxu0  ;;  %v1780_v14 = vpop.f32.mrf.mxu1 }
 0x105   :  { %v3952_v15 = vpop.f32.mrf.mxu0  ;;  %v3954_v16 = vpop.f32.mrf.mxu1 }
 0x106   :  { %4893 = vst [vmem:[#allocation3_spill] sm:$0xff] %v3954_v16 }
 0x107   :  { %v1567_v21 = vpop.f32.mrf.mxu0  ;;  %v1783_v22 = vpop.f32.mrf.mxu1 }
 0x109   :  { %v3968_v23 = vpop.f32.mrf.mxu0  ;;  %1761 = vmatmul.mubr.bf16.gmra.mxu0 %v3367_v17  ;;  %v3970_v24 = vpop.f32.mrf.mxu1  ;;  %2010 = vmatmul.mubr.bf16.gmra.mxu1 %v3368_v18  ;;  %v3390_v17 = vld [vmem:[%s4869_s0 + $0x350] ss:$20 sps:$4 sm:$0xff]   ;;  %v3394_v18 = vld [vmem:[%s4869_s0 + $0x128] ss:$20 sps:$4 sm:$0xff]  }
 0x10a   :  { %4894 = vst [vmem:[#allocation4_spill] sm:$0xff] %v3970_v24  ;;  %1768 = vmatprep.mubr.bf16.mxu0 %v3369_v19  ;;  %2017 = vmatprep.mubr.bf16.mxu1 %v3371_v20  ;;  %v3397_v19 = vld [vmem:[%s4869_s0 + $0x37c] ss:$20 sps:$4 sm:$0xff]  }
 0x10b   :  { %v1572_v25 = vpop.f32.mrf.mxu0  ;;  %v1788_v26 = vpop.f32.mrf.mxu1  ;;  %v3398_v20 = vld [vmem:[%s4869_s0 + $0x150] ss:$20 sps:$4 sm:$0xff]  }
 0x10d   :  { %v3972_v27 = vpop.f32.mrf.mxu0  ;;  %v3974_v28 = vpop.f32.mrf.mxu1 }
 0x10e   :  { %4895 = vst [vmem:[#allocation5_spill] sm:$0xff] %v3974_v28 }
 0x10f   :  { %v1575_v33 = vpop.f32.mrf.mxu0  ;;  %v1791_v34 = vpop.f32.mrf.mxu1 }
 0x110   :  { %v3395_v33 = vld [vmem:[%s4869_s0 + $0x378] ss:$20 sps:$4 sm:$0xff]  }
 0x111   :  { %v3988_v35 = vpop.f32.mrf.mxu0  ;;  %1769 = vmatmul.mubr.bf16.gmra.mxu0 %v3373_v29  ;;  %v3990_v36 = vpop.f32.mrf.mxu1  ;;  %2018 = vmatmul.mubr.bf16.gmra.mxu1 %v3374_v30  ;;  %v3399_v34 = vld [vmem:[%s4869_s0 + $0x178] ss:$20 sps:$4 sm:$0xff]  }
 0x112   :  { %4896 = vst [vmem:[#allocation6_spill] sm:$0xff] %v3990_v36  ;;  %2025 = vmatprep.mubr.bf16.mxu1 %v3375_v31  ;;  %3072 = vmatprep.mubr.msk.bf16.mxu0 %vm1419_vm0, %v3377_v32 }
 0x113   :  { %v1580_v37 = vpop.f32.mrf.mxu0  ;;  %v1796_v38 = vpop.f32.mrf.mxu1 }
 0x114   :  { %v3402_v37 = vld [vmem:[%s4869_s0 + $0x3a4] ss:$20 sps:$4 sm:$0xff]   ;;  %v3403_v38 = vld [vmem:[%s4869_s0 + $0x1a0] ss:$20 sps:$4 sm:$0xff]  }
 0x115   :  { %v3993_v39 = vpop.f32.mrf.mxu0  ;;  %v3995_v40 = vpop.f32.mrf.mxu1 }
 0x116   :  { %4897 = vst [vmem:[#allocation7_spill] sm:$0xff] %v3995_v40 }
 0x117   :  { %v1583_v45 = vpop.f32.mrf.mxu0  ;;  %v1799_v46 = vpop.f32.mrf.mxu1 }
 0x119   :  { %v4009_v47 = vpop.f32.mrf.mxu0  ;;  %v4011_v48 = vpop.f32.mrf.mxu1  ;;  %2026 = vmatmul.mubr.bf16.gmra.mxu1 %v3378_v41  ;;  %3073 = vmatmul.mubr.msk.bf16.vlgmr.msra.gmra.mxu0 %vm1419_vm0, %v3379_v42 }
 0x11a   :  { %4898 = vst [vmem:[#allocation8_spill] sm:$0xff] %v4011_v48  ;;  %2033 = vmatprep.mubr.bf16.mxu1 %v3382_v43  ;;  %3076 = vmatprep.mubr.msk.bf16.mxu0 %vm1419_vm0, %v3383_v44 }
 0x11b   :  { %v1588_v49 = vpop.f32.mrf.mxu0  ;;  %v1804_v50 = vpop.f32.mrf.mxu1 }
 0x11d   :  { %v4015_v51 = vpop.f32.mrf.mxu0  ;;  %v4017_v52 = vpop.f32.mrf.mxu1 }
 0x11e   :  { %4899 = vst [vmem:[#allocation9_spill] sm:$0xff] %v4017_v52 }
 0x11f   :  { %v1591_v57 = vpop.f32.mrf.mxu0  ;;  %v1807_v58 = vpop.f32.mrf.mxu1 }
 0x121   :  { %v4031_v59 = vpop.f32.mrf.mxu0  ;;  %v4033_v60 = vpop.f32.mrf.mxu1  ;;  %2034 = vmatmul.mubr.bf16.gmra.mxu1 %v3380_v53  ;;  %3077 = vmatmul.mubr.msk.bf16.gmra.mxu0 %vm1419_vm0, %v3384_v54  ;;  %v3400_v53 = vld [vmem:[%s4869_s0 + $0x3a0] ss:$20 sps:$4 sm:$0xff]   ;;  %v3404_v54 = vld [vmem:[%s4869_s0 + $0x1c8] ss:$20 sps:$4 sm:$0xff]  }
 0x122   :  { %4900 = vst [vmem:[#allocation10_spill] sm:$0xff] %v4033_v60  ;;  %2041 = vmatprep.mubr.bf16.mxu1 %v3387_v55  ;;  %3080 = vmatprep.mubr.msk.bf16.mxu0 %vm1419_vm0, %v3388_v56  ;;  %v3407_v55 = vld [vmem:[%s4869_s0 + $0x3cc] ss:$20 sps:$4 sm:$0xff]   ;;  %v3408_v56 = vld [vmem:[%s4869_s0 + $0x1f0] ss:$20 sps:$4 sm:$0xff]  }
 0x123   :  { %v1596_v61 = vpop.f32.mrf.mxu0  ;;  %v1812_v62 = vpop.f32.mrf.mxu1 }
 0x125   :  { %v4037_v63 = vpop.f32.mrf.mxu0  ;;  %v4039_v1 = vpop.f32.mrf.mxu1 }
 0x126   :  { %4901 = vst [vmem:[#allocation11_spill] sm:$0xff] %v4039_v1 }
 0x127   :  { %v1599_v6 = vpop.f32.mrf.mxu0  ;;  %v1815_v7 = vpop.f32.mrf.mxu1 }
 0x128   :  { %v3405_v6 = vld [vmem:[%s4869_s0 + $0x3c8] ss:$20 sps:$4 sm:$0xff]   ;;  %v3409_v7 = vld [vmem:[%s4869_s0 + $0x218] ss:$20 sps:$4 sm:$0xff]  }
 0x129   :  { %v4053_v8 = vpop.f32.mrf.mxu0  ;;  %v4055_v9 = vpop.f32.mrf.mxu1  ;;  %2042 = vmatmul.mubr.bf16.gmra.mxu1 %v3385_v2  ;;  %3081 = vmatmul.mubr.msk.bf16.gmra.mxu0 %vm1419_vm0, %v3389_v3 }
 0x12a   :  { %4902 = vst [vmem:[#allocation12_spill] sm:$0xff] %v4055_v9  ;;  %2049 = vmatprep.mubr.bf16.mxu1 %v3392_v4  ;;  %3084 = vmatprep.mubr.msk.bf16.mxu0 %vm1419_vm0, %v3393_v5 }
 0x12b   :  { %v1604_v10 = vpop.f32.mrf.mxu0  ;;  %v1820_v11 = vpop.f32.mrf.mxu1 }
 0x12c   :  { %v3412_v10 = vld [vmem:[%s4869_s0 + $0x3f4] ss:$20 sps:$4 sm:$0xff]  }
 0x12d   :  { %v4059_v13 = vpop.f32.mrf.mxu0  ;;  %v4061_v14 = vpop.f32.mrf.mxu1  ;;  %v3413_v11 = vld [vmem:[%s4869_s0 + $0x240] ss:$20 sps:$4 sm:$0xff]  }
 0x12e   :  { %4903 = vst [vmem:[#allocation13_spill] sm:$0xff] %v4061_v14 }
 0x12f   :  { %v1607_v21 = vpop.f32.mrf.mxu0  ;;  %v1823_v22 = vpop.f32.mrf.mxu1 }
 0x131   :  { %v4075_v25 = vpop.f32.mrf.mxu0  ;;  %v4077_v26 = vpop.f32.mrf.mxu1  ;;  %2050 = vmatmul.mubr.bf16.gmra.mxu1 %v3390_v17  ;;  %3085 = vmatmul.mubr.msk.bf16.gmra.mxu0 %vm1419_vm0, %v3394_v18 }
 0x132   :  { %4904 = vst [vmem:[#allocation14_spill] sm:$0xff] %v4077_v26  ;;  %2057 = vmatprep.mubr.bf16.mxu1 %v3397_v19  ;;  %3088 = vmatprep.mubr.msk.bf16.mxu0 %vm1419_vm0, %v3398_v20 }
 0x133   :  { %v1612_v29 = vpop.f32.mrf.mxu0  ;;  %v1828_v30 = vpop.f32.mrf.mxu1 }
 0x135   :  { %v4081_v31 = vpop.f32.mrf.mxu0  ;;  %v4083_v32 = vpop.f32.mrf.mxu1 }
 0x136   :  { %4905 = vst [vmem:[#allocation15_spill] sm:$0xff] %v4083_v32 }
 0x137   :  { %v1615_v41 = vpop.f32.mrf.mxu0  ;;  %v1831_v42 = vpop.f32.mrf.mxu1 }
 0x139   :  { %v4097_v43 = vpop.f32.mrf.mxu0  ;;  %v4099_v44 = vpop.f32.mrf.mxu1  ;;  %2058 = vmatmul.mubr.bf16.gmra.mxu1 %v3395_v33  ;;  %3089 = vmatmul.mubr.msk.bf16.gmra.mxu0 %vm1419_vm0, %v3399_v34  ;;  %v3410_v33 = vld [vmem:[%s4869_s0 + $0x3f0] ss:$20 sps:$4 sm:$0xff]   ;;  %v3414_v34 = vld [vmem:[%s4869_s0 + $0x268] ss:$20 sps:$4 sm:$0xff]  }
 0x13a   :  { %4906 = vst [vmem:[#allocation16_spill] sm:$0xff] %v4099_v44  ;;  %2065 = vmatprep.mubr.bf16.mxu1 %v3402_v37  ;;  %3092 = vmatprep.mubr.msk.bf16.mxu0 %vm1419_vm0, %v3403_v38  ;;  %v3417_v37 = vld [vmem:[%s4869_s0 + $0x41c] ss:$20 sps:$4 sm:$0xff]  }
 0x13b   :  { %v1620_v45 = vpop.f32.mrf.mxu0  ;;  %v1836_v46 = vpop.f32.mrf.mxu1  ;;  %v3418_v38 = vld [vmem:[%s4869_s0 + $0x290] ss:$20 sps:$4 sm:$0xff]  }
 0x13d   :  { %v4103_v49 = vpop.f32.mrf.mxu0  ;;  %v4105_v50 = vpop.f32.mrf.mxu1 }
 0x13e   :  { %4907 = vst [vmem:[#allocation17_spill] sm:$0xff] %v4105_v50 }
 0x13f   :  { %v1623_v57 = vpop.f32.mrf.mxu0  ;;  %v1839_v58 = vpop.f32.mrf.mxu1 }
 0x140   :  { %v3415_v57 = vld [vmem:[%s4869_s0 + $0x418] ss:$20 sps:$4 sm:$0xff]  }
 0x141   :  { %v4119_v61 = vpop.f32.mrf.mxu0  ;;  %v4121_v62 = vpop.f32.mrf.mxu1  ;;  %2066 = vmatmul.mubr.bf16.gmra.mxu1 %v3400_v53  ;;  %3093 = vmatmul.mubr.msk.bf16.gmra.mxu0 %vm1419_vm0, %v3404_v54  ;;  %v3419_v58 = vld [vmem:[%s4869_s0 + $0x2b8] ss:$20 sps:$4 sm:$0xff]  }
 0x142   :  { %4908 = vst [vmem:[#allocation18_spill] sm:$0xff] %v4121_v62  ;;  %2073 = vmatprep.mubr.bf16.mxu1 %v3407_v55  ;;  %3096 = vmatprep.mubr.msk.bf16.mxu0 %vm1419_vm0, %v3408_v56 }
 0x143   :  { %v1628_v2 = vpop.f32.mrf.mxu0  ;;  %v1844_v3 = vpop.f32.mrf.mxu1 }
 0x144   :  { %v3422_v2 = vld [vmem:[%s4869_s0 + $0x444] ss:$20 sps:$4 sm:$0xff]   ;;  %v3423_v3 = vld [vmem:[%s4869_s0 + $0x2e0] ss:$20 sps:$4 sm:$0xff]  }
 0x145   :  { %v4125_v4 = vpop.f32.mrf.mxu0  ;;  %v4127_v5 = vpop.f32.mrf.mxu1 }
 0x146   :  { %4909 = vst [vmem:[#allocation19_spill] sm:$0xff] %v4127_v5 }
 0x147   :  { %v1631_v17 = vpop.f32.mrf.mxu0  ;;  %v1847_v18 = vpop.f32.mrf.mxu1 }
 0x149   :  { %v4141_v19 = vpop.f32.mrf.mxu0  ;;  %v4143_v20 = vpop.f32.mrf.mxu1  ;;  %2074 = vmatmul.mubr.bf16.gmra.mxu1 %v3405_v6  ;;  %3097 = vmatmul.mubr.msk.bf16.gmra.mxu0 %vm1419_vm0, %v3409_v7 }
 0x14a   :  { %2081 = vmatprep.mubr.bf16.mxu1 %v3412_v10  ;;  %3100 = vmatprep.mubr.msk.bf16.mxu0 %vm1419_vm0, %v3413_v11 }
 0x14b   :  { %v1636_v21 = vpop.f32.mrf.mxu0  ;;  %v1885_v22 = vpop.f32.mrf.mxu1 }
 0x14d   :  { %v4147_v29 = vpop.f32.mrf.mxu0  ;;  %v4149_v30 = vpop.f32.mrf.mxu1 }
 0x14f   :  { %v1639_v41 = vpop.f32.mrf.mxu0  ;;  %v1888_v42 = vpop.f32.mrf.mxu1 }
 0x151   :  { %v4163_v45 = vpop.f32.mrf.mxu0  ;;  %v4165_v46 = vpop.f32.mrf.mxu1  ;;  %2082 = vmatmul.mubr.bf16.gmra.mxu1 %v3410_v33  ;;  %3101 = vmatmul.mubr.msk.bf16.gmra.mxu0 %vm1419_vm0, %v3414_v34  ;;  %v3420_v33 = vld [vmem:[%s4869_s0 + $0x440] ss:$20 sps:$4 sm:$0xff]   ;;  %v3424_v34 = vld [vmem:[%s4869_s0 + $0x308] ss:$20 sps:$4 sm:$0xff]  }
 0x152   :  { %2089 = vmatprep.mubr.bf16.mxu1 %v3417_v37  ;;  %3104 = vmatprep.mubr.msk.bf16.mxu0 %vm1419_vm0, %v3418_v38  ;;  %v3427_v37 = vld [vmem:[%s4869_s0 + $0x46c] ss:$20 sps:$4 sm:$0xff]   ;;  %v3428_v38 = vld [vmem:[%s4869_s0 + $0x330] ss:$20 sps:$4 sm:$0xff]  }
 0x153   :  { %v1644_v53 = vpop.f32.mrf.mxu0  ;;  %v1893_v54 = vpop.f32.mrf.mxu1 }
 0x155   :  { %v4169_v55 = vpop.f32.mrf.mxu0  ;;  %v4171_v56 = vpop.f32.mrf.mxu1 }
 0x157   :  { %v1647_v6 = vpop.f32.mrf.mxu0  ;;  %v1896_v7 = vpop.f32.mrf.mxu1 }
 0x158   :  { %v3425_v6 = vld [vmem:[%s4869_s0 + $0x468] ss:$20 sps:$4 sm:$0xff]   ;;  %v3429_v7 = vld [vmem:[%s4869_s0 + $0x358] ss:$20 sps:$4 sm:$0xff]  }
 0x159   :  { %v4185_v10 = vpop.f32.mrf.mxu0  ;;  %v4187_v11 = vpop.f32.mrf.mxu1  ;;  %2090 = vmatmul.mubr.bf16.gmra.mxu1 %v3415_v57  ;;  %3105 = vmatmul.mubr.msk.bf16.gmra.mxu0 %vm1419_vm0, %v3419_v58 }
 0x15a   :  { %2097 = vmatprep.mubr.bf16.mxu1 %v3422_v2  ;;  %3108 = vmatprep.mubr.msk.bf16.mxu0 %vm1419_vm0, %v3423_v3 }
 0x15b   :  { %v1652_v17 = vpop.f32.mrf.mxu0  ;;  %v1901_v18 = vpop.f32.mrf.mxu1 }
 0x15c   :  { %v3432_v17 = vld [vmem:[%s4869_s0 + $0x494] ss:$20 sps:$4 sm:$0xff]  }
 0x15d   :  { %v4191_v21 = vpop.f32.mrf.mxu0  ;;  %v4193_v22 = vpop.f32.mrf.mxu1  ;;  %v3433_v18 = vld [vmem:[%s4869_s0 + $0x380] ss:$20 sps:$4 sm:$0xff]  }
 0x15f   :  { %v1655_v41 = vpop.f32.mrf.mxu0  ;;  %v1904_v42 = vpop.f32.mrf.mxu1 }
 0x161   :  { %v4207_v53 = vpop.f32.mrf.mxu0  ;;  %v4209_v54 = vpop.f32.mrf.mxu1  ;;  %2098 = vmatmul.mubr.bf16.gmra.mxu1 %v3420_v33  ;;  %3109 = vmatmul.mubr.msk.bf16.gmra.mxu0 %vm1419_vm0, %v3424_v34 }
 0x162   :  { %4910 = vst [vmem:[#allocation20_spill] sm:$0xff] %v4207_v53  ;;  %2105 = vmatprep.mubr.bf16.mxu1 %v3427_v37  ;;  %3112 = vmatprep.mubr.msk.bf16.mxu0 %vm1419_vm0, %v3428_v38 }
 0x163   :  { %v1660_v57 = vpop.f32.mrf.mxu0  ;;  %v1909_v58 = vpop.f32.mrf.mxu1 }
 0x165   :  { %v4213_v2 = vpop.f32.mrf.mxu0  ;;  %v4215_v3 = vpop.f32.mrf.mxu1 }
 0x166   :  { %4911 = vst [vmem:[#allocation21_spill] sm:$0xff] %v4213_v2 }
 0x167   :  { %v1663_v33 = vpop.f32.mrf.mxu0  ;;  %v1912_v34 = vpop.f32.mrf.mxu1 }
 0x168   :  { %v3430_v33 = vld [vmem:[%s4869_s0 + $0x490] ss:$20 sps:$4 sm:$0xff]   ;;  %v3434_v34 = vld [vmem:[%s4869_s0 + $0x3a8] ss:$20 sps:$4 sm:$0xff]  }
 0x169   :  { %v4229_v37 = vpop.f32.mrf.mxu0  ;;  %v4231_v38 = vpop.f32.mrf.mxu1  ;;  %2106 = vmatmul.mubr.bf16.gmra.mxu1 %v3425_v6  ;;  %3113 = vmatmul.mubr.msk.bf16.gmra.mxu0 %vm1419_vm0, %v3429_v7  ;;  %v3437_v6 = vld [vmem:[%s4869_s0 + $0x4bc] ss:$20 sps:$4 sm:$0xff]  }
 0x16a   :  { %2113 = vmatprep.mubr.bf16.mxu1 %v3432_v17  ;;  %3116 = vmatprep.mubr.msk.bf16.mxu0 %vm1419_vm0, %v3433_v18  ;;  %v3438_v7 = vld [vmem:[%s4869_s0 + $0x3d0] ss:$20 sps:$4 sm:$0xff]  }
 0x16b   :  { %v1668_v41 = vpop.f32.mrf.mxu0  ;;  %v1917_v42 = vpop.f32.mrf.mxu1 }
 0x16d   :  { %v4235_v57 = vpop.f32.mrf.mxu0  ;;  %v4237_v58 = vpop.f32.mrf.mxu1 }
 0x16e   :  { %4912 = vst [vmem:[#allocation22_spill] sm:$0xff] %v4235_v57 }
 0x16f   :  { %v1671_v17 = vpop.f32.mrf.mxu0  ;;  %v1920_v18 = vpop.f32.mrf.mxu1 }
 0x170   :  { %v3435_v17 = vld [vmem:[%s4869_s0 + $0x4b8] ss:$20 sps:$4 sm:$0xff]  }
 0x171   :  { %v4251_v41 = vpop.f32.mrf.mxu0  ;;  %v4253_v42 = vpop.f32.mrf.mxu1  ;;  %2114 = vmatmul.mubr.bf16.gmra.mxu1 %v3430_v33  ;;  %3117 = vmatmul.mubr.msk.bf16.gmra.mxu0 %vm1419_vm0, %v3434_v34  ;;  %v3439_v18 = vld [vmem:[%s4869_s0 + $0x3f8] ss:$20 sps:$4 sm:$0xff]  }
 0x172   :  { %4913 = vst [vmem:[#allocation23_spill] sm:$0xff] %v4251_v41  ;;  %2121 = vmatprep.mubr.bf16.mxu1 %v3437_v6  ;;  %3120 = vmatprep.mubr.msk.bf16.mxu0 %vm1419_vm0, %v3438_v7  ;;  %v3442_v33 = vld [vmem:[%s4869_s0 + $0x4e4] ss:$20 sps:$4 sm:$0xff]  }
 0x173   :  { %v1676_v50 = vpop.f32.mrf.mxu0  ;;  %v1925_v5 = vpop.f32.mrf.mxu1 }
 0x174   :  { %v3443_v50 = vld [vmem:[%s4869_s0 + $0x420] ss:$20 sps:$4 sm:$0xff]  }
 0x175   :  { %v4257_v62 = vpop.f32.mrf.mxu0  ;;  %v4259_v44 = vpop.f32.mrf.mxu1 }
 0x176   :  { %4914 = vst [vmem:[#allocation24_spill] sm:$0xff] %v4257_v62 }
 0x177   :  { %v1679_v5 = vpop.f32.mrf.mxu0  ;;  %v1928_v34 = vpop.f32.mrf.mxu1 }
 0x178   :  { %v3440_v5 = vld [vmem:[%s4869_s0 + $0x4e0] ss:$20 sps:$4 sm:$0xff]   ;;  %v3444_v34 = vld [vmem:[%s4869_s0 + $0x448] ss:$20 sps:$4 sm:$0xff]  }
 0x179   :  { %v4273_v6 = vpop.f32.mrf.mxu0  ;;  %v4275_v7 = vpop.f32.mrf.mxu1  ;;  %2122 = vmatmul.mubr.bf16.gmra.mxu1 %v3435_v17  ;;  %3121 = vmatmul.mubr.msk.bf16.gmra.mxu0 %vm1419_vm0, %v3439_v18  ;;  %v3447_v17 = vld [vmem:[%s4869_s0 + $0x50c] ss:$20 sps:$4 sm:$0xff]  }
 0x17a   :  { %4915 = vst [vmem:[#allocation25_spill] sm:$0xff] %v4273_v6  ;;  %2129 = vmatprep.mubr.bf16.mxu1 %v3442_v33  ;;  %3124 = vmatprep.mubr.msk.bf16.mxu0 %vm1419_vm0, %v3443_v50 }
 0x17b   :  { %v1684_v32 = vpop.f32.mrf.mxu0  ;;  %v1933_v14 = vpop.f32.mrf.mxu1 }
 0x17c   :  { %v3448_v14 = vld [vmem:[%s4869_s0 + $0x470] ss:$20 sps:$4 sm:$0xff]  }
 0x17d   :  { %v4279_v26 = vpop.f32.mrf.mxu0  ;;  %v4281_v9 = vpop.f32.mrf.mxu1 }
 0x17e   :  { %4916 = vst [vmem:[#allocation26_spill] sm:$0xff] %v4279_v26 }
 0x17f   :  { %v1687_v32 = vpop.f32.mrf.mxu0  ;;  %v1936_v18 = vpop.f32.mrf.mxu1 }
 0x180   :  { %v3445_v32 = vld [vmem:[%s4869_s0 + $0x508] ss:$20 sps:$4 sm:$0xff]   ;;  %v3449_v18 = vld [vmem:[%s4869_s0 + $0x498] ss:$20 sps:$4 sm:$0xff]  }
 0x181   :  { %v4295_v33 = vpop.f32.mrf.mxu0  ;;  %v4297_v50 = vpop.f32.mrf.mxu1  ;;  %2130 = vmatmul.mubr.bf16.gmra.mxu1 %v3440_v5  ;;  %3125 = vmatmul.mubr.msk.bf16.gmra.mxu0 %vm1419_vm0, %v3444_v34  ;;  %v3452_v5 = vld [vmem:[%s4869_s0 + $0x534] ss:$20 sps:$4 sm:$0xff]  }
 0x182   :  { %4917 = vst [vmem:[#allocation27_spill] sm:$0xff] %v4295_v33  ;;  %2137 = vmatprep.mubr.bf16.mxu1 %v3447_v17  ;;  %3128 = vmatprep.mubr.msk.bf16.mxu0 %vm1419_vm0, %v3448_v14 }
 0x183   :  { %v1692_v52 = vpop.f32.mrf.mxu0  ;;  %v1941_v1 = vpop.f32.mrf.mxu1 }
 0x184   :  { %v3453_v52 = vld [vmem:[%s4869_s0 + $0x4c0] ss:$20 sps:$4 sm:$0xff]  }
 0x185   :  { %v4301_v48 = vpop.f32.mrf.mxu0  ;;  %v4303_v60 = vpop.f32.mrf.mxu1 }
 0x186   :  { %4918 = vst [vmem:[#allocation28_spill] sm:$0xff] %v4301_v48 }
 0x187   :  { %v1695_v1 = vpop.f32.mrf.mxu0  ;;  %v1944_v34 = vpop.f32.mrf.mxu1 }
 0x188   :  { %v3450_v1 = vld [vmem:[%s4869_s0 + $0x530] ss:$20 sps:$4 sm:$0xff]   ;;  %v3454_v34 = vld [vmem:[%s4869_s0 + $0x4e8] ss:$20 sps:$4 sm:$0xff]  }
 0x189   :  { %v4317_v17 = vpop.f32.mrf.mxu0  ;;  %v4319_v14 = vpop.f32.mrf.mxu1  ;;  %2138 = vmatmul.mubr.bf16.gmra.mxu1 %v3445_v32  ;;  %3129 = vmatmul.mubr.msk.bf16.gmra.mxu0 %vm1419_vm0, %v3449_v18  ;;  %v3457_v32 = vld [vmem:[%s4869_s0 + $0x55c] ss:$20 sps:$4 sm:$0xff]  }
 0x18a   :  { %4919 = vst [vmem:[#allocation29_spill] sm:$0xff] %v4317_v17  ;;  %2145 = vmatprep.mubr.bf16.mxu1 %v3452_v5  ;;  %3132 = vmatprep.mubr.msk.bf16.mxu0 %vm1419_vm0, %v3453_v52 }
 0x18b   :  { %v1700_v40 = vpop.f32.mrf.mxu0  ;;  %v1949_v28 = vpop.f32.mrf.mxu1 }
 0x18c   :  { %v3458_v28 = vld [vmem:[%s4869_s0 + $0x510] ss:$20 sps:$4 sm:$0xff]  }
 0x18d   :  { %v4323_v24 = vpop.f32.mrf.mxu0  ;;  %v4325_v36 = vpop.f32.mrf.mxu1 }
 0x18e   :  { %4920 = vst [vmem:[#allocation30_spill] sm:$0xff] %v4323_v24 }
 0x18f   :  { %v1703_v40 = vpop.f32.mrf.mxu0  ;;  %v1952_v18 = vpop.f32.mrf.mxu1 }
 0x190   :  { %v3455_v40 = vld [vmem:[%s4869_s0 + $0x558] ss:$20 sps:$4 sm:$0xff]  }
 0x191   :  { %v4339_v5 = vpop.f32.mrf.mxu0  ;;  %v4341_v52 = vpop.f32.mrf.mxu1  ;;  %2146 = vmatmul.mubr.bf16.gmra.mxu1 %v3450_v1  ;;  %3133 = vmatmul.mubr.msk.bf16.gmra.mxu0 %vm1419_vm0, %v3454_v34  ;;  %v3459_v18 = vld [vmem:[%s4869_s0 + $0x538] ss:$20 sps:$4 sm:$0xff]  }
 0x192   :  { %4921 = vst [vmem:[#allocation31_spill] sm:$0xff] %v4339_v5  ;;  %2153 = vmatprep.mubr.bf16.mxu1 %v3457_v32  ;;  %3136 = vmatprep.mubr.msk.bf16.mxu0 %vm1419_vm0, %v3458_v28  ;;  %v3462_v1 = vld [vmem:[%s4869_s0 + $0x584] ss:$20 sps:$4 sm:$0xff]  }
 0x193   :  { %v1708_v16 = vpop.f32.mrf.mxu0  ;;  %v1957_v0 = vpop.f32.mrf.mxu1 }
 0x194   :  { %v3463_v0 = vld [vmem:[%s4869_s0 + $0x560] ss:$20 sps:$4 sm:$0xff]  }
 0x195   :  { %v4345_v48 = vpop.f32.mrf.mxu0  ;;  %v4347_v24 = vpop.f32.mrf.mxu1 }
 0x196   :  { %4922 = vst [vmem:[#allocation32_spill] sm:$0xff] %v4345_v48 }
 0x197   :  { %v1711_v16 = vpop.f32.mrf.mxu0  ;;  %v1960_v34 = vpop.f32.mrf.mxu1 }
 0x198   :  { %v3460_v16 = vld [vmem:[%s4869_s0 + $0x580] ss:$20 sps:$4 sm:$0xff]   ;;  %v3464_v34 = vld [vmem:[%s4869_s0 + $0x588] ss:$20 sps:$4 sm:$0xff]  }
 0x199   :  { %v4361_v32 = vpop.f32.mrf.mxu0  ;;  %v4363_v28 = vpop.f32.mrf.mxu1  ;;  %2154 = vmatmul.mubr.bf16.gmra.mxu1 %v3455_v40  ;;  %3137 = vmatmul.mubr.msk.bf16.gmra.mxu0 %vm1419_vm0, %v3459_v18 }
 0x19a   :  { %4923 = vst [vmem:[#allocation33_spill] sm:$0xff] %v4361_v32  ;;  %2161 = vmatprep.mubr.bf16.mxu1 %v3462_v1  ;;  %3140 = vmatprep.mubr.msk.bf16.mxu0 %vm1419_vm0, %v3463_v0 }
 0x19b   :  { %v1716_v48 = vpop.f32.mrf.mxu0  ;;  %v1965_v5 = vpop.f32.mrf.mxu1 }
 0x19d   :  { %v4367_v33 = vpop.f32.mrf.mxu0  ;;  %v4369_v17 = vpop.f32.mrf.mxu1 }
 0x19e   :  { %4924 = vst [vmem:[#allocation34_spill] sm:$0xff] %v4367_v33 }
 0x19f   :  { %v1719_v40 = vpop.f32.mrf.mxu0  ;;  %v1968_v32 = vpop.f32.mrf.mxu1 }
 0x1a1   :  { %v4377_v18 = vpop.f32.mrf.mxu0  ;;  %v4379_v1 = vpop.f32.mrf.mxu1  ;;  %2162 = vmatmul.mubr.bf16.gmra.mxu1 %v3460_v16  ;;  %3141 = vmatmul.mubr.msk.bf16.gmra.mxu0 %vm1419_vm0, %v3464_v34 }
 0x1a2   :  { %4925 = vst [vmem:[#allocation35_spill] sm:$0xff] %v4377_v18 }
 0x1a3   :  { %v1724_v48 = vpop.f32.mrf.mxu0  ;;  %v1973_v5 = vpop.f32.mrf.mxu1 }
 0x1a5   :  { %v4382_v0 = vpop.f32.mrf.mxu0  ;;  %v4384_v33 = vpop.f32.mrf.mxu1 }
 0x1a6   :  { %4926 = vst [vmem:[#allocation36_spill] sm:$0xff] %v4382_v0 }
 0x1a7   :  { %v1727_v62 = vpop.f32.mrf.mxu0  ;;  %v1976_v26 = vpop.f32.mrf.mxu1 }
 0x1a9   :  { %v4386_v41 = vpop.f32.mrf.mxu0  ;;  %v4388_v6 = vpop.f32.mrf.mxu1 }
 0x1aa   :  { %4927 = vst [vmem:[#allocation37_spill] sm:$0xff] %v4386_v41  ;;  %4928 = vst [vmem:[#allocation38_spill] sm:$0xff] %v4388_v6 }
 0x1ab   :  { %v1732_v32 = vpop.f32.mrf.mxu0  ;;  %v1981_v40 = vpop.f32.mrf.mxu1 }
 0x1ad   :  { %v4390_v18 = vpop.f32.mrf.mxu0  ;;  %v4392_v2 = vpop.f32.mrf.mxu1 }
 0x1ae   :  { %4929 = vst [vmem:[#allocation39_spill] sm:$0xff] %v4390_v18  ;;  %4930 = vst [vmem:[#allocation40_spill] sm:$0xff] %v4392_v2 }
 0x1af   :  { %v1735_v16 = vpop.f32.mrf.mxu0  ;;  %v1984_v34 = vpop.f32.mrf.mxu1 }
 0x1b1   :  { %v4394_v48 = vpop.f32.mrf.mxu0  ;;  %v4396_v5 = vpop.f32.mrf.mxu1 }
 0x1b2   :  { %4931 = vst [vmem:[#allocation41_spill] sm:$0xff] %v4394_v48 }
 0x1b3   :  { %v1740_v0 = vpop.f32.mrf.mxu0  ;;  %v1989_v57 = vpop.f32.mrf.mxu1 }
 0x1b5   :  { %v4398_v62 = vpop.f32.mrf.mxu0  ;;  %v4400_v26 = vpop.f32.mrf.mxu1 }
 0x1b6   :  { %4932 = vst [vmem:[#allocation42_spill] sm:$0xff] %v4398_v62  ;;  %4933 = vst [vmem:[#allocation43_spill] sm:$0xff] %v4400_v26 }
 0x1b7   :  { %v1743_v41 = vpop.f32.mrf.mxu0  ;;  %v1992_v6 = vpop.f32.mrf.mxu1 }
 0x1b9   :  { %v4402_v32 = vpop.f32.mrf.mxu0  ;;  %v4404_v40 = vpop.f32.mrf.mxu1 }
 0x1ba   :  { %4934 = vst [vmem:[#allocation44_spill] sm:$0xff] %v4402_v32  ;;  %4935 = vst [vmem:[#allocation45_spill] sm:$0xff] %v4404_v40 }
 0x1bb   :  { %v1748_v18 = vpop.f32.mrf.mxu0  ;;  %v1997_v2 = vpop.f32.mrf.mxu1 }
 0x1bd   :  { %v4406_v16 = vpop.f32.mrf.mxu0  ;;  %v4408_v34 = vpop.f32.mrf.mxu1 }
 0x1be   :  { %4936 = vst [vmem:[#allocation46_spill] sm:$0xff] %v4406_v16  ;;  %4937 = vst [vmem:[#allocation47_spill] sm:$0xff] %v4408_v34 }
 0x1bf   :  { %v1751_v48 = vpop.f32.mrf.mxu0  ;;  %v2000_v53 = vpop.f32.mrf.mxu1 }
 0x1c1   :  { %v4410_v0 = vpop.f32.mrf.mxu0  ;;  %v4412_v57 = vpop.f32.mrf.mxu1 }
 0x1c2   :  { %4938 = vst [vmem:[#allocation48_spill] sm:$0xff] %v4410_v0  ;;  %4939 = vst [vmem:[#allocation49_spill] sm:$0xff] %v4412_v57 }
 0x1c3   :  { %v1756_v62 = vpop.f32.mrf.mxu0  ;;  %v2005_v26 = vpop.f32.mrf.mxu1 }
 0x1c5   :  { %v4414_v41 = vpop.f32.mrf.mxu0  ;;  %v4416_v6 = vpop.f32.mrf.mxu1 }
 0x1c6   :  { %4940 = vst [vmem:[#allocation50_spill] sm:$0xff] %v4414_v41  ;;  %4941 = vst [vmem:[#allocation51_spill] sm:$0xff] %v4416_v6 }
 0x1c7   :  { %v1759_v32 = vpop.f32.mrf.mxu0  ;;  %v2008_v40 = vpop.f32.mrf.mxu1 }
 0x1c9   :  { %v4418_v18 = vpop.f32.mrf.mxu0  ;;  %v4420_v2 = vpop.f32.mrf.mxu1 }
 0x1ca   :  { %4942 = vst [vmem:[#allocation52_spill] sm:$0xff] %v4418_v18  ;;  %4943 = vst [vmem:[#allocation53_spill] sm:$0xff] %v4420_v2 }
 0x1cb   :  { %v1764_v16 = vpop.f32.mrf.mxu0  ;;  %v2013_v34 = vpop.f32.mrf.mxu1 }
 0x1cc   :  { %v1892_v16 = vadd.f32 %v4165_v46, %v3968_v23  ;;  %v1887_v23 = vadd.f32 %v4149_v30, %v3952_v15  ;;  %v1911_v15 = vadd.f32 %v4215_v3, %v4015_v51  ;;  %v1916_v3 = vadd.f32 %v4231_v38, %v4031_v59 }
 0x1cd   :  { %v4422_v48 = vpop.f32.mrf.mxu0  ;;  %v4424_v53 = vpop.f32.mrf.mxu1  ;;  %v1940_v59 = vadd.f32 %v4297_v50, %v4097_v43  ;;  %v1935_v50 = vadd.f32 %v4281_v9, %v4081_v31  ;;  %v1959_v9 = vadd.f32 %v4347_v24, %v4147_v29  ;;  %v4985_v24 = vld [vmem:[#allocation27_spill] sm:$0xff]  ;;  %v4988_v31 = vld [vmem:[#allocation30_spill] sm:$0xff] }
 0x1ce   :  { %4944 = vst [vmem:[#allocation54_spill] sm:$0xff] %v4422_v48  ;;  %4945 = vst [vmem:[#allocation55_spill] sm:$0xff] %v4424_v53 }
 0x1cf   :  { %v1767_v0 = vpop.f32.mrf.mxu0  ;;  %v2016_v57 = vpop.f32.mrf.mxu1 }
 0x1d0   :  { %v1884_v0 = vadd.f32 %v4143_v20, %v3948_v12  ;;  %v1908_v12 = vadd.f32 %v4209_v54, %v4009_v47  ;;  %v1903_v54 = vadd.f32 %v4193_v22, %v3993_v39  ;;  %v1927_v39 = vadd.f32 %v4259_v44, %v4059_v13 }
 0x1d1   :  { %v4426_v62 = vpop.f32.mrf.mxu0  ;;  %v4428_v26 = vpop.f32.mrf.mxu1  ;;  %v1932_v44 = vadd.f32 %v4275_v7, %v4075_v25  ;;  %v1956_v25 = vadd.f32 %v4341_v52, %v4141_v19 }
 0x1d2   :  { %4946 = vst [vmem:[#allocation56_spill] sm:$0xff] %v4426_v62 }
 0x1d3   :  { %v1772_v41 = vpop.f32.mrf.mxu0  ;;  %v2021_v6 = vpop.f32.mrf.mxu1 }
 0x1d4   :  { %v1895_v6 = vadd.f32 %v4171_v56, %v3972_v27  ;;  %v1900_v56 = vadd.f32 %v4187_v11, %v3988_v35  ;;  %v1924_v35 = vadd.f32 %v4253_v42, %v4053_v8  ;;  %v1919_v42 = vadd.f32 %v4237_v58, %v4037_v63 }
 0x1d5   :  { %v4430_v32 = vpop.f32.mrf.mxu0  ;;  %v4432_v40 = vpop.f32.mrf.mxu1  ;;  %v1943_v63 = vadd.f32 %v4303_v60, %v4103_v49  ;;  %v1948_v49 = vadd.f32 %v4319_v14, %v4119_v61 }
 0x1d6   :  { %4947 = vst [vmem:[#allocation57_spill] sm:$0xff] %v4430_v32 }
 0x1d7   :  { %v1775_v18 = vpop.f32.mrf.mxu0  ;;  %v2024_v2 = vpop.f32.mrf.mxu1 }
 0x1d9   :  { %v4436_v34 = vpop.f32.mrf.mxu1  ;;  %v3074_v48 = vpop.f32.mrf.mxu0 }
 0x1da   :  { %4948 = vst [vmem:[#allocation58_spill] sm:$0xff] %v4436_v34  ;;  %v4440_v57 = vadd.f32 %v3074_v48, %v1892_v16 }
 0x1db   :  { %v2029_v62 = vpop.f32.mrf.mxu1  ;;  %v2204_v41 = vpop.f32.mrf.mxu0 }
 0x1dc   :  { %v4444_v32 = vadd.f32 %v2204_v41, %v1884_v0 }
 0x1dd   :  { %v4446_v18 = vpop.f32.mrf.mxu1  ;;  %v3075_v2 = vpop.f32.mrf.mxu0 }
 0x1de   :  { %v4450_v46 = vadd.f32 %v3075_v2, %v1895_v6 }
 0x1df   :  { %v2032_v34 = vpop.f32.mrf.mxu1  ;;  %v2207_v53 = vpop.f32.mrf.mxu0 }
 0x1e0   :  { %v4454_v20 = vadd.f32 %v2207_v53, %v1887_v23 }
 0x1e1   :  { %v4456_v48 = vpop.f32.mrf.mxu1  ;;  %v3078_v27 = vpop.f32.mrf.mxu0 }
 0x1e2   :  { %v4460_v62 = vadd.f32 %v3078_v27, %v1908_v12 }
 0x1e3   :  { %v2037_v16 = vpop.f32.mrf.mxu1  ;;  %v2220_v0 = vpop.f32.mrf.mxu0 }
 0x1e4   :  { %v4464_v30 = vadd.f32 %v2220_v0, %v1900_v56 }
 0x1e5   :  { %v4466_v34 = vpop.f32.mrf.mxu1  ;;  %v3079_v47 = vpop.f32.mrf.mxu0 }
 0x1e6   :  { %v4470_v53 = vadd.f32 %v3079_v47, %v1911_v15 }
 0x1e7   :  { %v2040_v41 = vpop.f32.mrf.mxu1  ;;  %v2223_v6 = vpop.f32.mrf.mxu0 }
 0x1e8   :  { %4949 = vst [vmem:[#allocation59_spill] sm:$0xff] %v4470_v53  ;;  %v4474_v11 = vadd.f32 %v2223_v6, %v1903_v54 }
 0x1e9   :  { %v4476_v2 = vpop.f32.mrf.mxu1  ;;  %v3082_v51 = vpop.f32.mrf.mxu0 }
 0x1ea   :  { %v4480_v23 = vadd.f32 %v3082_v51, %v1924_v35 }
 0x1eb   :  { %v2045_v12 = vpop.f32.mrf.mxu1  ;;  %v2236_v27 = vpop.f32.mrf.mxu0 }
 0x1ec   :  { %4950 = vst [vmem:[#allocation60_spill] sm:$0xff] %v4480_v23  ;;  %v4484_v22 = vadd.f32 %v2236_v27, %v1916_v3  ;;  %v5002_v23 = vld [vmem:[#allocation58_spill] sm:$0xff] }
 0x1ed   :  { %v4486_v56 = vpop.f32.mrf.mxu1  ;;  %v3083_v8 = vpop.f32.mrf.mxu0 }
 0x1ee   :  { %v4490_v16 = vadd.f32 %v3083_v8, %v1927_v39 }
 0x1ef   :  { %v2048_v0 = vpop.f32.mrf.mxu1  ;;  %v2239_v15 = vpop.f32.mrf.mxu0 }
 0x1f0   :  { %4951 = vst [vmem:[#allocation61_spill] sm:$0xff] %v4490_v16  ;;  %v4494_v38 = vadd.f32 %v2239_v15, %v1919_v42  ;;  %v1951_v15 = vadd.f32 %v4325_v36, %v4125_v4 }
 0x1f1   :  { %v4496_v47 = vpop.f32.mrf.mxu1  ;;  %v3086_v13 = vpop.f32.mrf.mxu0 }
 0x1f2   :  { %4952 = vst [vmem:[#allocation62_spill] sm:$0xff] %v4494_v38  ;;  %v4500_v54 = vadd.f32 %v3086_v13, %v1940_v59  ;;  %v1972_v13 = vadd.f32 %v4379_v1, %v4185_v10  ;;  %v4982_v10 = vld [vmem:[#allocation29_spill] sm:$0xff] }
 0x1f3   :  { %v2053_v41 = vpop.f32.mrf.mxu1  ;;  %v2252_v6 = vpop.f32.mrf.mxu0 }
 0x1f4   :  { %4953 = vst [vmem:[#allocation63_spill] sm:$0xff] %v4500_v54  ;;  %v4504_v58 = vadd.f32 %v2252_v6, %v1932_v44  ;;  %v1964_v6 = vadd.f32 %v4363_v28, %v4163_v45  ;;  %v4979_v45 = vld [vmem:[#allocation24_spill] sm:$0xff] }
 0x1f5   :  { %v4506_v35 = vpop.f32.mrf.mxu1  ;;  %v3087_v43 = vpop.f32.mrf.mxu0 }
 0x1f6   :  { %4954 = vst [vmem:[#allocation64_spill] sm:$0xff] %v4504_v58  ;;  %v4510_v51 = vadd.f32 %v3087_v43, %v1943_v63  ;;  %v1975_v43 = vadd.f32 %v4384_v33, %v4191_v21  ;;  %v1988_v21 = vadd.f32 %v4396_v5, %v4229_v37  ;;  %v4963_v37 = vld [vmem:[#allocation43_spill] sm:$0xff] }
 0x1f7   :  { %v2056_v3 = vpop.f32.mrf.mxu1  ;;  %v2255_v12 = vpop.f32.mrf.mxu0 }
 0x1f8   :  { %4955 = vst [vmem:[#allocation65_spill] sm:$0xff] %v4510_v51  ;;  %v4514_v7 = vadd.f32 %v2255_v12, %v1935_v50  ;;  %v1967_v12 = vadd.f32 %v4369_v17, %v4169_v55  ;;  %v4961_v55 = vld [vmem:[#allocation38_spill] sm:$0xff] }
 0x1f9   :  { %v4516_v27 = vpop.f32.mrf.mxu1  ;;  %v3090_v60 = vpop.f32.mrf.mxu0 }
 0x1fa   :  { %4956 = vst [vmem:[#allocation66_spill] sm:$0xff] %v4514_v7  ;;  %v4520_v39 = vadd.f32 %v3090_v60, %v1956_v25 }
 0x1fb   :  { %v2061_v8 = vpop.f32.mrf.mxu1  ;;  %v2268_v42 = vpop.f32.mrf.mxu0 }
 0x1fc   :  { %v4526_v0 = vadd.f32 %v2268_v42, %v1948_v49 }
 0x1fd   :  { %v4528_v19 = vpop.f32.mrf.mxu1  ;;  %v3091_v52 = vpop.f32.mrf.mxu0 }
 0x1fe   :  { %4957 = vst [vmem:[#allocation67_spill] sm:$0xff] %v4526_v0  ;;  %v4532_v59 = vadd.f32 %v3091_v52, %v1959_v9  ;;  %v4960_v9 = vld [vmem:[#allocation20_spill] sm:$0xff]  ;;  %v4975_v52 = vld [vmem:[#allocation26_spill] sm:$0xff] }
 0x1ff   :  { %v2064_v61 = vpop.f32.mrf.mxu1  ;;  %v2271_v14 = vpop.f32.mrf.mxu0  ;;  %v1980_v17 = vadd.f32 %v4961_v55, %v4960_v9  ;;  %v4968_v9 = vld [vmem:[#allocation25_spill] sm:$0xff] }
 0x200   :  { %v4538_v29 = vadd.f32 %v2271_v14, %v1951_v15  ;;  %v4969_v55 = vld [vmem:[#allocation49_spill] sm:$0xff] }
 0x201   :  { %v4540_v44 = vpop.f32.mrf.mxu1  ;;  %v3094_v41 = vpop.f32.mrf.mxu0 }
 0x202   :  { %4958 = vst [vmem:[#allocation68_spill] sm:$0xff] %v4538_v29  ;;  %v4544_v63 = vadd.f32 %v3094_v41, %v1972_v13  ;;  %v4962_v13 = vld [vmem:[#allocation22_spill] sm:$0xff]  ;;  %v4972_v41 = vld [vmem:[#allocation23_spill] sm:$0xff] }
 0x203   :  { %v2069_v36 = vpop.f32.mrf.mxu1  ;;  %v2284_v4 = vpop.f32.mrf.mxu0  ;;  %v1991_v5 = vadd.f32 %v4963_v37, %v4962_v13 }
 0x204   :  { %v4550_v1 = vadd.f32 %v2284_v4, %v1964_v6 }
 0x205   :  { %v4552_v50 = vpop.f32.mrf.mxu1  ;;  %v3095_v3 = vpop.f32.mrf.mxu0 }
 0x206   :  { %v4558_v28 = vadd.f32 %v3095_v3, %v1975_v43  ;;  %v4965_v43 = vld [vmem:[#allocation21_spill] sm:$0xff]  ;;  %v4966_v3 = vld [vmem:[#allocation40_spill] sm:$0xff] }
 0x207   :  { %v2072_v25 = vpop.f32.mrf.mxu1  ;;  %v2287_v60 = vpop.f32.mrf.mxu0 }
 0x208   :  { %v4564_v49 = vadd.f32 %v2287_v60, %v1967_v12  ;;  %v1983_v12 = vadd.f32 %v4966_v3, %v4965_v43  ;;  %v4973_v43 = vld [vmem:[#allocation45_spill] sm:$0xff] }
 0x209   :  { %v4566_v8 = vpop.f32.mrf.mxu1  ;;  %v3098_v42 = vpop.f32.mrf.mxu0  ;;  %v1996_v3 = vadd.f32 %v4973_v43, %v4972_v41  ;;  %v4980_v41 = vld [vmem:[#allocation47_spill] sm:$0xff] }
 0x20a   :  { %4959 = vst [vmem:[#allocation69_spill] sm:$0xff] %v4566_v8  ;;  %v4572_v15 = vadd.f32 %v3098_v42, %v1988_v21  ;;  %v1999_v43 = vadd.f32 %v4980_v41, %v4979_v45  ;;  %v4986_v45 = vld [vmem:[#allocation53_spill] sm:$0xff] }
 0x20b   :  { %v2077_v61 = vpop.f32.mrf.mxu1  ;;  %v2300_v14 = vpop.f32.mrf.mxu0  ;;  %v2012_v41 = vadd.f32 %v4986_v45, %v4985_v24  ;;  %v4992_v24 = vld [vmem:[#allocation55_spill] sm:$0xff] }
 0x20c   :  { %v4578_v6 = vadd.f32 %v2300_v14, %v1980_v17  ;;  %v2004_v61 = vadd.f32 %v4969_v55, %v4968_v9  ;;  %v4976_v9 = vld [vmem:[#allocation51_spill] sm:$0xff] }
 0x20d   :  { %v4580_v36 = vpop.f32.mrf.mxu1  ;;  %v3099_v4 = vpop.f32.mrf.mxu0  ;;  %v2007_v55 = vadd.f32 %v4976_v9, %v4975_v52  ;;  %v2020_v52 = vadd.f32 %v4428_v26, %v4982_v10  ;;  %v2023_v26 = vadd.f32 %v4432_v40, %v4988_v31 }
 0x20e   :  { %4964 = vst [vmem:[#allocation20_spill] sm:$0xff] %v4580_v36  ;;  %v4586_v60 = vadd.f32 %v3099_v4, %v1991_v5 }
 0x20f   :  { %v2080_v21 = vpop.f32.mrf.mxu1  ;;  %v2303_v42 = vpop.f32.mrf.mxu0 }
 0x210   :  { %4967 = vst [vmem:[#allocation38_spill] sm:$0xff] %v4586_v60  ;;  %v4592_v14 = vadd.f32 %v2303_v42, %v1983_v12  ;;  %v5005_v60 = vld [vmem:[#allocation3_spill] sm:$0xff] }
 0x211   :  { %v4594_v13 = vpop.f32.mrf.mxu1  ;;  %v3102_v37 = vpop.f32.mrf.mxu0 }
 0x212   :  { %4970 = vst [vmem:[#allocation22_spill] sm:$0xff] %v4592_v14  ;;  %4971 = vst [vmem:[#allocation43_spill] sm:$0xff] %v4594_v13  ;;  %v4600_v4 = vadd.f32 %v3102_v37, %v2004_v61 }
 0x213   :  { %v2085_v21 = vpop.f32.mrf.mxu1  ;;  %v2316_v25 = vpop.f32.mrf.mxu0 }
 0x214   :  { %4974 = vst [vmem:[#allocation21_spill] sm:$0xff] %v4600_v4  ;;  %v4606_v42 = vadd.f32 %v2316_v25, %v1996_v3 }
 0x215   :  { %v4608_v17 = vpop.f32.mrf.mxu1  ;;  %v3103_v33 = vpop.f32.mrf.mxu0 }
 0x216   :  { %4977 = vst [vmem:[#allocation40_spill] sm:$0xff] %v4606_v42  ;;  %4978 = vst [vmem:[#allocation25_spill] sm:$0xff] %v4608_v17  ;;  %v4614_v37 = vadd.f32 %v3103_v33, %v2007_v55  ;;  %v4991_v17 = vld [vmem:[#allocation28_spill] sm:$0xff]  ;;  %v5001_v42 = vld [vmem:[#allocation31_spill] sm:$0xff] }
 0x217   :  { %v2088_v21 = vpop.f32.mrf.mxu1  ;;  %v2319_v5 = vpop.f32.mrf.mxu0  ;;  %v2015_v45 = vadd.f32 %v4992_v24, %v4991_v17  ;;  %v2028_v4 = vadd.f32 %v5002_v23, %v5001_v42  ;;  %v5006_v23 = vmax.f32 %v4444_v32, %v4520_v39  ;;  %v5010_v32 = vld [vmem:[#allocation4_spill] sm:$0xff] }
 0x218   :  { %4981 = vst [vmem:[#allocation49_spill] sm:$0xff] %v4614_v37  ;;  %v4620_v3 = vadd.f32 %v2319_v5, %v1999_v43 }
 0x219   :  { %v4622_v9 = vpop.f32.mrf.mxu1  ;;  %v3106_v12 = vpop.f32.mrf.mxu0 }
 0x21a   :  { %4983 = vst [vmem:[#allocation23_spill] sm:$0xff] %v4620_v3  ;;  %4984 = vst [vmem:[#allocation45_spill] sm:$0xff] %v4622_v9  ;;  %v4628_v55 = vadd.f32 %v3106_v12, %v2020_v52 }
 0x21b   :  { %v2093_v21 = vpop.f32.mrf.mxu1  ;;  %v2332_v61 = vpop.f32.mrf.mxu0 }
 0x21c   :  { %4987 = vst [vmem:[#allocation26_spill] sm:$0xff] %v4628_v55  ;;  %v4634_v5 = vadd.f32 %v2332_v61, %v2012_v41 }
 0x21d   :  { %v4636_v43 = vpop.f32.mrf.mxu1  ;;  %v3107_v25 = vpop.f32.mrf.mxu0 }
 0x21e   :  { %4989 = vst [vmem:[#allocation51_spill] sm:$0xff] %v4634_v5  ;;  %4990 = vst [vmem:[#allocation24_spill] sm:$0xff] %v4636_v43  ;;  %v4642_v52 = vadd.f32 %v3107_v25, %v2023_v26 }
 0x21f   :  { %v2096_v21 = vpop.f32.mrf.mxu1  ;;  %v2335_v33 = vpop.f32.mrf.mxu0 }
 0x220   :  { %4993 = vst [vmem:[#allocation47_spill] sm:$0xff] %v4642_v52  ;;  %v4646_v31 = vadd.f32 %v2335_v33, %v2015_v45 }
 0x221   :  { %v2099_v61 = vpop.f32.mrf.mxu1  ;;  %v4648_v41 = vpop.f32.mrf.mxu0 }
 0x222   :  { %4994 = vst [vmem:[#allocation29_spill] sm:$0xff] %v4646_v31 }
 0x223   :  { %v2101_v55 = vpop.f32.mrf.mxu1  ;;  %v2348_v17 = vpop.f32.mrf.mxu0 }
 0x224   :  { %v2349_v53 = vadd.f32 %v2348_v17, %v2028_v4 }
 0x225   :  { %v2102_v24 = vpop.f32.mrf.mxu1  ;;  %v4652_v0 = vpop.f32.mrf.mxu0 }
 0x227   :  { %v2104_v25 = vpop.f32.mrf.mxu1  ;;  %v2351_v26 = vpop.f32.mrf.mxu0 }
 0x229   :  { %v2107_v21 = vpop.f32.mrf.mxu1  ;;  %v4654_v12 = vpop.f32.mrf.mxu0 }
 0x22a   :  { %v2108_v39 = vadd.f32 %v2107_v21, %v5010_v32 }
 0x22b   :  { %v2109_v5 = vpop.f32.mrf.mxu1  ;;  %v2364_v40 = vpop.f32.mrf.mxu0 }
 0x22d   :  { %v2110_v33 = vpop.f32.mrf.mxu1  ;;  %v4656_v45 = vpop.f32.mrf.mxu0 }
 0x22f   :  { %v2112_v52 = vpop.f32.mrf.mxu1  ;;  %v4658_v29 = vpop.f32.mrf.mxu0 }
 0x231   :  { %v2115_v54 = vpop.f32.mrf.mxu1  ;;  %v4660_v10 = vpop.f32.mrf.mxu0 }
 0x232   :  { %4995 = vst [vmem:[#allocation27_spill] sm:$0xff] %v4660_v10 }
 0x233   :  { %v2117_v55 = vpop.f32.mrf.mxu1  ;;  %v4662_v31 = vpop.f32.mrf.mxu0 }
 0x235   :  { %v2118_v51 = vpop.f32.mrf.mxu1  ;;  %v4664_v25 = vpop.f32.mrf.mxu0 }
 0x236   :  { %4996 = vst [vmem:[#allocation53_spill] sm:$0xff] %v4664_v25 }
 0x237   :  { %v2120_v3 = vpop.f32.mrf.mxu1  ;;  %v4666_v16 = vpop.f32.mrf.mxu0 }
 0x238   :  { %v5003_v3 = vld [vmem:[#allocation2_spill] sm:$0xff] }
 0x239   :  { %v4668_v5 = vpop.f32.mrf.mxu1  ;;  %v4670_v37 = vpop.f32.mrf.mxu0  ;;  %v2100_v58 = vadd.f32 %v2099_v61, %v5003_v3 }
 0x23a   :  { %4997 = vst [vmem:[#allocation30_spill] sm:$0xff] %v4670_v37 }
 0x23b   :  { %v2125_v7 = vpop.f32.mrf.mxu1  ;;  %v4672_v52 = vpop.f32.mrf.mxu0 }
 0x23c   :  { %4998 = vst [vmem:[#allocation28_spill] sm:$0xff] %v4672_v52  ;;  %v5004_v52 = vld [vmem:[#allocation32_spill] sm:$0xff] }
 0x23d   :  { %v4674_v43 = vpop.f32.mrf.mxu1  ;;  %v4676_v9 = vpop.f32.mrf.mxu0  ;;  %v2031_v36 = vadd.f32 %v4446_v18, %v5004_v52  ;;  %v5007_v18 = vld [vmem:[#allocation35_spill] sm:$0xff]  ;;  %v5011_v52 = vmax.f32 %v4454_v20, %v4532_v59  ;;  %v5015_v20 = vld [vmem:[#allocation5_spill] sm:$0xff] }
 0x23e   :  { %4999 = vst [vmem:[#allocation55_spill] sm:$0xff] %v4676_v9  ;;  %v2103_v9 = vadd.f32 %v2102_v24, %v5005_v60  ;;  %v5008_v60 = vld [vmem:[#allocation6_spill] sm:$0xff]  ;;  %v2111_v59 = vadd.f32 %v2110_v33, %v5015_v20 }
 0x23f   :  { %v2128_v55 = vpop.f32.mrf.mxu1  ;;  %v4678_v13 = vpop.f32.mrf.mxu0  ;;  %v2352_v8 = vadd.f32 %v2351_v26, %v2031_v36  ;;  %v5009_v36 = vld [vmem:[#allocation33_spill] sm:$0xff] }
 0x240   :  { %5000 = vst [vmem:[#allocation70_spill] sm:$0xff] %v4678_v13  ;;  %v2036_v17 = vadd.f32 %v4456_v48, %v5009_v36 }
 0x241   :  { %v2131_v25 = vpop.f32.mrf.mxu1  ;;  %v3126_v14 = vpop.f32.mrf.mxu0 }
 0x242   :  { %v2421_v10 = vadd.f32 %v3126_v14, %v2100_v58  ;;  %v4696_v58 = vld [vmem:[%s4870_s2] ss:$0 sm:$0xff]  ;;  %v2357_v48 = vadd.f32 %v4648_v41, %v2036_v17  ;;  %v5017_v41 = vmax.f32 %v4464_v30, %v4544_v63 }
 0x243   :  { %v2133_v37 = vpop.f32.mrf.mxu1  ;;  %v4683_v7 = vpop.f32.mrf.mxu0 }
 0x244   :  { %v2509_v55 = vmax.f32 %v2349_v53, %v2421_v10  ;;  %v2044_v53 = vadd.f32 %v4476_v2, %v5007_v18  ;;  %v2116_v37 = vadd.f32 %v2115_v54, %v5008_v60  ;;  %v5012_v2 = vld [vmem:[#allocation34_spill] sm:$0xff]  ;;  %v5013_v18 = vld [vmem:[#allocation36_spill] sm:$0xff]  ;;  %v5016_v60 = vld [vmem:[#allocation7_spill] sm:$0xff] }
 0x245   :  { %v4688_v38 = vpop.f32.mrf.mxu1  ;;  %v3127_v13 = vpop.f32.mrf.mxu0  ;;  %v2039_v54 = vadd.f32 %v4466_v34, %v5012_v2  ;;  %v5020_v2 = vmax.f32 %v4440_v57, %v4550_v1 }
 0x246   :  { %v2527_v42 = vmax.f32 %v5006_v23, %v2509_v55  ;;  %v2424_v61 = vadd.f32 %v3127_v13, %v2103_v9  ;;  %v2365_v24 = vadd.f32 %v2364_v40, %v2044_v53  ;;  %v2047_v40 = vadd.f32 %v4486_v56, %v5013_v18  ;;  %v5024_v18 = vld [vmem:[#allocation46_spill] sm:$0xff] }
 0x247   :  { %v2136_v14 = vpop.f32.mrf.mxu1  ;;  %v4698_v4 = vpop.f32.mrf.mxu0 }
 0x248   :  { %v2510_v10 = vmax.f32 %v2352_v8, %v2424_v61  ;;  %v2552_v26 = vadd.f32 %v4696_v58, %v2527_v42  ;;  %v5014_v42 = vld [vmem:[#allocation37_spill] sm:$0xff]  ;;  %v2368_v33 = vadd.f32 %v4658_v29, %v2047_v40  ;;  %v5025_v40 = vld [vmem:[#allocation8_spill] sm:$0xff] }
 0x249   :  { %v4706_v13 = vpop.f32.mrf.mxu1  ;;  %v3130_v9 = vpop.f32.mrf.mxu0  ;;  %v2052_v53 = vadd.f32 %v4496_v47, %v5014_v42  ;;  %v2124_v57 = vadd.f32 %v4668_v5, %v5025_v40  ;;  %v5039_v40 = vld [vmem:[#allocation50_spill] sm:$0xff] }
 0x24a   :  { %v2528_v3 = vmax.f32 %v5011_v52, %v2510_v10  ;;  %v2437_v55 = vadd.f32 %v3130_v9, %v2116_v37  ;;  %v2119_v37 = vadd.f32 %v2118_v51, %v5016_v60  ;;  %v2570_v36 = vmax.f32 %v2552_v26, 0.0  ;;  %v5018_v9 = vld [vmem:[#allocation39_spill] sm:$0xff] }
 0x24b   :  { %v2141_v8 = vpop.f32.mrf.mxu1  ;;  %v2428_v23 = vpop.f32.mrf.mxu0  ;;  %v2055_v56 = vadd.f32 %v4506_v35, %v5018_v9  ;;  %v5022_v35 = vld [vmem:[#allocation44_spill] sm:$0xff]  ;;  %v5027_v60 = vld [vmem:[#allocation11_spill] sm:$0xff]  ;;  %v5029_v9 = vld [vmem:[#allocation9_spill] sm:$0xff] }
 0x24c   :  { %v2553_v21 = vadd.f32 %v4696_v58, %v2528_v3  ;;  %v2513_v61 = vmax.f32 %v2365_v24, %v2437_v55  ;;  %v2429_v14 = vadd.f32 %v2428_v23, %v2108_v39  ;;  %v5019_v24 = vld [vmem:[#allocation41_spill] sm:$0xff]  ;;  %v2360_v55 = vadd.f32 %v4652_v0, %v2039_v54  ;;  %v5021_v8 = vld [vmem:[#allocation42_spill] sm:$0xff] }
 0x24d   :  { %v4722_v10 = vpop.f32.mrf.mxu1  ;;  %v3131_v34 = vpop.f32.mrf.mxu0  ;;  %v2060_v47 = vadd.f32 %v4516_v27, %v5019_v24  ;;  %v2063_v23 = vadd.f32 %v4528_v19, %v5021_v8  ;;  %v5023_v27 = vld [vmem:[#allocation10_spill] sm:$0xff]  ;;  %v2071_v0 = vadd.f32 %v4552_v50, %v5024_v18  ;;  %v2135_v5 = vadd.f32 %v4688_v38, %v5027_v60 }
 0x24e   :  { %v2571_v32 = vmax.f32 %v2553_v21, 0.0  ;;  %v2531_v17 = vmax.f32 %v5017_v41, %v2513_v61  ;;  %v2511_v39 = vmax.f32 %v2357_v48, %v2429_v14  ;;  %v2440_v52 = vadd.f32 %v3131_v34, %v2119_v37  ;;  %v5037_v18 = vld [vmem:[#allocation38_spill] sm:$0xff] }
 0x24f   :  { %v2144_v51 = vpop.f32.mrf.mxu1  ;;  %v2431_v3 = vpop.f32.mrf.mxu0  ;;  %v2068_v48 = vadd.f32 %v4540_v44, %v5022_v35  ;;  %v2132_v21 = vadd.f32 %v2131_v25, %v5023_v27  ;;  %v2381_v54 = vadd.f32 %v4662_v31, %v2060_v47  ;;  %v5026_v25 = vmax.f32 %v4474_v11, %v4558_v28  ;;  %v5035_v35 = vld [vmem:[#allocation14_spill] sm:$0xff] }
 0x250   :  { %v2974_v26 = vpack.c.bf16 %v2571_v32, %v2570_v36  ;;  %v2529_v30 = vmax.f32 %v5020_v2, %v2511_v39  ;;  %v2432_v63 = vadd.f32 %v2431_v3, %v2111_v59  ;;  %v2514_v29 = vmax.f32 %v2368_v33, %v2440_v52  ;;  %v5033_v2 = vld [vmem:[#allocation69_spill] sm:$0xff]  ;;  %v5044_v60 = vld [vmem:[#allocation22_spill] sm:$0xff] }
 0x251   :  { %v2147_v61 = vpop.f32.mrf.mxu1  ;;  %v3134_v14 = vpop.f32.mrf.mxu0  ;;  %v2556_v44 = vadd.f32 %v4696_v58, %v2531_v17  ;;  %v2373_v31 = vadd.f32 %v4654_v12, %v2052_v53  ;;  %v5028_v37 = vmax.f32 %v4450_v46, %v4564_v49  ;;  %v2376_v32 = vadd.f32 %v4656_v45, %v2055_v56 }
 0x252   :  { %2975 = vst [vmem:[%s4871_s3] sm:$0xff] %v2974_v26   ;;  %v2512_v19 = vmax.f32 %v2360_v55, %v2432_v63  ;;  %v2554_v1 = vadd.f32 %v4696_v58, %v2529_v30  ;;  %v2532_v42 = vmax.f32 %v5026_v25, %v2514_v29  ;;  %v2453_v20 = vadd.f32 %v3134_v14, %v2132_v21  ;;  %v5032_v26 = vld [vmem:[#allocation48_spill] sm:$0xff]  ;;  %v5036_v14 = vld [vmem:[#allocation62_spill] sm:$0xff] }
 0x253   :  { %v2149_v50 = vpop.f32.mrf.mxu1  ;;  %v2444_v59 = vpop.f32.mrf.mxu0  ;;  %v2384_v41 = vadd.f32 %v4666_v16, %v2063_v23  ;;  %v2127_v12 = vadd.f32 %v4674_v43, %v5029_v9  ;;  %v2574_v47 = vmax.f32 %v2556_v44, 0.0  ;;  %v5030_v45 = vmax.f32 %v4484_v22, %v4572_v15  ;;  %v5034_v63 = vld [vmem:[#allocation12_spill] sm:$0xff] }
 0x254   :  { %v2530_v34 = vmax.f32 %v5028_v37, %v2512_v19  ;;  %v2445_v36 = vadd.f32 %v2444_v59, %v2124_v57  ;;  %v2557_v11 = vadd.f32 %v4696_v58, %v2532_v42  ;;  %v2517_v28 = vmax.f32 %v2381_v54, %v2453_v20  ;;  %v5040_v57 = vld [vmem:[#allocation20_spill] sm:$0xff]  ;;  %v5042_v20 = vld [vmem:[#allocation27_spill] sm:$0xff] }
 0x255   :  { %v2150_v17 = vpop.f32.mrf.mxu1  ;;  %v3135_v39 = vpop.f32.mrf.mxu0  ;;  %v2572_v46 = vmax.f32 %v2554_v1, 0.0  ;;  %v5031_v51 = vmax.f32 %v4460_v62, %v4578_v6  ;;  %v2076_v30 = vadd.f32 %v5033_v2, %v5032_v26  ;;  %v2140_v8 = vadd.f32 %v4706_v13, %v5034_v63  ;;  %v5041_v44 = vld [vmem:[#allocation28_spill] sm:$0xff] }
 0x256   :  { %v2555_v53 = vadd.f32 %v4696_v58, %v2530_v34  ;;  %v2515_v38 = vmax.f32 %v2373_v31, %v2445_v36  ;;  %v2456_v24 = vadd.f32 %v3135_v39, %v2135_v5  ;;  %v2575_v49 = vmax.f32 %v2557_v11, 0.0  ;;  %v5043_v31 = vld [vmem:[#allocation59_spill] sm:$0xff]  ;;  %v5046_v36 = vld [vmem:[#allocation53_spill] sm:$0xff]  ;;  %v5056_v63 = vld [vmem:[#allocation52_spill] sm:$0xff] }
 0x257   :  { %v2535_v56 = vmax.f32 %v5030_v45, %v2517_v28  ;;  %v2152_v16 = vpop.f32.mrf.mxu1  ;;  %v2447_v33 = vpop.f32.mrf.mxu0  ;;  %v2148_v27 = vadd.f32 %v2147_v61, %v5035_v35  ;;  %v5038_v62 = vmax.f32 %v5036_v14, %v5037_v18  ;;  %v2079_v19 = vadd.f32 %v5040_v57, %v5039_v40  ;;  %v5048_v28 = vld [vmem:[#allocation15_spill] sm:$0xff]  ;;  %v5058_v35 = vld [vmem:[#allocation56_spill] sm:$0xff] }
 0x258   :  { %v2573_v52 = vmax.f32 %v2555_v53, 0.0  ;;  %v2533_v3 = vmax.f32 %v5031_v51, %v2515_v38  ;;  %v2518_v55 = vmax.f32 %v2384_v41, %v2456_v24  ;;  %v2448_v43 = vadd.f32 %v2447_v33, %v2127_v12  ;;  %v5047_v41 = vld [vmem:[#allocation13_spill] sm:$0xff]  ;;  %v5062_v40 = vld [vmem:[#allocation16_spill] sm:$0xff] }
 0x259   :  { %v2984_v23 = vpack.c.bf16 %v2575_v49, %v2574_v47  ;;  %v2155_v22 = vpop.f32.mrf.mxu1  ;;  %v3138_v15 = vpop.f32.mrf.mxu0  ;;  %v2560_v29 = vadd.f32 %v4696_v58, %v2535_v56  ;;  %v2397_v1 = vadd.f32 %v5041_v44, %v2076_v30  ;;  %v2389_v50 = vadd.f32 %v5042_v20, %v2068_v48  ;;  %v5050_v56 = vld [vmem:[#allocation64_spill] sm:$0xff]  ;;  %v5051_v16 = vld [vmem:[#allocation21_spill] sm:$0xff]  ;;  %v5063_v44 = vld [vmem:[#allocation18_spill] sm:$0xff] }
 0x25a   :  { %v2979_v21 = vpack.c.bf16 %v2573_v52, %v2572_v46  ;;  %v2536_v6 = vmax.f32 %v5038_v62, %v2518_v55  ;;  %v2516_v54 = vmax.f32 %v2376_v32, %v2448_v43  ;;  %v2558_v13 = vadd.f32 %v4696_v58, %v2533_v3  ;;  %v5049_v46 = vld [vmem:[#allocation70_spill] sm:$0xff]  ;;  %v5053_v55 = vld [vmem:[#allocation60_spill] sm:$0xff] }
 0x25b   :  { %3017 = vst [vmem:[%s4871_s3 + $0x10] sm:$0xff] %v2984_v23   ;;  %v2469_v61 = vadd.f32 %v3138_v15, %v2148_v27  ;;  %v2157_v25 = vpop.f32.mrf.mxu1  ;;  %v2460_v42 = vpop.f32.mrf.mxu0  ;;  %v5045_v5 = vmax.f32 %v5043_v31, %v5044_v60  ;;  %v2392_v32 = vadd.f32 %v5046_v36, %v2071_v0  ;;  %v2143_v11 = vadd.f32 %v4722_v10, %v5047_v41  ;;  %v5054_v43 = vld [vmem:[#allocation40_spill] sm:$0xff]  ;;  %v5059_v27 = vld [vmem:[#allocation45_spill] sm:$0xff]  ;;  %v5065_v20 = vld [vmem:[#allocation66_spill] sm:$0xff] }
 0x25c   :  { %3016 = vst [vmem:[%s4871_s3 + $0x8] sm:$0xff] %v2979_v21   ;;  %v2561_v59 = vadd.f32 %v4696_v58, %v2536_v6  ;;  %v2461_v34 = vadd.f32 %v2460_v42, %v2140_v8  ;;  %v2151_v39 = vadd.f32 %v2150_v17, %v5048_v28  ;;  %v2578_v53 = vmax.f32 %v2560_v29, 0.0  ;;  %v5057_v8 = vld [vmem:[#allocation43_spill] sm:$0xff]  ;;  %v5060_v21 = vld [vmem:[#allocation57_spill] sm:$0xff]  ;;  %v5061_v29 = vld [vmem:[#allocation24_spill] sm:$0xff] }
 0x25d   :  { %v2534_v37 = vmax.f32 %v5045_v5, %v2516_v54  ;;  %v2521_v9 = vmax.f32 %v2397_v1, %v2469_v61  ;;  %v2158_v48 = vpop.f32.mrf.mxu1  ;;  %v3139_v12 = vpop.f32.mrf.mxu0  ;;  %v2400_v49 = vadd.f32 %v5049_v46, %v2079_v19  ;;  %v2576_v45 = vmax.f32 %v2558_v13, 0.0  ;;  %v5064_v13 = vld [vmem:[#allocation30_spill] sm:$0xff] }
 0x25e   :  { %v2579_v38 = vmax.f32 %v2561_v59, 0.0  ;;  %v2519_v47 = vmax.f32 %v2389_v50, %v2461_v34  ;;  %v5052_v33 = vmax.f32 %v5050_v56, %v5051_v16  ;;  %v2472_v52 = vadd.f32 %v3139_v12, %v2151_v39  ;;  %v5066_v50 = vld [vmem:[#allocation49_spill] sm:$0xff]  ;;  %v5069_v34 = vld [vmem:[#allocation23_spill] sm:$0xff]  ;;  %v5071_v28 = vld [vmem:[#allocation54_spill] sm:$0xff] }
 0x25f   :  { %v2559_v24 = vadd.f32 %v4696_v58, %v2534_v37  ;;  %v2160_v51 = vpop.f32.mrf.mxu1  ;;  %v2463_v10 = vpop.f32.mrf.mxu0  ;;  %v5055_v26 = vmax.f32 %v5053_v55, %v5054_v43  ;;  %v2084_v23 = vadd.f32 %v5057_v8, %v5056_v63  ;;  %v2092_v15 = vadd.f32 %v5059_v27, %v5058_v35  ;;  %v5072_v39 = vld [vmem:[#allocation25_spill] sm:$0xff] }
 0x260   :  { %v2539_v0 = vmax.f32 %v5052_v33, %v2521_v9  ;;  %v2994_v3 = vpack.c.bf16 %v2579_v38, %v2578_v53  ;;  %v2464_v30 = vadd.f32 %v2463_v10, %v2143_v11  ;;  %v2095_v14 = vadd.f32 %v5061_v29, %v5060_v21  ;;  %v5074_v33 = vld [vmem:[#allocation17_spill] sm:$0xff] }
 0x261   :  { %v2577_v17 = vmax.f32 %v2559_v24, 0.0  ;;  %v2537_v2 = vmax.f32 %v5055_v26, %v2519_v47  ;;  %v2522_v18 = vmax.f32 %v2400_v49, %v2472_v52  ;;  %v2163_v62 = vpop.f32.mrf.mxu1  ;;  %v3142_v6 = vpop.f32.mrf.mxu0  ;;  %v2156_v57 = vadd.f32 %v2155_v22, %v5062_v40  ;;  %v5068_v22 = vld [vmem:[#allocation61_spill] sm:$0xff]  ;;  %v5073_v49 = vld [vmem:[#allocation19_spill] sm:$0xff] }
 0x262   :  { %3019 = vst [vmem:[%s4871_s3 + $0x20] sm:$0xff] %v2994_v3   ;;  %v2520_v19 = vmax.f32 %v2392_v32, %v2464_v30  ;;  %v2164_v1 = vadd.f32 %v2163_v62, %v5063_v44  ;;  %v2405_v61 = vadd.f32 %v5064_v13, %v2084_v23  ;;  %v2564_v25 = vadd.f32 %v4696_v58, %v2539_v0  ;;  %v5078_v26 = vld [vmem:[#allocation63_spill] sm:$0xff] }
 0x263   :  { %v2989_v54 = vpack.c.bf16 %v2577_v17, %v2576_v45  ;;  %v2562_v42 = vadd.f32 %v4696_v58, %v2537_v2  ;;  %v5067_v59 = vmax.f32 %v5065_v20, %v5066_v50  ;;  %v2165_v60 = vpop.f32.mrf.mxu1  ;;  %v2476_v5 = vpop.f32.mrf.mxu0  ;;  %v2413_v37 = vadd.f32 %v4683_v7, %v2092_v15  ;;  %v5075_v17 = vld [vmem:[#allocation67_spill] sm:$0xff] }
 0x264   :  { %v5070_v36 = vmax.f32 %v5068_v22, %v5069_v34  ;;  %v2485_v41 = vadd.f32 %v3142_v6, %v2164_v1  ;;  %v2477_v11 = vadd.f32 %v2476_v5, %v2156_v57  ;;  %v2087_v9 = vadd.f32 %v5072_v39, %v5071_v28  ;;  %v5079_v2 = vld [vmem:[#allocation51_spill] sm:$0xff]  ;;  %v5085_v57 = vld [vmem:[#allocation65_spill] sm:$0xff] }
 0x265   :  { %v2540_v31 = vmax.f32 %v5067_v59, %v2522_v18  ;;  %3018 = vst [vmem:[%s4871_s3 + $0x18] sm:$0xff] %v2989_v54   ;;  %v2416_v12 = vadd.f32 %v4698_v4, %v2095_v14  ;;  %v2166_v38 = vpop.f32.mrf.mxu1  ;;  %v3143_v24 = vpop.f32.mrf.mxu0  ;;  %v2582_v56 = vmax.f32 %v2564_v25, 0.0  ;;  %v2580_v16 = vmax.f32 %v2562_v42, 0.0  ;;  %v5076_v4 = vld [vmem:[#allocation26_spill] sm:$0xff]  ;;  %v5081_v23 = vld [vmem:[#allocation55_spill] sm:$0xff]  ;;  %v5082_v18 = vld [vmem:[#allocation68_spill] sm:$0xff] }
 0x266   :  { %v2538_v32 = vmax.f32 %v5070_v36, %v2520_v19  ;;  %v2525_v47 = vmax.f32 %v2413_v37, %v2485_v41  ;;  %v2523_v46 = vmax.f32 %v2405_v61, %v2477_v11  ;;  %v2167_v45 = vadd.f32 %v2166_v38, %v5073_v49  ;;  %v5083_v62 = vld [vmem:[#allocation47_spill] sm:$0xff]  ;;  %v5086_v19 = vld [vmem:[#allocation29_spill] sm:$0xff] }
 0x267   :  { %v2565_v53 = vadd.f32 %v4696_v58, %v2540_v31  ;;  %v2159_v0 = vadd.f32 %v2158_v48, %v5074_v33  ;;  %v2168_v51 = vpop.f32.mrf.mxu1  ;;  %v2479_v10 = vpop.f32.mrf.mxu0  ;;  %v5077_v55 = vmax.f32 %v5075_v17, %v5076_v4  ;;  %v5080_v30 = vmax.f32 %v5078_v26, %v5079_v2 }
 0x268   :  { %v2563_v7 = vadd.f32 %v4696_v58, %v2538_v32  ;;  %v2488_v8 = vadd.f32 %v3143_v24, %v2167_v45  ;;  %v2408_v35 = vadd.f32 %v5081_v23, %v2087_v9  ;;  %v5084_v6 = vmax.f32 %v5082_v18, %v5083_v62 }
 0x269   :  { %v2583_v52 = vmax.f32 %v2565_v53, 0.0  ;;  %v2543_v43 = vmax.f32 %v5077_v55, %v2525_v47  ;;  %v2541_v63 = vmax.f32 %v5080_v30, %v2523_v46  ;;  %v2480_v15 = vadd.f32 %v2479_v10, %v2159_v0 }
 0x26a   :  { %v2581_v3 = vmax.f32 %v2563_v7, 0.0  ;;  %v2526_v29 = vmax.f32 %v2416_v12, %v2488_v8  ;;  %v5087_v44 = vmax.f32 %v5085_v57, %v5086_v19 }
 0x26b   :  { %v3004_v27 = vpack.c.bf16 %v2583_v52, %v2582_v56  ;;  %v2524_v48 = vmax.f32 %v2408_v35, %v2480_v15  ;;  %v2568_v14 = vadd.f32 %v4696_v58, %v2543_v43  ;;  %v2566_v40 = vadd.f32 %v4696_v58, %v2541_v63 }
 0x26c   :  { %v2999_v21 = vpack.c.bf16 %v2581_v3, %v2580_v16  ;;  %v2544_v54 = vmax.f32 %v5084_v6, %v2526_v29 }
 0x26d   :  { %3021 = vst [vmem:[%s4871_s3 + $0x30] sm:$0xff] %v3004_v27   ;;  %v2542_v1 = vmax.f32 %v5087_v44, %v2524_v48  ;;  %v2586_v25 = vmax.f32 %v2568_v14, 0.0  ;;  %v2584_v20 = vmax.f32 %v2566_v40, 0.0 }
 0x26e   :  { %3020 = vst [vmem:[%s4871_s3 + $0x28] sm:$0xff] %v2999_v21   ;;  %v2569_v13 = vadd.f32 %v4696_v58, %v2544_v54 }
 0x26f   :  { %v2567_v61 = vadd.f32 %v4696_v58, %v2542_v1 }
 0x270   :  { %v2587_v42 = vmax.f32 %v2569_v13, 0.0 }
 0x271   :  { %v2585_v50 = vmax.f32 %v2567_v61, 0.0 }
 0x272   :  { %v3014_v59 = vpack.c.bf16 %v2587_v42, %v2586_v25 }
 0x273   :  { %v3009_v31 = vpack.c.bf16 %v2585_v50, %v2584_v20 }
 0x274   :  { %3023 = vst [vmem:[%s4871_s3 + $0x40] sm:$0xff] %v3014_v59  }
 0x275   :  { %3022 = vst [vmem:[%s4871_s3 + $0x38] sm:$0xff] %v3009_v31  }

// kernel: mnist_forward.5
= control target key start
LH: loop header
LB: loop body
LE: loop exit
PB: predicated region body
PF: predicated region fallthrough
CT: control target
= control target key end

     0   :  { %vm8761_vm0 = vmmov 0   ;;  %s11045_s1 = inlined_call_operand.vmem [shape: bf16[9216,128], index: 1, kind: input, shape index: {}]   ;;  %s11046_s0 = inlined_call_operand.vmem [shape: bf16[16,9216], index: 0, kind: input, shape index: {}]   ;;  %s11047_s2 = inlined_call_operand.vmem [shape: f32[1,128], index: 2, kind: input, shape index: {}]   ;;  %s11048_s3 = inlined_call_operand.vmem [shape: bf16[128,128], index: 3, kind: input, shape index: {}]   ;;  %s11049_s4 = inlined_call_operand.vmem [shape: f32[1,128], index: 4, kind: input, shape index: {}]   ;;  %s11050_s5 = inlined_call_operand.vmem [shape: f32[16,128], index: 5, kind: output, shape index: {}]  }
   0x1   :  { %v8168_v0 = vld [vmem:[%s11045_s1 + $0x78] sm:$0xff]   ;;  %v8172_v4 = vld [vmem:[%s11045_s1 + $0x70] sm:$0xff]   ;;  %v8176_v8 = vld [vmem:[%s11045_s1 + $0x68] sm:$0xff]  }
   0x2   :  { %v8169_v1 = vld [vmem:[%s11045_s1 + $0xf8] sm:$0xff]   ;;  %7345 = vmatprep.subr.bf16.mxu0 %v8168_v0  ;;  %v8173_v5 = vld [vmem:[%s11045_s1 + $0xf0] sm:$0xff]   ;;  %v8177_v9 = vld [vmem:[%s11045_s1 + $0xe8] sm:$0xff]  }
   0x3   :  { %v8170_v2 = vld [vmem:[%s11045_s1 + $0x38] sm:$0xff]   ;;  %7367 = vmatprep.subr.bf16.mxu1 %v8169_v1  ;;  %v8174_v6 = vld [vmem:[%s11045_s1 + $0x30] sm:$0xff]   ;;  %v8178_v10 = vld [vmem:[%s11045_s1 + $0x28] sm:$0xff]  }
   0x4   :  { %v8171_v3 = vld [vmem:[%s11045_s1 + $0xb8] sm:$0xff]   ;;  %7346 = vmatpush3.bf16.msra.mxu0 %v8170_v2  ;;  %v8175_v7 = vld [vmem:[%s11045_s1 + $0xb0] sm:$0xff]   ;;  %v8179_v11 = vld [vmem:[%s11045_s1 + $0xa8] sm:$0xff]  }
   0x5   :  { %7368 = vmatpush3.bf16.msra.mxu1 %v8171_v3  ;;  %7347 = vmatprep.subr.bf16.mxu0 %v8172_v4  ;;  %v8180_v12 = vld [vmem:[%s11045_s1 + $0x60] sm:$0xff]   ;;  %v8184_v16 = vld [vmem:[%s11045_s1 + $0x58] sm:$0xff]   ;;  %v8188_v20 = vld [vmem:[%s11045_s1 + $0x50] sm:$0xff]  }
   0x6   :  { %7369 = vmatprep.subr.bf16.mxu1 %v8173_v5  ;;  %v8181_v13 = vld [vmem:[%s11045_s1 + $0xe0] sm:$0xff]   ;;  %v8185_v17 = vld [vmem:[%s11045_s1 + $0xd8] sm:$0xff]   ;;  %v8189_v21 = vld [vmem:[%s11045_s1 + $0xd0] sm:$0xff]  }
   0x7   :  { %v8182_v14 = vld [vmem:[%s11045_s1 + $0x20] sm:$0xff]   ;;  %v8186_v18 = vld [vmem:[%s11045_s1 + $0x18] sm:$0xff]   ;;  %v8190_v22 = vld [vmem:[%s11045_s1 + $0x10] sm:$0xff]  }
   0x8   :  { %7348 = vmatpush3.bf16.msra.mxu0 %v8174_v6  ;;  %v8183_v15 = vld [vmem:[%s11045_s1 + $0xa0] sm:$0xff]   ;;  %v8187_v19 = vld [vmem:[%s11045_s1 + $0x98] sm:$0xff]   ;;  %v8191_v23 = vld [vmem:[%s11045_s1 + $0x90] sm:$0xff]  }
   0x9   :  { %7370 = vmatpush3.bf16.msra.mxu1 %v8175_v7  ;;  %7349 = vmatprep.subr.bf16.mxu0 %v8176_v8  ;;  %v8192_v24 = vld [vmem:[%s11045_s1 + $0x48] sm:$0xff]   ;;  %v8196_v28 = vld [vmem:[%s11045_s1 + $0x40] sm:$0xff]   ;;  %v8200_v40 = vld [vmem:[%s11045_s1 + $0x178] sm:$0xff]  }
   0xa   :  { %7371 = vmatprep.subr.bf16.mxu1 %v8177_v9  ;;  %v8193_v25 = vld [vmem:[%s11045_s1 + $0xc8] sm:$0xff]   ;;  %v8197_v29 = vld [vmem:[%s11045_s1 + $0xc0] sm:$0xff]   ;;  %v8201_v41 = vld [vmem:[%s11045_s1 + $0x1f8] sm:$0xff]  }
   0xb   :  { %v8194_v26 = vld [vmem:[%s11045_s1 + $0x8] sm:$0xff]   ;;  %v8198_v30 = vld [vmem:[%s11045_s1] sm:$0xff]   ;;  %v8202_v42 = vld [vmem:[%s11045_s1 + $0x138] sm:$0xff]  }
   0xc   :  { %7350 = vmatpush3.bf16.msra.mxu0 %v8178_v10  ;;  %v8195_v27 = vld [vmem:[%s11045_s1 + $0x88] sm:$0xff]   ;;  %v8199_v31 = vld [vmem:[%s11045_s1 + $0x80] sm:$0xff]   ;;  %v8203_v43 = vld [vmem:[%s11045_s1 + $0x1b8] sm:$0xff]  }
   0xd   :  { %7372 = vmatpush3.bf16.msra.mxu1 %v8179_v11  ;;  %7351 = vmatprep.subr.bf16.mxu0 %v8180_v12  ;;  %v21_v32 = vld [vmem:[%s11046_s0] sm:$0xff]  ;;  %v22_v34 = vld [vmem:[%s11046_s0 + $0x8] sm:$0xff]  ;;  %v8204_v44 = vld [vmem:[%s11045_s1 + $0x170] sm:$0xff]  }
   0xe   :  { %7373 = vmatprep.subr.bf16.mxu1 %v8181_v13  ;;  %v57_v33 = vld [vmem:[%s11046_s0 + $0x120] sm:$0xff]  ;;  %v58_v37 = vld [vmem:[%s11046_s0 + $0x128] sm:$0xff]  ;;  %v8205_v45 = vld [vmem:[%s11045_s1 + $0x1f0] sm:$0xff]  }
   0xf   :  { %v6688_v35 = vcombine.low %v21_v32, %v57_v33  ;;  %v6689_v36 = vcombine.high %v21_v32, %v57_v33  ;;  %v6690_v38 = vcombine.low %v22_v34, %v58_v37  ;;  %v6691_v39 = vcombine.high %v22_v34, %v58_v37  ;;  %v8206_v46 = vld [vmem:[%s11045_s1 + $0x130] sm:$0xff]   ;;  %v8208_v48 = vld [vmem:[%s11045_s1 + $0x168] sm:$0xff]   ;;  %v8212_v52 = vld [vmem:[%s11045_s1 + $0x160] sm:$0xff]  }
  0x10   :  { %7352 = vmatpush3.bf16.msra.mxu0 %v8182_v14  ;;  %v8207_v47 = vld [vmem:[%s11045_s1 + $0x1b0] sm:$0xff]   ;;  %v8209_v49 = vld [vmem:[%s11045_s1 + $0x1e8] sm:$0xff]   ;;  %v8213_v53 = vld [vmem:[%s11045_s1 + $0x1e0] sm:$0xff]  }
  0x11   :  { %7374 = vmatpush3.bf16.msra.mxu1 %v8183_v15  ;;  %7353 = vmatprep.subr.bf16.mxu0 %v8184_v16  ;;  %v8210_v50 = vld [vmem:[%s11045_s1 + $0x128] sm:$0xff]   ;;  %v8214_v54 = vld [vmem:[%s11045_s1 + $0x120] sm:$0xff]   ;;  %v8216_v56 = vld [vmem:[%s11045_s1 + $0x158] sm:$0xff]  }
  0x12   :  { %7375 = vmatprep.subr.bf16.mxu1 %v8185_v17  ;;  %5100 = vmatprep.mubr.bf16.mxu0 %v6689_v36  ;;  %v8211_v51 = vld [vmem:[%s11045_s1 + $0x1a8] sm:$0xff]   ;;  %v8215_v55 = vld [vmem:[%s11045_s1 + $0x1a0] sm:$0xff]   ;;  %v8217_v57 = vld [vmem:[%s11045_s1 + $0x1d8] sm:$0xff]  }
  0x13   :  { %5141 = vmatprep.mubr.bf16.mxu1 %v6691_v39  ;;  %v8218_v58 = vld [vmem:[%s11045_s1 + $0x118] sm:$0xff]   ;;  %v8220_v60 = vld [vmem:[%s11045_s1 + $0x150] sm:$0xff]   ;;  %v8224_v0 = vld [vmem:[%s11045_s1 + $0x148] sm:$0xff]  }
  0x14   :  { %7354 = vmatpush3.bf16.msra.mxu0 %v8186_v18  ;;  %v8219_v59 = vld [vmem:[%s11045_s1 + $0x198] sm:$0xff]   ;;  %v8221_v61 = vld [vmem:[%s11045_s1 + $0x1d0] sm:$0xff]   ;;  %v8225_v1 = vld [vmem:[%s11045_s1 + $0x1c8] sm:$0xff]  }
  0x15   :  { %7376 = vmatpush3.bf16.msra.mxu1 %v8187_v19  ;;  %7355 = vmatprep.subr.bf16.mxu0 %v8188_v20  ;;  %v8222_v62 = vld [vmem:[%s11045_s1 + $0x110] sm:$0xff]   ;;  %v8226_v2 = vld [vmem:[%s11045_s1 + $0x108] sm:$0xff]   ;;  %v8228_v4 = vld [vmem:[%s11045_s1 + $0x140] sm:$0xff]  }
  0x16   :  { %7377 = vmatprep.subr.bf16.mxu1 %v8189_v21  ;;  %v8223_v63 = vld [vmem:[%s11045_s1 + $0x190] sm:$0xff]   ;;  %v8227_v3 = vld [vmem:[%s11045_s1 + $0x188] sm:$0xff]   ;;  %v8229_v5 = vld [vmem:[%s11045_s1 + $0x1c0] sm:$0xff]  }
  0x17   :  { %v8230_v6 = vld [vmem:[%s11045_s1 + $0x100] sm:$0xff]   ;;  %v23_v8 = vld [vmem:[%s11046_s0 + $0x10] sm:$0xff]  ;;  %v24_v12 = vld [vmem:[%s11046_s0 + $0x18] sm:$0xff] }
  0x18   :  { %7356 = vmatpush3.bf16.msra.mxu0 %v8190_v22  ;;  %v8231_v7 = vld [vmem:[%s11045_s1 + $0x180] sm:$0xff]   ;;  %v59_v9 = vld [vmem:[%s11046_s0 + $0x130] sm:$0xff]  ;;  %v60_v13 = vld [vmem:[%s11046_s0 + $0x138] sm:$0xff] }
  0x19   :  { %7378 = vmatpush3.bf16.msra.mxu1 %v8191_v23  ;;  %7357 = vmatprep.subr.bf16.mxu0 %v8192_v24  ;;  %v6692_v10 = vcombine.low %v23_v8, %v59_v9  ;;  %v6693_v11 = vcombine.high %v23_v8, %v59_v9  ;;  %v6694_v14 = vcombine.low %v24_v12, %v60_v13  ;;  %v8232_v16 = vld [vmem:[%s11045_s1 + $0x278] sm:$0xff]   ;;  %v8236_v20 = vld [vmem:[%s11045_s1 + $0x270] sm:$0xff]   ;;  %v8240_v24 = vld [vmem:[%s11045_s1 + $0x268] sm:$0xff]  }
  0x1a   :  { %7379 = vmatprep.subr.bf16.mxu1 %v8193_v25  ;;  %v6695_v15 = vcombine.high %v24_v12, %v60_v13  ;;  %v8233_v17 = vld [vmem:[%s11045_s1 + $0x2f8] sm:$0xff]   ;;  %v8237_v21 = vld [vmem:[%s11045_s1 + $0x2f0] sm:$0xff]   ;;  %v8241_v25 = vld [vmem:[%s11045_s1 + $0x2e8] sm:$0xff]  }
  0x1b   :  { %v8234_v18 = vld [vmem:[%s11045_s1 + $0x238] sm:$0xff]   ;;  %v8238_v22 = vld [vmem:[%s11045_s1 + $0x230] sm:$0xff]  }
  0x1c   :  { %7358 = vmatpush3.bf16.msra.mxu0 %v8194_v26  ;;  %v8235_v19 = vld [vmem:[%s11045_s1 + $0x2b8] sm:$0xff]   ;;  %v8239_v23 = vld [vmem:[%s11045_s1 + $0x2b0] sm:$0xff]   ;;  %v8242_v26 = vld [vmem:[%s11045_s1 + $0x228] sm:$0xff]  }
  0x1d   :  { %7380 = vmatpush3.bf16.msra.mxu1 %v8195_v27  ;;  %7359 = vmatprep.subr.bf16.mxu0 %v8196_v28  ;;  %v8243_v27 = vld [vmem:[%s11045_s1 + $0x2a8] sm:$0xff]   ;;  %v8244_v28 = vld [vmem:[%s11045_s1 + $0x260] sm:$0xff]   ;;  %v8248_v32 = vld [vmem:[%s11045_s1 + $0x258] sm:$0xff]  }
  0x1e   :  { %7381 = vmatprep.subr.bf16.mxu1 %v8197_v29  ;;  %v8245_v29 = vld [vmem:[%s11045_s1 + $0x2e0] sm:$0xff]   ;;  %v8249_v33 = vld [vmem:[%s11045_s1 + $0x2d8] sm:$0xff]   ;;  %v8252_v36 = vld [vmem:[%s11045_s1 + $0x250] sm:$0xff]  }
  0x1f   :  { %v8250_v34 = vld [vmem:[%s11045_s1 + $0x218] sm:$0xff]   ;;  %v8253_v37 = vld [vmem:[%s11045_s1 + $0x2d0] sm:$0xff]  }
  0x20   :  { %7360 = vmatpush3.bf16.msra.mxu0 %v8198_v30  ;;  %v8246_v30 = vld [vmem:[%s11045_s1 + $0x220] sm:$0xff]   ;;  %v8255_v39 = vld [vmem:[%s11045_s1 + $0x290] sm:$0xff]   ;;  %v8280_v8 = vld [vmem:[%s11045_s1 + $0x358] sm:$0xff]  }
  0x21   :  { %7382 = vmatpush3.bf16.msra.mxu1 %v8199_v31  ;;  %7389 = vmatprep.subr.bf16.mxu0 %v8200_v40  ;;  %v8247_v31 = vld [vmem:[%s11045_s1 + $0x2a0] sm:$0xff]   ;;  %v8256_v40 = vld [vmem:[%s11045_s1 + $0x248] sm:$0xff]   ;;  %v8281_v9 = vld [vmem:[%s11045_s1 + $0x3d8] sm:$0xff]  }
  0x22   :  { %7411 = vmatprep.subr.bf16.mxu1 %v8201_v41  ;;  %v8257_v41 = vld [vmem:[%s11045_s1 + $0x2c8] sm:$0xff]   ;;  %v8284_v12 = vld [vmem:[%s11045_s1 + $0x350] sm:$0xff]  }
  0x23   :  { %5101 = vmatmul.mubr.bf16.vlgmr.msra.gmra.mxu0 %v6688_v35  ;;  %v8251_v35 = vld [vmem:[%s11045_s1 + $0x298] sm:$0xff]   ;;  %v8285_v13 = vld [vmem:[%s11045_s1 + $0x3d0] sm:$0xff]  }
  0x24   :  { %5142 = vmatmul.mubr.bf16.vlgmr.msra.gmra.mxu1 %v6690_v38  ;;  %7390 = vmatpush3.bf16.msra.mxu0 %v8202_v42  ;;  %v8254_v38 = vld [vmem:[%s11045_s1 + $0x210] sm:$0xff]   ;;  %v8258_v42 = vld [vmem:[%s11045_s1 + $0x208] sm:$0xff]  }
  0x25   :  { %7412 = vmatpush3.bf16.msra.mxu1 %v8203_v43  ;;  %7391 = vmatprep.subr.bf16.mxu0 %v8204_v44  ;;  %v8259_v43 = vld [vmem:[%s11045_s1 + $0x288] sm:$0xff]   ;;  %v8260_v44 = vld [vmem:[%s11045_s1 + $0x240] sm:$0xff]  }
  0x26   :  { %7413 = vmatprep.subr.bf16.mxu1 %v8205_v45  ;;  %5182 = vmatprep.mubr.bf16.mxu0 %v6693_v11  ;;  %v8261_v45 = vld [vmem:[%s11045_s1 + $0x2c0] sm:$0xff]   ;;  %v8283_v11 = vld [vmem:[%s11045_s1 + $0x398] sm:$0xff]  }
  0x27   :  { %5223 = vmatprep.mubr.bf16.mxu1 %v6695_v15  ;;  %v8287_v15 = vld [vmem:[%s11045_s1 + $0x390] sm:$0xff]  }
  0x28   :  { %7392 = vmatpush3.bf16.msra.mxu0 %v8206_v46  ;;  %v8262_v46 = vld [vmem:[%s11045_s1 + $0x200] sm:$0xff]  }
  0x29   :  { %7414 = vmatpush3.bf16.msra.mxu1 %v8207_v47  ;;  %7393 = vmatprep.subr.bf16.mxu0 %v8208_v48  ;;  %v8263_v47 = vld [vmem:[%s11045_s1 + $0x280] sm:$0xff]  }
  0x2a   :  { %7415 = vmatprep.subr.bf16.mxu1 %v8209_v49  ;;  %v25_v48 = vld [vmem:[%s11046_s0 + $0x20] sm:$0xff] }
  0x2b   :  { %v61_v49 = vld [vmem:[%s11046_s0 + $0x140] sm:$0xff] }
  0x2c   :  { %7394 = vmatpush3.bf16.msra.mxu0 %v8210_v50  ;;  %v26_v50 = vld [vmem:[%s11046_s0 + $0x28] sm:$0xff] }
  0x2d   :  { %7416 = vmatpush3.bf16.msra.mxu1 %v8211_v51  ;;  %7395 = vmatprep.subr.bf16.mxu0 %v8212_v52  ;;  %v62_v51 = vld [vmem:[%s11046_s0 + $0x148] sm:$0xff]  ;;  %v6696_v52 = vcombine.low %v25_v48, %v61_v49 }
  0x2e   :  { %7417 = vmatprep.subr.bf16.mxu1 %v8213_v53  ;;  %v6697_v53 = vcombine.high %v25_v48, %v61_v49  ;;  %v8312_v48 = vld [vmem:[%s11045_s1 + $0x458] sm:$0xff]  }
  0x2f   :  { %v8313_v49 = vld [vmem:[%s11045_s1 + $0x4d8] sm:$0xff]  }
  0x30   :  { %7396 = vmatpush3.bf16.msra.mxu0 %v8214_v54  ;;  %v6698_v54 = vcombine.low %v26_v50, %v62_v51 }
  0x31   :  { %7418 = vmatpush3.bf16.msra.mxu1 %v8215_v55  ;;  %7397 = vmatprep.subr.bf16.mxu0 %v8216_v56  ;;  %v6699_v55 = vcombine.high %v26_v50, %v62_v51  ;;  %v8264_v56 = vld [vmem:[%s11045_s1 + $0x378] sm:$0xff]  }
  0x32   :  { %7419 = vmatprep.subr.bf16.mxu1 %v8217_v57  ;;  %v8265_v57 = vld [vmem:[%s11045_s1 + $0x3f8] sm:$0xff]  }
  0x33   :  { %v8314_v50 = vld [vmem:[%s11045_s1 + $0x418] sm:$0xff]  }
  0x34   :  { %7398 = vmatpush3.bf16.msra.mxu0 %v8218_v58  ;;  %v8266_v58 = vld [vmem:[%s11045_s1 + $0x338] sm:$0xff]  }
  0x35   :  { %7420 = vmatpush3.bf16.msra.mxu1 %v8219_v59  ;;  %7399 = vmatprep.subr.bf16.mxu0 %v8220_v60  ;;  %v8267_v59 = vld [vmem:[%s11045_s1 + $0x3b8] sm:$0xff]   ;;  %v8268_v60 = vld [vmem:[%s11045_s1 + $0x370] sm:$0xff]  }
  0x36   :  { %7421 = vmatprep.subr.bf16.mxu1 %v8221_v61  ;;  %v8269_v61 = vld [vmem:[%s11045_s1 + $0x3f0] sm:$0xff]   ;;  %v8315_v51 = vld [vmem:[%s11045_s1 + $0x498] sm:$0xff]  }
  0x38   :  { %7400 = vmatpush3.bf16.msra.mxu0 %v8222_v62  ;;  %v8270_v62 = vld [vmem:[%s11045_s1 + $0x330] sm:$0xff]  }
  0x39   :  { %7422 = vmatpush3.bf16.msra.mxu1 %v8223_v63  ;;  %7401 = vmatprep.subr.bf16.mxu0 %v8224_v0  ;;  %v8271_v63 = vld [vmem:[%s11045_s1 + $0x3b0] sm:$0xff]   ;;  %v8272_v0 = vld [vmem:[%s11045_s1 + $0x368] sm:$0xff]  }
  0x3a   :  { %7423 = vmatprep.subr.bf16.mxu1 %v8225_v1  ;;  %v8273_v1 = vld [vmem:[%s11045_s1 + $0x3e8] sm:$0xff]  }
  0x3c   :  { %7402 = vmatpush3.bf16.msra.mxu0 %v8226_v2  ;;  %v8274_v2 = vld [vmem:[%s11045_s1 + $0x328] sm:$0xff]  }
  0x3d   :  { %7424 = vmatpush3.bf16.msra.mxu1 %v8227_v3  ;;  %7403 = vmatprep.subr.bf16.mxu0 %v8228_v4  ;;  %v8275_v3 = vld [vmem:[%s11045_s1 + $0x3a8] sm:$0xff]   ;;  %v8276_v4 = vld [vmem:[%s11045_s1 + $0x360] sm:$0xff]  }
  0x3e   :  { %7425 = vmatprep.subr.bf16.mxu1 %v8229_v5  ;;  %v8277_v5 = vld [vmem:[%s11045_s1 + $0x3e0] sm:$0xff]  }
  0x40   :  { %7404 = vmatpush3.bf16.msra.mxu0 %v8230_v6  ;;  %v8278_v6 = vld [vmem:[%s11045_s1 + $0x320] sm:$0xff]  }
  0x41   :  { %7426 = vmatpush3.bf16.msra.mxu1 %v8231_v7  ;;  %7433 = vmatprep.subr.bf16.mxu0 %v8232_v16  ;;  %v8279_v7 = vld [vmem:[%s11045_s1 + $0x3a0] sm:$0xff]   ;;  %v8288_v16 = vld [vmem:[%s11045_s1 + $0x348] sm:$0xff]  }
  0x42   :  { %7455 = vmatprep.subr.bf16.mxu1 %v8233_v17  ;;  %v8289_v17 = vld [vmem:[%s11045_s1 + $0x3c8] sm:$0xff]  }
  0x43   :  { %5183 = vmatmul.mubr.bf16.vlgmr.msra.gmra.mxu0 %v6692_v10  ;;  %v8282_v10 = vld [vmem:[%s11045_s1 + $0x318] sm:$0xff]  }
  0x44   :  { %5224 = vmatmul.mubr.bf16.vlgmr.msra.gmra.mxu1 %v6694_v14  ;;  %7434 = vmatpush3.bf16.msra.mxu0 %v8234_v18  ;;  %v8286_v14 = vld [vmem:[%s11045_s1 + $0x310] sm:$0xff]   ;;  %v8290_v18 = vld [vmem:[%s11045_s1 + $0x308] sm:$0xff]  }
  0x45   :  { %7456 = vmatpush3.bf16.msra.mxu1 %v8235_v19  ;;  %7435 = vmatprep.subr.bf16.mxu0 %v8236_v20  ;;  %v8291_v19 = vld [vmem:[%s11045_s1 + $0x388] sm:$0xff]   ;;  %v8292_v20 = vld [vmem:[%s11045_s1 + $0x340] sm:$0xff]  }
  0x46   :  { %7457 = vmatprep.subr.bf16.mxu1 %v8237_v21  ;;  %5264 = vmatprep.mubr.bf16.mxu0 %v6697_v53  ;;  %v8293_v21 = vld [vmem:[%s11045_s1 + $0x3c0] sm:$0xff]   ;;  %v8317_v53 = vld [vmem:[%s11045_s1 + $0x4d0] sm:$0xff]  }
  0x47   :  { %5305 = vmatprep.mubr.bf16.mxu1 %v6699_v55  ;;  %v8319_v55 = vld [vmem:[%s11045_s1 + $0x490] sm:$0xff]  }
  0x48   :  { %7436 = vmatpush3.bf16.msra.mxu0 %v8238_v22  ;;  %v8294_v22 = vld [vmem:[%s11045_s1 + $0x300] sm:$0xff]  }
  0x49   :  { %7458 = vmatpush3.bf16.msra.mxu1 %v8239_v23  ;;  %7437 = vmatprep.subr.bf16.mxu0 %v8240_v24  ;;  %v8295_v23 = vld [vmem:[%s11045_s1 + $0x380] sm:$0xff]   ;;  %v27_v24 = vld [vmem:[%s11046_s0 + $0x30] sm:$0xff] }
  0x4a   :  { %7459 = vmatprep.subr.bf16.mxu1 %v8241_v25  ;;  %v63_v25 = vld [vmem:[%s11046_s0 + $0x150] sm:$0xff] }
  0x4c   :  { %7438 = vmatpush3.bf16.msra.mxu0 %v8242_v26  ;;  %v28_v26 = vld [vmem:[%s11046_s0 + $0x38] sm:$0xff] }
  0x4d   :  { %7460 = vmatpush3.bf16.msra.mxu1 %v8243_v27  ;;  %7439 = vmatprep.subr.bf16.mxu0 %v8244_v28  ;;  %v6700_v27 = vcombine.low %v27_v24, %v63_v25  ;;  %v6701_v28 = vcombine.high %v27_v24, %v63_v25  ;;  %v8344_v24 = vld [vmem:[%s11045_s1 + $0x558] sm:$0xff]  }
  0x4e   :  { %7461 = vmatprep.subr.bf16.mxu1 %v8245_v29  ;;  %v64_v29 = vld [vmem:[%s11046_s0 + $0x158] sm:$0xff] }
  0x4f   :  { %v8345_v25 = vld [vmem:[%s11045_s1 + $0x5d8] sm:$0xff]  }
  0x50   :  { %7440 = vmatpush3.bf16.msra.mxu0 %v8246_v30  ;;  %v6702_v30 = vcombine.low %v28_v26, %v64_v29 }
  0x51   :  { %7462 = vmatpush3.bf16.msra.mxu1 %v8247_v31  ;;  %7441 = vmatprep.subr.bf16.mxu0 %v8248_v32  ;;  %v6703_v31 = vcombine.high %v28_v26, %v64_v29  ;;  %v8296_v32 = vld [vmem:[%s11045_s1 + $0x478] sm:$0xff]   ;;  %v8349_v29 = vld [vmem:[%s11045_s1 + $0x5d0] sm:$0xff]  }
  0x52   :  { %7463 = vmatprep.subr.bf16.mxu1 %v8249_v33  ;;  %v8297_v33 = vld [vmem:[%s11045_s1 + $0x4f8] sm:$0xff]  }
  0x53   :  { %v8346_v26 = vld [vmem:[%s11045_s1 + $0x518] sm:$0xff]  }
  0x54   :  { %7442 = vmatpush3.bf16.msra.mxu0 %v8250_v34  ;;  %v8298_v34 = vld [vmem:[%s11045_s1 + $0x438] sm:$0xff]  }
  0x55   :  { %7464 = vmatpush3.bf16.msra.mxu1 %v8251_v35  ;;  %7443 = vmatprep.subr.bf16.mxu0 %v8252_v36  ;;  %v8299_v35 = vld [vmem:[%s11045_s1 + $0x4b8] sm:$0xff]   ;;  %v8300_v36 = vld [vmem:[%s11045_s1 + $0x470] sm:$0xff]  }
  0x56   :  { %7465 = vmatprep.subr.bf16.mxu1 %v8253_v37  ;;  %v8301_v37 = vld [vmem:[%s11045_s1 + $0x4f0] sm:$0xff]  }
  0x58   :  { %7444 = vmatpush3.bf16.msra.mxu0 %v8254_v38  ;;  %v8302_v38 = vld [vmem:[%s11045_s1 + $0x430] sm:$0xff]  }
  0x59   :  { %7466 = vmatpush3.bf16.msra.mxu1 %v8255_v39  ;;  %7445 = vmatprep.subr.bf16.mxu0 %v8256_v40  ;;  %v8303_v39 = vld [vmem:[%s11045_s1 + $0x4b0] sm:$0xff]   ;;  %v8304_v40 = vld [vmem:[%s11045_s1 + $0x468] sm:$0xff]  }
  0x5a   :  { %7467 = vmatprep.subr.bf16.mxu1 %v8257_v41  ;;  %v8305_v41 = vld [vmem:[%s11045_s1 + $0x4e8] sm:$0xff]  }
  0x5c   :  { %7446 = vmatpush3.bf16.msra.mxu0 %v8258_v42  ;;  %v8306_v42 = vld [vmem:[%s11045_s1 + $0x428] sm:$0xff]  }
  0x5d   :  { %7468 = vmatpush3.bf16.msra.mxu1 %v8259_v43  ;;  %7447 = vmatprep.subr.bf16.mxu0 %v8260_v44  ;;  %v8307_v43 = vld [vmem:[%s11045_s1 + $0x4a8] sm:$0xff]   ;;  %v8308_v44 = vld [vmem:[%s11045_s1 + $0x460] sm:$0xff]  }
  0x5e   :  { %7469 = vmatprep.subr.bf16.mxu1 %v8261_v45  ;;  %v8309_v45 = vld [vmem:[%s11045_s1 + $0x4e0] sm:$0xff]  }
  0x60   :  { %7448 = vmatpush3.bf16.msra.mxu0 %v8262_v46  ;;  %v8310_v46 = vld [vmem:[%s11045_s1 + $0x420] sm:$0xff]  }
  0x61   :  { %7470 = vmatpush3.bf16.msra.mxu1 %v8263_v47  ;;  %7477 = vmatprep.subr.bf16.mxu0 %v8264_v56  ;;  %v8311_v47 = vld [vmem:[%s11045_s1 + $0x4a0] sm:$0xff]   ;;  %v8320_v56 = vld [vmem:[%s11045_s1 + $0x448] sm:$0xff]  }
  0x62   :  { %7499 = vmatprep.subr.bf16.mxu1 %v8265_v57  ;;  %v8321_v57 = vld [vmem:[%s11045_s1 + $0x4c8] sm:$0xff]  }
  0x63   :  { %5265 = vmatmul.mubr.bf16.vlgmr.msra.gmra.mxu0 %v6696_v52  ;;  %v8316_v52 = vld [vmem:[%s11045_s1 + $0x450] sm:$0xff]  }
  0x64   :  { %5306 = vmatmul.mubr.bf16.vlgmr.msra.gmra.mxu1 %v6698_v54  ;;  %7478 = vmatpush3.bf16.msra.mxu0 %v8266_v58  ;;  %v8318_v54 = vld [vmem:[%s11045_s1 + $0x410] sm:$0xff]   ;;  %v8322_v58 = vld [vmem:[%s11045_s1 + $0x408] sm:$0xff]  }
  0x65   :  { %7500 = vmatpush3.bf16.msra.mxu1 %v8267_v59  ;;  %7479 = vmatprep.subr.bf16.mxu0 %v8268_v60  ;;  %v8323_v59 = vld [vmem:[%s11045_s1 + $0x488] sm:$0xff]   ;;  %v8324_v60 = vld [vmem:[%s11045_s1 + $0x440] sm:$0xff]  }
  0x66   :  { %7501 = vmatprep.subr.bf16.mxu1 %v8269_v61  ;;  %5346 = vmatprep.mubr.bf16.mxu0 %v6701_v28  ;;  %v8325_v61 = vld [vmem:[%s11045_s1 + $0x4c0] sm:$0xff]   ;;  %v8348_v28 = vld [vmem:[%s11045_s1 + $0x550] sm:$0xff]  }
  0x67   :  { %5387 = vmatprep.mubr.bf16.mxu1 %v6703_v31  ;;  %v8351_v31 = vld [vmem:[%s11045_s1 + $0x590] sm:$0xff]  }
  0x68   :  { %7480 = vmatpush3.bf16.msra.mxu0 %v8270_v62  ;;  %v8326_v62 = vld [vmem:[%s11045_s1 + $0x400] sm:$0xff]  }
  0x69   :  { %7502 = vmatpush3.bf16.msra.mxu1 %v8271_v63  ;;  %7481 = vmatprep.subr.bf16.mxu0 %v8272_v0  ;;  %v8327_v63 = vld [vmem:[%s11045_s1 + $0x480] sm:$0xff]  }
  0x6a   :  { %7503 = vmatprep.subr.bf16.mxu1 %v8273_v1  ;;  %v29_v0 = vld [vmem:[%s11046_s0 + $0x40] sm:$0xff] }
  0x6b   :  { %v65_v1 = vld [vmem:[%s11046_s0 + $0x160] sm:$0xff] }
  0x6c   :  { %7482 = vmatpush3.bf16.msra.mxu0 %v8274_v2  ;;  %v6704_v2 = vcombine.low %v29_v0, %v65_v1 }
  0x6d   :  { %7504 = vmatpush3.bf16.msra.mxu1 %v8275_v3  ;;  %7483 = vmatprep.subr.bf16.mxu0 %v8276_v4  ;;  %v6705_v3 = vcombine.high %v29_v0, %v65_v1  ;;  %v30_v4 = vld [vmem:[%s11046_s0 + $0x48] sm:$0xff]  ;;  %v8376_v0 = vld [vmem:[%s11045_s1 + $0x658] sm:$0xff]  }
  0x6e   :  { %7505 = vmatprep.subr.bf16.mxu1 %v8277_v5  ;;  %v66_v5 = vld [vmem:[%s11046_s0 + $0x168] sm:$0xff]  ;;  %v8377_v1 = vld [vmem:[%s11045_s1 + $0x6d8] sm:$0xff]  }
  0x70   :  { %7484 = vmatpush3.bf16.msra.mxu0 %v8278_v6  ;;  %v6706_v6 = vcombine.low %v30_v4, %v66_v5 }
  0x71   :  { %7506 = vmatpush3.bf16.msra.mxu1 %v8279_v7  ;;  %7485 = vmatprep.subr.bf16.mxu0 %v8280_v8  ;;  %v6707_v7 = vcombine.high %v30_v4, %v66_v5  ;;  %v8328_v8 = vld [vmem:[%s11045_s1 + $0x578] sm:$0xff]   ;;  %v8380_v4 = vld [vmem:[%s11045_s1 + $0x650] sm:$0xff]  }
  0x72   :  { %7507 = vmatprep.subr.bf16.mxu1 %v8281_v9  ;;  %v8329_v9 = vld [vmem:[%s11045_s1 + $0x5f8] sm:$0xff]   ;;  %v8381_v5 = vld [vmem:[%s11045_s1 + $0x6d0] sm:$0xff]  }
  0x74   :  { %7486 = vmatpush3.bf16.msra.mxu0 %v8282_v10  ;;  %v8330_v10 = vld [vmem:[%s11045_s1 + $0x538] sm:$0xff]  }
  0x75   :  { %7508 = vmatpush3.bf16.msra.mxu1 %v8283_v11  ;;  %7487 = vmatprep.subr.bf16.mxu0 %v8284_v12  ;;  %v8331_v11 = vld [vmem:[%s11045_s1 + $0x5b8] sm:$0xff]   ;;  %v8332_v12 = vld [vmem:[%s11045_s1 + $0x570] sm:$0xff]  }
  0x76   :  { %7509 = vmatprep.subr.bf16.mxu1 %v8285_v13  ;;  %v8333_v13 = vld [vmem:[%s11045_s1 + $0x5f0] sm:$0xff]  }
  0x78   :  { %7488 = vmatpush3.bf16.msra.mxu0 %v8286_v14  ;;  %v8334_v14 = vld [vmem:[%s11045_s1 + $0x530] sm:$0xff]  }
  0x79   :  { %7510 = vmatpush3.bf16.msra.mxu1 %v8287_v15  ;;  %7489 = vmatprep.subr.bf16.mxu0 %v8288_v16  ;;  %v8335_v15 = vld [vmem:[%s11045_s1 + $0x5b0] sm:$0xff]   ;;  %v8336_v16 = vld [vmem:[%s11045_s1 + $0x568] sm:$0xff]  }
  0x7a   :  { %7511 = vmatprep.subr.bf16.mxu1 %v8289_v17  ;;  %v8337_v17 = vld [vmem:[%s11045_s1 + $0x5e8] sm:$0xff]  }
  0x7c   :  { %7490 = vmatpush3.bf16.msra.mxu0 %v8290_v18  ;;  %v8338_v18 = vld [vmem:[%s11045_s1 + $0x528] sm:$0xff]  }
  0x7d   :  { %7512 = vmatpush3.bf16.msra.mxu1 %v8291_v19  ;;  %7491 = vmatprep.subr.bf16.mxu0 %v8292_v20  ;;  %v8339_v19 = vld [vmem:[%s11045_s1 + $0x5a8] sm:$0xff]   ;;  %v8340_v20 = vld [vmem:[%s11045_s1 + $0x560] sm:$0xff]  }
  0x7e   :  { %7513 = vmatprep.subr.bf16.mxu1 %v8293_v21  ;;  %v8341_v21 = vld [vmem:[%s11045_s1 + $0x5e0] sm:$0xff]  }
  0x80   :  { %7492 = vmatpush3.bf16.msra.mxu0 %v8294_v22  ;;  %v8342_v22 = vld [vmem:[%s11045_s1 + $0x520] sm:$0xff]  }
  0x81   :  { %7514 = vmatpush3.bf16.msra.mxu1 %v8295_v23  ;;  %7521 = vmatprep.subr.bf16.mxu0 %v8296_v32  ;;  %v8343_v23 = vld [vmem:[%s11045_s1 + $0x5a0] sm:$0xff]   ;;  %v8352_v32 = vld [vmem:[%s11045_s1 + $0x548] sm:$0xff]  }
  0x82   :  { %7543 = vmatprep.subr.bf16.mxu1 %v8297_v33  ;;  %v8353_v33 = vld [vmem:[%s11045_s1 + $0x5c8] sm:$0xff]  }
  0x83   :  { %5347 = vmatmul.mubr.bf16.vlgmr.msra.gmra.mxu0 %v6700_v27  ;;  %v8347_v27 = vld [vmem:[%s11045_s1 + $0x598] sm:$0xff]  }
  0x84   :  { %5388 = vmatmul.mubr.bf16.vlgmr.msra.gmra.mxu1 %v6702_v30  ;;  %7522 = vmatpush3.bf16.msra.mxu0 %v8298_v34  ;;  %v8350_v30 = vld [vmem:[%s11045_s1 + $0x510] sm:$0xff]   ;;  %v8354_v34 = vld [vmem:[%s11045_s1 + $0x508] sm:$0xff]  }
  0x85   :  { %7544 = vmatpush3.bf16.msra.mxu1 %v8299_v35  ;;  %7523 = vmatprep.subr.bf16.mxu0 %v8300_v36  ;;  %v8355_v35 = vld [vmem:[%s11045_s1 + $0x588] sm:$0xff]   ;;  %v8356_v36 = vld [vmem:[%s11045_s1 + $0x540] sm:$0xff]  }
  0x86   :  { %7545 = vmatprep.subr.bf16.mxu1 %v8301_v37  ;;  %5428 = vmatprep.mubr.bf16.mxu0 %v6705_v3  ;;  %v8357_v37 = vld [vmem:[%s11045_s1 + $0x5c0] sm:$0xff]   ;;  %v8379_v3 = vld [vmem:[%s11045_s1 + $0x698] sm:$0xff]  }
  0x87   :  { %5469 = vmatprep.mubr.bf16.mxu1 %v6707_v7  ;;  %v8383_v7 = vld [vmem:[%s11045_s1 + $0x690] sm:$0xff]  }
  0x88   :  { %7524 = vmatpush3.bf16.msra.mxu0 %v8302_v38  ;;  %v8358_v38 = vld [vmem:[%s11045_s1 + $0x500] sm:$0xff]  }
  0x89   :  { %7546 = vmatpush3.bf16.msra.mxu1 %v8303_v39  ;;  %7525 = vmatprep.subr.bf16.mxu0 %v8304_v40  ;;  %v8359_v39 = vld [vmem:[%s11045_s1 + $0x580] sm:$0xff]   ;;  %v31_v40 = vld [vmem:[%s11046_s0 + $0x50] sm:$0xff] }
  0x8a   :  { %7547 = vmatprep.subr.bf16.mxu1 %v8305_v41  ;;  %v67_v41 = vld [vmem:[%s11046_s0 + $0x170] sm:$0xff] }
  0x8c   :  { %7526 = vmatpush3.bf16.msra.mxu0 %v8306_v42  ;;  %v32_v42 = vld [vmem:[%s11046_s0 + $0x58] sm:$0xff] }
  0x8d   :  { %7548 = vmatpush3.bf16.msra.mxu1 %v8307_v43  ;;  %7527 = vmatprep.subr.bf16.mxu0 %v8308_v44  ;;  %v68_v43 = vld [vmem:[%s11046_s0 + $0x178] sm:$0xff]  ;;  %v6708_v44 = vcombine.low %v31_v40, %v67_v41 }
  0x8e   :  { %7549 = vmatprep.subr.bf16.mxu1 %v8309_v45  ;;  %v6709_v45 = vcombine.high %v31_v40, %v67_v41  ;;  %v6687_v40 = vld [vmem:[%s11047_s2] ss:$0 sm:$0xff] }
  0x90   :  { %7528 = vmatpush3.bf16.msra.mxu0 %v8310_v46  ;;  %v6710_v46 = vcombine.low %v32_v42, %v68_v43 }
  0x91   :  { %7550 = vmatpush3.bf16.msra.mxu1 %v8311_v47  ;;  %7529 = vmatprep.subr.bf16.mxu0 %v8312_v48  ;;  %v6711_v47 = vcombine.high %v32_v42, %v68_v43  ;;  %v8360_v48 = vld [vmem:[%s11045_s1 + $0x678] sm:$0xff]   ;;  %v8396_v42 = vld [vmem:[%s11045_s1 + $0x770] sm:$0xff]  }
  0x92   :  { %7551 = vmatprep.subr.bf16.mxu1 %v8313_v49  ;;  %v8361_v49 = vld [vmem:[%s11045_s1 + $0x6f8] sm:$0xff]  }
  0x94   :  { %7530 = vmatpush3.bf16.msra.mxu0 %v8314_v50  ;;  %v8362_v50 = vld [vmem:[%s11045_s1 + $0x638] sm:$0xff]  }
  0x95   :  { %7552 = vmatpush3.bf16.msra.mxu1 %v8315_v51  ;;  %7531 = vmatprep.subr.bf16.mxu0 %v8316_v52  ;;  %v8363_v51 = vld [vmem:[%s11045_s1 + $0x6b8] sm:$0xff]   ;;  %v8364_v52 = vld [vmem:[%s11045_s1 + $0x670] sm:$0xff]  }
  0x96   :  { %7553 = vmatprep.subr.bf16.mxu1 %v8317_v53  ;;  %v8365_v53 = vld [vmem:[%s11045_s1 + $0x6f0] sm:$0xff]  }
  0x98   :  { %7532 = vmatpush3.bf16.msra.mxu0 %v8318_v54  ;;  %v8366_v54 = vld [vmem:[%s11045_s1 + $0x630] sm:$0xff]  }
  0x99   :  { %7554 = vmatpush3.bf16.msra.mxu1 %v8319_v55  ;;  %7533 = vmatprep.subr.bf16.mxu0 %v8320_v56  ;;  %v8367_v55 = vld [vmem:[%s11045_s1 + $0x6b0] sm:$0xff]   ;;  %v8368_v56 = vld [vmem:[%s11045_s1 + $0x668] sm:$0xff]  }
  0x9a   :  { %7555 = vmatprep.subr.bf16.mxu1 %v8321_v57  ;;  %v8369_v57 = vld [vmem:[%s11045_s1 + $0x6e8] sm:$0xff]  }
  0x9c   :  { %7534 = vmatpush3.bf16.msra.mxu0 %v8322_v58  ;;  %v8370_v58 = vld [vmem:[%s11045_s1 + $0x628] sm:$0xff]  }
  0x9d   :  { %7556 = vmatpush3.bf16.msra.mxu1 %v8323_v59  ;;  %7535 = vmatprep.subr.bf16.mxu0 %v8324_v60  ;;  %v8371_v59 = vld [vmem:[%s11045_s1 + $0x6a8] sm:$0xff]   ;;  %v8372_v60 = vld [vmem:[%s11045_s1 + $0x660] sm:$0xff]  }
  0x9e   :  { %7557 = vmatprep.subr.bf16.mxu1 %v8325_v61  ;;  %v8373_v61 = vld [vmem:[%s11045_s1 + $0x6e0] sm:$0xff]  }
  0xa0   :  { %7536 = vmatpush3.bf16.msra.mxu0 %v8326_v62  ;;  %v8374_v62 = vld [vmem:[%s11045_s1 + $0x620] sm:$0xff]  }
  0xa1   :  { %7558 = vmatpush3.bf16.msra.mxu1 %v8327_v63  ;;  %7565 = vmatprep.subr.bf16.mxu0 %v8328_v8  ;;  %v8375_v63 = vld [vmem:[%s11045_s1 + $0x6a0] sm:$0xff]   ;;  %v8384_v8 = vld [vmem:[%s11045_s1 + $0x648] sm:$0xff]  }
  0xa2   :  { %7587 = vmatprep.subr.bf16.mxu1 %v8329_v9  ;;  %v8385_v9 = vld [vmem:[%s11045_s1 + $0x6c8] sm:$0xff]  }
  0xa3   :  { %5429 = vmatmul.mubr.bf16.vlgmr.msra.gmra.mxu0 %v6704_v2  ;;  %v8378_v2 = vld [vmem:[%s11045_s1 + $0x618] sm:$0xff]  }
  0xa4   :  { %5470 = vmatmul.mubr.bf16.vlgmr.msra.gmra.mxu1 %v6706_v6  ;;  %7566 = vmatpush3.bf16.msra.mxu0 %v8330_v10  ;;  %v8382_v6 = vld [vmem:[%s11045_s1 + $0x610] sm:$0xff]   ;;  %v8386_v10 = vld [vmem:[%s11045_s1 + $0x608] sm:$0xff]  }
  0xa5   :  { %7588 = vmatpush3.bf16.msra.mxu1 %v8331_v11  ;;  %7567 = vmatprep.subr.bf16.mxu0 %v8332_v12  ;;  %v8387_v11 = vld [vmem:[%s11045_s1 + $0x688] sm:$0xff]   ;;  %v8388_v12 = vld [vmem:[%s11045_s1 + $0x640] sm:$0xff]  }
  0xa6   :  { %7589 = vmatprep.subr.bf16.mxu1 %v8333_v13  ;;  %5510 = vmatprep.mubr.bf16.mxu0 %v6709_v45 }
  0xa7   :  { %5551 = vmatprep.mubr.bf16.mxu1 %v6711_v47 }
  0xa8   :  { %7568 = vmatpush3.bf16.msra.mxu0 %v8334_v14  ;;  %v8389_v14 = vld [vmem:[%s11045_s1 + $0x6c0] sm:$0xff]  }
  0xa9   :  { %7590 = vmatpush3.bf16.msra.mxu1 %v8335_v15  ;;  %7569 = vmatprep.subr.bf16.mxu0 %v8336_v16  ;;  %v8390_v16 = vld [vmem:[%s11045_s1 + $0x600] sm:$0xff]  }
  0xaa   :  { %7591 = vmatprep.subr.bf16.mxu1 %v8337_v17 }
  0xac   :  { %7570 = vmatpush3.bf16.msra.mxu0 %v8338_v18  ;;  %v8391_v18 = vld [vmem:[%s11045_s1 + $0x680] sm:$0xff]  }
  0xad   :  { %7592 = vmatpush3.bf16.msra.mxu1 %v8339_v19  ;;  %7571 = vmatprep.subr.bf16.mxu0 %v8340_v20 }
  0xae   :  { %7593 = vmatprep.subr.bf16.mxu1 %v8341_v21  ;;  %v33_v21 = vld [vmem:[%s11046_s0 + $0x60] sm:$0xff] }
  0xb0   :  { %7572 = vmatpush3.bf16.msra.mxu0 %v8342_v22  ;;  %v69_v22 = vld [vmem:[%s11046_s0 + $0x180] sm:$0xff] }
  0xb1   :  { %7594 = vmatpush3.bf16.msra.mxu1 %v8343_v23  ;;  %7573 = vmatprep.subr.bf16.mxu0 %v8344_v24  ;;  %v34_v23 = vld [vmem:[%s11046_s0 + $0x68] sm:$0xff] }
  0xb2   :  { %7595 = vmatprep.subr.bf16.mxu1 %v8345_v25 }
  0xb4   :  { %7574 = vmatpush3.bf16.msra.mxu0 %v8346_v26  ;;  %v6712_v26 = vcombine.low %v33_v21, %v69_v22 }
  0xb5   :  { %7596 = vmatpush3.bf16.msra.mxu1 %v8347_v27  ;;  %7575 = vmatprep.subr.bf16.mxu0 %v8348_v28  ;;  %v6713_v27 = vcombine.high %v33_v21, %v69_v22  ;;  %v70_v28 = vld [vmem:[%s11046_s0 + $0x188] sm:$0xff] }
  0xb6   :  { %7597 = vmatprep.subr.bf16.mxu1 %v8349_v29 }
  0xb8   :  { %7576 = vmatpush3.bf16.msra.mxu0 %v8350_v30  ;;  %v6714_v30 = vcombine.low %v34_v23, %v70_v28 }
  0xb9   :  { %7598 = vmatpush3.bf16.msra.mxu1 %v8351_v31  ;;  %7577 = vmatprep.subr.bf16.mxu0 %v8352_v32  ;;  %v6715_v31 = vcombine.high %v34_v23, %v70_v28  ;;  %v8392_v32 = vld [vmem:[%s11045_s1 + $0x778] sm:$0xff]  }
  0xba   :  { %7599 = vmatprep.subr.bf16.mxu1 %v8353_v33  ;;  %v8425_v28 = vld [vmem:[%s11045_s1 + $0x8f8] sm:$0xff]  }
  0xbc   :  { %7578 = vmatpush3.bf16.msra.mxu0 %v8354_v34  ;;  %v8393_v34 = vld [vmem:[%s11045_s1 + $0x7f8] sm:$0xff]  }
  0xbd   :  { %7600 = vmatpush3.bf16.msra.mxu1 %v8355_v35  ;;  %7579 = vmatprep.subr.bf16.mxu0 %v8356_v36 }
  0xbe   :  { %7601 = vmatprep.subr.bf16.mxu1 %v8357_v37  ;;  %v8394_v37 = vld [vmem:[%s11045_s1 + $0x738] sm:$0xff]  }
  0xc0   :  { %7580 = vmatpush3.bf16.msra.mxu0 %v8358_v38 }
  0xc1   :  { %7602 = vmatpush3.bf16.msra.mxu1 %v8359_v39  ;;  %7609 = vmatprep.subr.bf16.mxu0 %v8360_v48  ;;  %v8395_v39 = vld [vmem:[%s11045_s1 + $0x7b8] sm:$0xff]   ;;  %v8399_v48 = vld [vmem:[%s11045_s1 + $0x7b0] sm:$0xff]  }
  0xc2   :  { %7631 = vmatprep.subr.bf16.mxu1 %v8361_v49  ;;  %v8400_v49 = vld [vmem:[%s11045_s1 + $0x768] sm:$0xff]  }
  0xc3   :  { %5511 = vmatmul.mubr.bf16.vlgmr.msra.gmra.mxu0 %v6708_v44  ;;  %v8397_v44 = vld [vmem:[%s11045_s1 + $0x7f0] sm:$0xff]  }
  0xc4   :  { %5552 = vmatmul.mubr.bf16.vlgmr.msra.gmra.mxu1 %v6710_v46  ;;  %7610 = vmatpush3.bf16.msra.mxu0 %v8362_v50  ;;  %v8398_v46 = vld [vmem:[%s11045_s1 + $0x730] sm:$0xff]   ;;  %v8401_v50 = vld [vmem:[%s11045_s1 + $0x7e8] sm:$0xff]  }
  0xc5   :  { %7632 = vmatpush3.bf16.msra.mxu1 %v8363_v51  ;;  %7611 = vmatprep.subr.bf16.mxu0 %v8364_v52  ;;  %v8402_v51 = vld [vmem:[%s11045_s1 + $0x728] sm:$0xff]  }
  0xc6   :  { %7633 = vmatprep.subr.bf16.mxu1 %v8365_v53  ;;  %5592 = vmatprep.mubr.bf16.mxu0 %v6713_v27  ;;  %v8403_v52 = vld [vmem:[%s11045_s1 + $0x7a8] sm:$0xff]   ;;  %v8404_v53 = vld [vmem:[%s11045_s1 + $0x760] sm:$0xff]  }
  0xc7   :  { %5633 = vmatprep.mubr.bf16.mxu1 %v6715_v31 }
  0xc8   :  { %7612 = vmatpush3.bf16.msra.mxu0 %v8366_v54  ;;  %v8405_v54 = vld [vmem:[%s11045_s1 + $0x7e0] sm:$0xff]  }
  0xc9   :  { %7634 = vmatpush3.bf16.msra.mxu1 %v8367_v55  ;;  %7613 = vmatprep.subr.bf16.mxu0 %v8368_v56  ;;  %v8406_v55 = vld [vmem:[%s11045_s1 + $0x720] sm:$0xff]  }
  0xca   :  { %7635 = vmatprep.subr.bf16.mxu1 %v8369_v57  ;;  %v8407_v56 = vld [vmem:[%s11045_s1 + $0x7a0] sm:$0xff]   ;;  %v8408_v57 = vld [vmem:[%s11045_s1 + $0x758] sm:$0xff]  }
  0xcc   :  { %7614 = vmatpush3.bf16.msra.mxu0 %v8370_v58  ;;  %v8409_v58 = vld [vmem:[%s11045_s1 + $0x7d8] sm:$0xff]  }
  0xcd   :  { %7636 = vmatpush3.bf16.msra.mxu1 %v8371_v59  ;;  %7615 = vmatprep.subr.bf16.mxu0 %v8372_v60  ;;  %v8410_v59 = vld [vmem:[%s11045_s1 + $0x718] sm:$0xff]  }
  0xce   :  { %7637 = vmatprep.subr.bf16.mxu1 %v8373_v61  ;;  %v8411_v60 = vld [vmem:[%s11045_s1 + $0x798] sm:$0xff]   ;;  %v8412_v61 = vld [vmem:[%s11045_s1 + $0x750] sm:$0xff]  }
  0xd0   :  { %7616 = vmatpush3.bf16.msra.mxu0 %v8374_v62  ;;  %v8413_v62 = vld [vmem:[%s11045_s1 + $0x7d0] sm:$0xff]  }
  0xd1   :  { %7638 = vmatpush3.bf16.msra.mxu1 %v8375_v63  ;;  %7617 = vmatprep.subr.bf16.mxu0 %v8376_v0  ;;  %v8414_v63 = vld [vmem:[%s11045_s1 + $0x710] sm:$0xff]  }
  0xd2   :  { %7639 = vmatprep.subr.bf16.mxu1 %v8377_v1  ;;  %v8415_v0 = vld [vmem:[%s11045_s1 + $0x790] sm:$0xff]   ;;  %v8416_v1 = vld [vmem:[%s11045_s1 + $0x748] sm:$0xff]  }
  0xd4   :  { %7618 = vmatpush3.bf16.msra.mxu0 %v8378_v2  ;;  %v8417_v2 = vld [vmem:[%s11045_s1 + $0x7c8] sm:$0xff]  }
  0xd5   :  { %7640 = vmatpush3.bf16.msra.mxu1 %v8379_v3  ;;  %7619 = vmatprep.subr.bf16.mxu0 %v8380_v4  ;;  %v8418_v3 = vld [vmem:[%s11045_s1 + $0x708] sm:$0xff]  }
  0xd6   :  { %7641 = vmatprep.subr.bf16.mxu1 %v8381_v5  ;;  %v8419_v4 = vld [vmem:[%s11045_s1 + $0x788] sm:$0xff]  }
  0xd8   :  { %7620 = vmatpush3.bf16.msra.mxu0 %v8382_v6  ;;  %v8420_v6 = vld [vmem:[%s11045_s1 + $0x740] sm:$0xff]  }
  0xd9   :  { %7642 = vmatpush3.bf16.msra.mxu1 %v8383_v7  ;;  %7621 = vmatprep.subr.bf16.mxu0 %v8384_v8  ;;  %v8421_v8 = vld [vmem:[%s11045_s1 + $0x7c0] sm:$0xff]  }
  0xda   :  { %7643 = vmatprep.subr.bf16.mxu1 %v8385_v9 }
  0xdc   :  { %7622 = vmatpush3.bf16.msra.mxu0 %v8386_v10  ;;  %v8422_v10 = vld [vmem:[%s11045_s1 + $0x700] sm:$0xff]  }
  0xdd   :  { %7644 = vmatpush3.bf16.msra.mxu1 %v8387_v11  ;;  %7623 = vmatprep.subr.bf16.mxu0 %v8388_v12 }
  0xde   :  { %7645 = vmatprep.subr.bf16.mxu1 %v8389_v14  ;;  %v35_v14 = vld [vmem:[%s11046_s0 + $0x70] sm:$0xff] }
  0xe0   :  { %7624 = vmatpush3.bf16.msra.mxu0 %v8390_v16 }
  0xe1   :  { %7646 = vmatpush3.bf16.msra.mxu1 %v8391_v18  ;;  %7653 = vmatprep.subr.bf16.mxu0 %v8392_v32  ;;  %v36_v18 = vld [vmem:[%s11046_s0 + $0x78] sm:$0xff] }
  0xe2   :  { %7675 = vmatprep.subr.bf16.mxu1 %v8393_v34  ;;  %v8426_v32 = vld [vmem:[%s11045_s1 + $0x838] sm:$0xff]  }
  0xe3   :  { %v7361_v13 = vpop.f32.mrf.mxu0  ;;  %5593 = vmatmul.mubr.bf16.vlgmr.msra.gmra.mxu0 %v6712_v26  ;;  %v8424_v26 = vld [vmem:[%s11045_s1 + $0x878] sm:$0xff]  }
  0xe4   :  { %v7383_v15 = vpop.f32.mrf.mxu1  ;;  %5634 = vmatmul.mubr.bf16.vlgmr.msra.gmra.mxu1 %v6714_v30  ;;  %7654 = vmatpush3.bf16.msra.mxu0 %v8394_v37  ;;  %v8427_v34 = vld [vmem:[%s11045_s1 + $0x8b8] sm:$0xff]   ;;  %v8429_v37 = vld [vmem:[%s11045_s1 + $0x8f0] sm:$0xff]  }
  0xe5   :  { %v7362_v17 = vpop.f32.mrf.mxu0  ;;  %7676 = vmatpush3.bf16.msra.mxu1 %v8395_v39  ;;  %7655 = vmatprep.subr.bf16.mxu0 %v8396_v42  ;;  %v8430_v39 = vld [vmem:[%s11045_s1 + $0x830] sm:$0xff]   ;;  %v8433_v42 = vld [vmem:[%s11045_s1 + $0x8e8] sm:$0xff]  }
  0xe6   :  { %v7363_v19 = vadd.f32 %v7362_v17, %v7361_v13  ;;  %v7384_v20 = vpop.f32.mrf.mxu1  ;;  %7677 = vmatprep.subr.bf16.mxu1 %v8397_v44  ;;  %v8423_v13 = vld [vmem:[%s11045_s1 + $0x780] sm:$0xff]   ;;  %v71_v17 = vld [vmem:[%s11046_s0 + $0x190] sm:$0xff]  ;;  %v8435_v44 = vld [vmem:[%s11045_s1 + $0x8a8] sm:$0xff]  }
  0xe7   :  { %v7385_v24 = vadd.f32 %v7384_v20, %v7383_v15  ;;  %v7364_v25 = vpop.f32.mrf.mxu0  ;;  %v6716_v22 = vcombine.low %v35_v14, %v71_v17  ;;  %v6717_v23 = vcombine.high %v35_v14, %v71_v17  ;;  %v8457_v17 = vld [vmem:[%s11045_s1 + $0x9f8] sm:$0xff]  }
  0xe8   :  { %v7386_v29 = vpop.f32.mrf.mxu1  ;;  %v5103_v41 = vadd.f32 %v7363_v19, %v6687_v40  ;;  %7656 = vmatpush3.bf16.msra.mxu0 %v8398_v46  ;;  %v72_v19 = vld [vmem:[%s11046_s0 + $0x198] sm:$0xff]  ;;  %v8437_v46 = vld [vmem:[%s11045_s1 + $0x8e0] sm:$0xff]  }
  0xe9   :  { %v7365_v33 = vpop.f32.mrf.mxu0  ;;  %7678 = vmatpush3.bf16.msra.mxu1 %v8399_v48  ;;  %7657 = vmatprep.subr.bf16.mxu0 %v8400_v49  ;;  %v8439_v48 = vld [vmem:[%s11045_s1 + $0x8a0] sm:$0xff]   ;;  %v8440_v49 = vld [vmem:[%s11045_s1 + $0x858] sm:$0xff]  }
  0xea   :  { %v7366_v35 = vadd.f32 %v7365_v33, %v7364_v25  ;;  %v7387_v36 = vpop.f32.mrf.mxu1  ;;  %v9569_v45 = vadd.f32 %v7385_v24, %v5103_v41  ;;  %7679 = vmatprep.subr.bf16.mxu1 %v8401_v50  ;;  %v6718_v24 = vcombine.low %v36_v18, %v72_v19  ;;  %v6719_v25 = vcombine.high %v36_v18, %v72_v19  ;;  %v8432_v41 = vld [vmem:[%s11045_s1 + $0x868] sm:$0xff]   ;;  %v8441_v50 = vld [vmem:[%s11045_s1 + $0x8d8] sm:$0xff]  }
  0xeb   :  { %v7388_v38 = vadd.f32 %v7387_v36, %v7386_v29  ;;  %5674 = vmatprep.mubr.bf16.mxu0 %v6717_v23  ;;  %v8428_v36 = vld [vmem:[%s11045_s1 + $0x870] sm:$0xff]   ;;  %v8458_v19 = vld [vmem:[%s11045_s1 + $0x938] sm:$0xff]  }
  0xec   :  { %v5106_v43 = vadd.f32 %v7366_v35, %v6687_v40  ;;  %7658 = vmatpush3.bf16.msra.mxu0 %v8402_v51  ;;  %5715 = vmatprep.mubr.bf16.mxu1 %v6719_v25  ;;  %v8431_v40 = vld [vmem:[%s11045_s1 + $0x8b0] sm:$0xff]   ;;  %v8442_v51 = vld [vmem:[%s11045_s1 + $0x818] sm:$0xff]   ;;  %v8464_v25 = vld [vmem:[%s11045_s1 + $0x968] sm:$0xff]  }
  0xed   :  { %7680 = vmatpush3.bf16.msra.mxu1 %v8403_v52  ;;  %7659 = vmatprep.subr.bf16.mxu0 %v8404_v53  ;;  %v8443_v52 = vld [vmem:[%s11045_s1 + $0x898] sm:$0xff]   ;;  %v8444_v53 = vld [vmem:[%s11045_s1 + $0x850] sm:$0xff]  }
  0xee   :  { %v9574_v47 = vadd.f32 %v7388_v38, %v5106_v43  ;;  %7681 = vmatprep.subr.bf16.mxu1 %v8405_v54  ;;  %v8434_v43 = vld [vmem:[%s11045_s1 + $0x828] sm:$0xff]   ;;  %v8445_v54 = vld [vmem:[%s11045_s1 + $0x8d0] sm:$0xff]  }
  0xef   :  { %v8462_v23 = vld [vmem:[%s11045_s1 + $0x930] sm:$0xff]  }
  0xf0   :  { %7660 = vmatpush3.bf16.msra.mxu0 %v8406_v55  ;;  %v8446_v55 = vld [vmem:[%s11045_s1 + $0x810] sm:$0xff]  }
  0xf1   :  { %7682 = vmatpush3.bf16.msra.mxu1 %v8407_v56  ;;  %7661 = vmatprep.subr.bf16.mxu0 %v8408_v57  ;;  %v8447_v56 = vld [vmem:[%s11045_s1 + $0x890] sm:$0xff]   ;;  %v8448_v57 = vld [vmem:[%s11045_s1 + $0x848] sm:$0xff]  }
  0xf2   :  { %7683 = vmatprep.subr.bf16.mxu1 %v8409_v58  ;;  %v8449_v58 = vld [vmem:[%s11045_s1 + $0x8c8] sm:$0xff]  }
  0xf4   :  { %7662 = vmatpush3.bf16.msra.mxu0 %v8410_v59  ;;  %v8450_v59 = vld [vmem:[%s11045_s1 + $0x808] sm:$0xff]  }
  0xf5   :  { %7684 = vmatpush3.bf16.msra.mxu1 %v8411_v60  ;;  %7663 = vmatprep.subr.bf16.mxu0 %v8412_v61  ;;  %v8451_v60 = vld [vmem:[%s11045_s1 + $0x888] sm:$0xff]   ;;  %v8452_v61 = vld [vmem:[%s11045_s1 + $0x840] sm:$0xff]  }
  0xf6   :  { %7685 = vmatprep.subr.bf16.mxu1 %v8413_v62 }
  0xf8   :  { %7664 = vmatpush3.bf16.msra.mxu0 %v8414_v63 }
  0xf9   :  { %7686 = vmatpush3.bf16.msra.mxu1 %v8415_v0  ;;  %7665 = vmatprep.subr.bf16.mxu0 %v8416_v1  ;;  %v8453_v0 = vld [vmem:[%s11045_s1 + $0x8c0] sm:$0xff]  }
  0xfa   :  { %7687 = vmatprep.subr.bf16.mxu1 %v8417_v2  ;;  %v8454_v1 = vld [vmem:[%s11045_s1 + $0x800] sm:$0xff]  }
  0xfc   :  { %7666 = vmatpush3.bf16.msra.mxu0 %v8418_v3 }
  0xfd   :  { %7688 = vmatpush3.bf16.msra.mxu1 %v8419_v4  ;;  %7667 = vmatprep.subr.bf16.mxu0 %v8420_v6  ;;  %v8455_v4 = vld [vmem:[%s11045_s1 + $0x880] sm:$0xff]  }
  0xfe   :  { %7689 = vmatprep.subr.bf16.mxu1 %v8421_v8  ;;  %v73_v8 = vld [vmem:[%s11046_s0 + $0x1a0] sm:$0xff] }
 0x100   :  { %7668 = vmatpush3.bf16.msra.mxu0 %v8422_v10 }
 0x101   :  { %7690 = vmatpush3.bf16.msra.mxu1 %v8423_v13  ;;  %7697 = vmatprep.subr.bf16.mxu0 %v8424_v26  ;;  %v8465_v26 = vld [vmem:[%s11045_s1 + $0x9e8] sm:$0xff]  }
 0x102   :  { %7719 = vmatprep.subr.bf16.mxu1 %v8425_v28  ;;  %v8467_v28 = vld [vmem:[%s11045_s1 + $0x9a8] sm:$0xff]  }
 0x103   :  { %v7405_v5 = vpop.f32.mrf.mxu0  ;;  %5675 = vmatmul.mubr.bf16.vlgmr.msra.gmra.mxu0 %v6716_v22  ;;  %v8461_v22 = vld [vmem:[%s11045_s1 + $0x9f0] sm:$0xff]  }
 0x104   :  { %v7427_v7 = vpop.f32.mrf.mxu1  ;;  %5716 = vmatmul.mubr.bf16.vlgmr.msra.gmra.mxu1 %v6718_v24  ;;  %7698 = vmatpush3.bf16.msra.mxu0 %v8426_v32  ;;  %v8463_v24 = vld [vmem:[%s11045_s1 + $0x9b0] sm:$0xff]   ;;  %v8471_v32 = vld [vmem:[%s11045_s1 + $0x9a0] sm:$0xff]  }
 0x105   :  { %v7406_v9 = vpop.f32.mrf.mxu0  ;;  %7720 = vmatpush3.bf16.msra.mxu1 %v8427_v34  ;;  %7699 = vmatprep.subr.bf16.mxu0 %v8428_v36  ;;  %v8473_v34 = vld [vmem:[%s11045_s1 + $0x9d8] sm:$0xff]  }
 0x106   :  { %v7407_v11 = vadd.f32 %v7406_v9, %v7405_v5  ;;  %v7428_v12 = vpop.f32.mrf.mxu1  ;;  %7721 = vmatprep.subr.bf16.mxu1 %v8429_v37  ;;  %v38_v9 = vld [vmem:[%s11046_s0 + $0x88] sm:$0xff]  ;;  %v8475_v36 = vld [vmem:[%s11045_s1 + $0x998] sm:$0xff]   ;;  %v8476_v37 = vld [vmem:[%s11045_s1 + $0x950] sm:$0xff]  }
 0x107   :  { %v7429_v15 = vadd.f32 %v7428_v12, %v7427_v7  ;;  %v7408_v16 = vpop.f32.mrf.mxu0  ;;  %v37_v7 = vld [vmem:[%s11046_s0 + $0x80] sm:$0xff]  ;;  %v74_v12 = vld [vmem:[%s11046_s0 + $0x1a8] sm:$0xff] }
 0x108   :  { %v5185_v20 = vadd.f32 %v7407_v11, %v9569_v45  ;;  %v7430_v21 = vpop.f32.mrf.mxu1  ;;  %7700 = vmatpush3.bf16.msra.mxu0 %v8430_v39  ;;  %v8436_v45 = vld [vmem:[%s11045_s1 + $0x860] sm:$0xff]   ;;  %v6720_v10 = vcombine.low %v37_v7, %v73_v8  ;;  %v6721_v11 = vcombine.high %v37_v7, %v73_v8  ;;  %v6722_v14 = vcombine.low %v38_v9, %v74_v12  ;;  %v8477_v39 = vld [vmem:[%s11045_s1 + $0x9d0] sm:$0xff]  }
 0x109   :  { %v7409_v27 = vpop.f32.mrf.mxu0  ;;  %7722 = vmatpush3.bf16.msra.mxu1 %v8431_v40  ;;  %7701 = vmatprep.subr.bf16.mxu0 %v8432_v41  ;;  %v8478_v40 = vld [vmem:[%s11045_s1 + $0x910] sm:$0xff]   ;;  %v8501_v7 = vld [vmem:[%s11045_s1 + $0xae0] sm:$0xff]  }
 0x10a   :  { %v9670_v29 = vadd.f32 %v7429_v15, %v5185_v20  ;;  %v7410_v30 = vadd.f32 %v7409_v27, %v7408_v16  ;;  %v7431_v31 = vpop.f32.mrf.mxu1  ;;  %7723 = vmatprep.subr.bf16.mxu1 %v8433_v42  ;;  %v6723_v15 = vcombine.high %v38_v9, %v74_v12  ;;  %v8456_v16 = vld [vmem:[%s11045_s1 + $0x978] sm:$0xff]   ;;  %5756 = vmatprep.mubr.bf16.mxu0 %v6721_v11  ;;  %v8466_v27 = vld [vmem:[%s11045_s1 + $0x928] sm:$0xff]   ;;  %v8479_v41 = vld [vmem:[%s11045_s1 + $0x990] sm:$0xff]  }
 0x10b   :  { %v7432_v33 = vadd.f32 %v7431_v31, %v7430_v21  ;;  %v8459_v20 = vld [vmem:[%s11045_s1 + $0x9b8] sm:$0xff]   ;;  %v8460_v21 = vld [vmem:[%s11045_s1 + $0x970] sm:$0xff]   ;;  %v8470_v31 = vld [vmem:[%s11045_s1 + $0x920] sm:$0xff]  }
 0x10c   :  { %v5188_v35 = vadd.f32 %v7410_v30, %v9574_v47  ;;  %7702 = vmatpush3.bf16.msra.mxu0 %v8434_v43  ;;  %v8438_v47 = vld [vmem:[%s11045_s1 + $0x820] sm:$0xff]   ;;  %5797 = vmatprep.mubr.bf16.mxu1 %v6723_v15  ;;  %v8480_v42 = vld [vmem:[%s11045_s1 + $0x948] sm:$0xff]   ;;  %v8505_v11 = vld [vmem:[%s11045_s1 + $0xad8] sm:$0xff]  }
 0x10d   :  { %7724 = vmatpush3.bf16.msra.mxu1 %v8435_v44  ;;  %7703 = vmatprep.subr.bf16.mxu0 %v8436_v45  ;;  %v8469_v30 = vld [vmem:[%s11045_s1 + $0x9e0] sm:$0xff]   ;;  %v8481_v43 = vld [vmem:[%s11045_s1 + $0x9c8] sm:$0xff]   ;;  %v8506_v12 = vld [vmem:[%s11045_s1 + $0xa18] sm:$0xff]  }
 0x10e   :  { %v9685_v38 = vadd.f32 %v7432_v33, %v5188_v35  ;;  %7725 = vmatprep.subr.bf16.mxu1 %v8437_v46  ;;  %v8472_v33 = vld [vmem:[%s11045_s1 + $0x958] sm:$0xff]   ;;  %v8482_v44 = vld [vmem:[%s11045_s1 + $0x908] sm:$0xff]   ;;  %v8484_v46 = vld [vmem:[%s11045_s1 + $0x940] sm:$0xff]  }
 0x10f   :  { %v8474_v35 = vld [vmem:[%s11045_s1 + $0x918] sm:$0xff]   ;;  %v8483_v45 = vld [vmem:[%s11045_s1 + $0x988] sm:$0xff]   ;;  %v8502_v8 = vld [vmem:[%s11045_s1 + $0xa20] sm:$0xff]  }
 0x110   :  { %7704 = vmatpush3.bf16.msra.mxu0 %v8438_v47  ;;  %v8485_v47 = vld [vmem:[%s11045_s1 + $0x9c0] sm:$0xff]   ;;  %v8509_v15 = vld [vmem:[%s11045_s1 + $0xad0] sm:$0xff]  }
 0x111   :  { %7726 = vmatpush3.bf16.msra.mxu1 %v8439_v48  ;;  %7705 = vmatprep.subr.bf16.mxu0 %v8440_v49  ;;  %v8486_v48 = vld [vmem:[%s11045_s1 + $0x900] sm:$0xff]  }
 0x112   :  { %7727 = vmatprep.subr.bf16.mxu1 %v8441_v50  ;;  %v8487_v49 = vld [vmem:[%s11045_s1 + $0x980] sm:$0xff]   ;;  %v39_v50 = vld [vmem:[%s11046_s0 + $0x90] sm:$0xff] }
 0x113   :  { %v8503_v9 = vld [vmem:[%s11045_s1 + $0xaa0] sm:$0xff]  }
 0x114   :  { %7706 = vmatpush3.bf16.msra.mxu0 %v8442_v51  ;;  %v75_v51 = vld [vmem:[%s11046_s0 + $0x1b0] sm:$0xff] }
 0x115   :  { %7728 = vmatpush3.bf16.msra.mxu1 %v8443_v52  ;;  %7707 = vmatprep.subr.bf16.mxu0 %v8444_v53  ;;  %v6724_v52 = vcombine.low %v39_v50, %v75_v51  ;;  %v6725_v53 = vcombine.high %v39_v50, %v75_v51  ;;  %v8534_v50 = vld [vmem:[%s11045_s1 + $0xb20] sm:$0xff]  }
 0x116   :  { %7729 = vmatprep.subr.bf16.mxu1 %v8445_v54  ;;  %v40_v54 = vld [vmem:[%s11046_s0 + $0x98] sm:$0xff]  ;;  %v8535_v51 = vld [vmem:[%s11045_s1 + $0xba0] sm:$0xff]  }
 0x118   :  { %7708 = vmatpush3.bf16.msra.mxu0 %v8446_v55  ;;  %v76_v55 = vld [vmem:[%s11046_s0 + $0x1b8] sm:$0xff] }
 0x119   :  { %7730 = vmatpush3.bf16.msra.mxu1 %v8447_v56  ;;  %7709 = vmatprep.subr.bf16.mxu0 %v8448_v57  ;;  %v6726_v56 = vcombine.low %v40_v54, %v76_v55  ;;  %v6727_v57 = vcombine.high %v40_v54, %v76_v55  ;;  %v8538_v54 = vld [vmem:[%s11045_s1 + $0xb18] sm:$0xff]  }
 0x11a   :  { %7731 = vmatprep.subr.bf16.mxu1 %v8449_v58  ;;  %v8488_v58 = vld [vmem:[%s11045_s1 + $0xa78] sm:$0xff]  }
 0x11b   :  { %v8539_v55 = vld [vmem:[%s11045_s1 + $0xb98] sm:$0xff]  }
 0x11c   :  { %7710 = vmatpush3.bf16.msra.mxu0 %v8450_v59  ;;  %v8489_v59 = vld [vmem:[%s11045_s1 + $0xaf8] sm:$0xff]  }
 0x11d   :  { %7732 = vmatpush3.bf16.msra.mxu1 %v8451_v60  ;;  %7711 = vmatprep.subr.bf16.mxu0 %v8452_v61  ;;  %v8490_v60 = vld [vmem:[%s11045_s1 + $0xa38] sm:$0xff]  }
 0x11e   :  { %7733 = vmatprep.subr.bf16.mxu1 %v8453_v0  ;;  %v8491_v61 = vld [vmem:[%s11045_s1 + $0xab8] sm:$0xff]   ;;  %v8494_v0 = vld [vmem:[%s11045_s1 + $0xa30] sm:$0xff]  }
 0x120   :  { %7712 = vmatpush3.bf16.msra.mxu0 %v8454_v1  ;;  %v8495_v1 = vld [vmem:[%s11045_s1 + $0xab0] sm:$0xff]  }
 0x121   :  { %7734 = vmatpush3.bf16.msra.mxu1 %v8455_v4  ;;  %7741 = vmatprep.subr.bf16.mxu0 %v8456_v16  ;;  %v8498_v4 = vld [vmem:[%s11045_s1 + $0xa28] sm:$0xff]   ;;  %v8510_v16 = vld [vmem:[%s11045_s1 + $0xa10] sm:$0xff]  }
 0x122   :  { %7763 = vmatprep.subr.bf16.mxu1 %v8457_v17  ;;  %v8511_v17 = vld [vmem:[%s11045_s1 + $0xa90] sm:$0xff]  }
 0x123   :  { %v7449_v62 = vpop.f32.mrf.mxu0  ;;  %5757 = vmatmul.mubr.bf16.vlgmr.msra.gmra.mxu0 %v6720_v10  ;;  %v8504_v10 = vld [vmem:[%s11045_s1 + $0xa58] sm:$0xff]  }
 0x124   :  { %v7471_v63 = vpop.f32.mrf.mxu1  ;;  %5798 = vmatmul.mubr.bf16.vlgmr.msra.gmra.mxu1 %v6722_v14  ;;  %7742 = vmatpush3.bf16.msra.mxu0 %v8458_v19  ;;  %v8508_v14 = vld [vmem:[%s11045_s1 + $0xa50] sm:$0xff]   ;;  %v8512_v19 = vld [vmem:[%s11045_s1 + $0xa48] sm:$0xff]  }
 0x125   :  { %v7450_v2 = vpop.f32.mrf.mxu0  ;;  %7764 = vmatpush3.bf16.msra.mxu1 %v8459_v20  ;;  %7743 = vmatprep.subr.bf16.mxu0 %v8460_v21  ;;  %v8513_v20 = vld [vmem:[%s11045_s1 + $0xac8] sm:$0xff]  }
 0x126   :  { %v7472_v3 = vpop.f32.mrf.mxu1  ;;  %v7451_v5 = vadd.f32 %v7450_v2, %v7449_v62  ;;  %7765 = vmatprep.subr.bf16.mxu1 %v8461_v22  ;;  %5838 = vmatprep.mubr.bf16.mxu0 %v6725_v53  ;;  %v8492_v62 = vld [vmem:[%s11045_s1 + $0xa70] sm:$0xff]   ;;  %v8496_v2 = vld [vmem:[%s11045_s1 + $0xa68] sm:$0xff]   ;;  %v8537_v53 = vld [vmem:[%s11045_s1 + $0xbd8] sm:$0xff]  }
 0x127   :  { %v7473_v6 = vadd.f32 %v7472_v3, %v7471_v63  ;;  %5879 = vmatprep.mubr.bf16.mxu1 %v6727_v57  ;;  %v8493_v63 = vld [vmem:[%s11045_s1 + $0xaf0] sm:$0xff]   ;;  %v8497_v3 = vld [vmem:[%s11045_s1 + $0xae8] sm:$0xff]  }
 0x128   :  { %v5267_v13 = vadd.f32 %v7451_v5, %v9670_v29  ;;  %7744 = vmatpush3.bf16.msra.mxu0 %v8462_v23  ;;  %v8468_v29 = vld [vmem:[%s11045_s1 + $0x960] sm:$0xff]   ;;  %v8499_v5 = vld [vmem:[%s11045_s1 + $0xaa8] sm:$0xff]   ;;  %v8541_v57 = vld [vmem:[%s11045_s1 + $0xbd0] sm:$0xff]  }
 0x129   :  { %7766 = vmatpush3.bf16.msra.mxu1 %v8463_v24  ;;  %7745 = vmatprep.subr.bf16.mxu0 %v8464_v25  ;;  %v8514_v21 = vld [vmem:[%s11045_s1 + $0xa08] sm:$0xff]   ;;  %v8516_v23 = vld [vmem:[%s11045_s1 + $0xa40] sm:$0xff]  }
 0x12a   :  { %v9784_v18 = vadd.f32 %v7473_v6, %v5267_v13  ;;  %7767 = vmatprep.subr.bf16.mxu1 %v8465_v26  ;;  %v8500_v6 = vld [vmem:[%s11045_s1 + $0xa60] sm:$0xff]   ;;  %v8507_v13 = vld [vmem:[%s11045_s1 + $0xa98] sm:$0xff]   ;;  %v8515_v22 = vld [vmem:[%s11045_s1 + $0xa88] sm:$0xff]  }
 0x12b   :  { %v8517_v24 = vld [vmem:[%s11045_s1 + $0xac0] sm:$0xff]  }
 0x12c   :  { %7746 = vmatpush3.bf16.msra.mxu0 %v8466_v27  ;;  %v8518_v25 = vld [vmem:[%s11045_s1 + $0xa00] sm:$0xff]  }
 0x12d   :  { %7768 = vmatpush3.bf16.msra.mxu1 %v8467_v28  ;;  %7747 = vmatprep.subr.bf16.mxu0 %v8468_v29  ;;  %v8519_v26 = vld [vmem:[%s11045_s1 + $0xa80] sm:$0xff]   ;;  %v42_v29 = vld [vmem:[%s11046_s0 + $0xa8] sm:$0xff] }
 0x12e   :  { %7769 = vmatprep.subr.bf16.mxu1 %v8469_v30  ;;  %v41_v27 = vld [vmem:[%s11046_s0 + $0xa0] sm:$0xff]  ;;  %v78_v30 = vld [vmem:[%s11046_s0 + $0x1c8] sm:$0xff] }
 0x12f   :  { %v77_v28 = vld [vmem:[%s11046_s0 + $0x1c0] sm:$0xff] }
 0x130   :  { %7748 = vmatpush3.bf16.msra.mxu0 %v8470_v31  ;;  %v6728_v31 = vcombine.low %v41_v27, %v77_v28 }
 0x131   :  { %7770 = vmatpush3.bf16.msra.mxu1 %v8471_v32  ;;  %7749 = vmatprep.subr.bf16.mxu0 %v8472_v33  ;;  %v6729_v32 = vcombine.high %v41_v27, %v77_v28  ;;  %v6730_v33 = vcombine.low %v42_v29, %v78_v30  ;;  %v8566_v27 = vld [vmem:[%s11045_s1 + $0xc20] sm:$0xff]  }
 0x132   :  { %7771 = vmatprep.subr.bf16.mxu1 %v8473_v34  ;;  %v6731_v34 = vcombine.high %v42_v29, %v78_v30  ;;  %v8567_v28 = vld [vmem:[%s11045_s1 + $0xca0] sm:$0xff]   ;;  %v8568_v29 = vld [vmem:[%s11045_s1 + $0xc58] sm:$0xff]  }
 0x133   :  { %v8569_v30 = vld [vmem:[%s11045_s1 + $0xcd8] sm:$0xff]  }
 0x134   :  { %7750 = vmatpush3.bf16.msra.mxu0 %v8474_v35  ;;  %v8520_v35 = vld [vmem:[%s11045_s1 + $0xb78] sm:$0xff]  }
 0x135   :  { %7772 = vmatpush3.bf16.msra.mxu1 %v8475_v36  ;;  %7751 = vmatprep.subr.bf16.mxu0 %v8476_v37  ;;  %v8521_v36 = vld [vmem:[%s11045_s1 + $0xbf8] sm:$0xff]  }
 0x136   :  { %7773 = vmatprep.subr.bf16.mxu1 %v8477_v39  ;;  %v8522_v37 = vld [vmem:[%s11045_s1 + $0xb38] sm:$0xff]  }
 0x137   :  { %v8523_v39 = vld [vmem:[%s11045_s1 + $0xbb8] sm:$0xff]  }
 0x138   :  { %7752 = vmatpush3.bf16.msra.mxu0 %v8478_v40  ;;  %v8524_v40 = vld [vmem:[%s11045_s1 + $0xb70] sm:$0xff]  }
 0x139   :  { %7774 = vmatpush3.bf16.msra.mxu1 %v8479_v41  ;;  %7753 = vmatprep.subr.bf16.mxu0 %v8480_v42  ;;  %v8525_v41 = vld [vmem:[%s11045_s1 + $0xbf0] sm:$0xff]  }
 0x13a   :  { %7775 = vmatprep.subr.bf16.mxu1 %v8481_v43  ;;  %v8526_v42 = vld [vmem:[%s11045_s1 + $0xb30] sm:$0xff]  }
 0x13b   :  { %v8527_v43 = vld [vmem:[%s11045_s1 + $0xbb0] sm:$0xff]  }
 0x13c   :  { %7754 = vmatpush3.bf16.msra.mxu0 %v8482_v44  ;;  %v8528_v44 = vld [vmem:[%s11045_s1 + $0xb68] sm:$0xff]  }
 0x13d   :  { %7776 = vmatpush3.bf16.msra.mxu1 %v8483_v45  ;;  %7755 = vmatprep.subr.bf16.mxu0 %v8484_v46  ;;  %v8529_v45 = vld [vmem:[%s11045_s1 + $0xbe8] sm:$0xff]  }
 0x13e   :  { %7777 = vmatprep.subr.bf16.mxu1 %v8485_v47  ;;  %v8530_v46 = vld [vmem:[%s11045_s1 + $0xb28] sm:$0xff]  }
 0x13f   :  { %v8531_v47 = vld [vmem:[%s11045_s1 + $0xba8] sm:$0xff]  }
 0x140   :  { %7756 = vmatpush3.bf16.msra.mxu0 %v8486_v48  ;;  %v8532_v48 = vld [vmem:[%s11045_s1 + $0xb60] sm:$0xff]  }
 0x141   :  { %7778 = vmatpush3.bf16.msra.mxu1 %v8487_v49  ;;  %7785 = vmatprep.subr.bf16.mxu0 %v8488_v58  ;;  %v8533_v49 = vld [vmem:[%s11045_s1 + $0xbe0] sm:$0xff]   ;;  %v8542_v58 = vld [vmem:[%s11045_s1 + $0xb10] sm:$0xff]  }
 0x142   :  { %7807 = vmatprep.subr.bf16.mxu1 %v8489_v59  ;;  %v8543_v59 = vld [vmem:[%s11045_s1 + $0xb90] sm:$0xff]  }
 0x143   :  { %5839 = vmatmul.mubr.bf16.vlgmr.msra.gmra.mxu0 %v6724_v52  ;;  %v8536_v52 = vld [vmem:[%s11045_s1 + $0xb58] sm:$0xff]  }
 0x144   :  { %5880 = vmatmul.mubr.bf16.vlgmr.msra.gmra.mxu1 %v6726_v56  ;;  %7786 = vmatpush3.bf16.msra.mxu0 %v8490_v60  ;;  %v8540_v56 = vld [vmem:[%s11045_s1 + $0xb50] sm:$0xff]   ;;  %v8544_v60 = vld [vmem:[%s11045_s1 + $0xb48] sm:$0xff]  }
 0x145   :  { %7808 = vmatpush3.bf16.msra.mxu1 %v8491_v61  ;;  %7787 = vmatprep.subr.bf16.mxu0 %v8492_v62  ;;  %v8545_v61 = vld [vmem:[%s11045_s1 + $0xbc8] sm:$0xff]  }
 0x146   :  { %7809 = vmatprep.subr.bf16.mxu1 %v8493_v63  ;;  %5920 = vmatprep.mubr.bf16.mxu0 %v6729_v32  ;;  %v8546_v62 = vld [vmem:[%s11045_s1 + $0xb08] sm:$0xff]   ;;  %v8571_v32 = vld [vmem:[%s11045_s1 + $0xc98] sm:$0xff]  }
 0x147   :  { %5961 = vmatprep.mubr.bf16.mxu1 %v6731_v34  ;;  %v8547_v63 = vld [vmem:[%s11045_s1 + $0xb88] sm:$0xff]   ;;  %v8573_v34 = vld [vmem:[%s11045_s1 + $0xcd0] sm:$0xff]  }
 0x148   :  { %7788 = vmatpush3.bf16.msra.mxu0 %v8494_v0  ;;  %v8548_v0 = vld [vmem:[%s11045_s1 + $0xb40] sm:$0xff]  }
 0x149   :  { %7810 = vmatpush3.bf16.msra.mxu1 %v8495_v1  ;;  %7789 = vmatprep.subr.bf16.mxu0 %v8496_v2  ;;  %v8549_v1 = vld [vmem:[%s11045_s1 + $0xbc0] sm:$0xff]  }
 0x14a   :  { %7811 = vmatprep.subr.bf16.mxu1 %v8497_v3  ;;  %v8550_v2 = vld [vmem:[%s11045_s1 + $0xb00] sm:$0xff]  }
 0x14b   :  { %v8551_v3 = vld [vmem:[%s11045_s1 + $0xb80] sm:$0xff]  }
 0x14c   :  { %7790 = vmatpush3.bf16.msra.mxu0 %v8498_v4  ;;  %v43_v4 = vld [vmem:[%s11046_s0 + $0xb0] sm:$0xff] }
 0x14d   :  { %7812 = vmatpush3.bf16.msra.mxu1 %v8499_v5  ;;  %7791 = vmatprep.subr.bf16.mxu0 %v8500_v6  ;;  %v79_v5 = vld [vmem:[%s11046_s0 + $0x1d0] sm:$0xff]  ;;  %v44_v6 = vld [vmem:[%s11046_s0 + $0xb8] sm:$0xff] }
 0x14e   :  { %7813 = vmatprep.subr.bf16.mxu1 %v8501_v7  ;;  %v6732_v7 = vcombine.low %v43_v4, %v79_v5 }
 0x150   :  { %7792 = vmatpush3.bf16.msra.mxu0 %v8502_v8  ;;  %v6733_v8 = vcombine.high %v43_v4, %v79_v5  ;;  %v8598_v4 = vld [vmem:[%s11045_s1 + $0xd20] sm:$0xff]  }
 0x151   :  { %7814 = vmatpush3.bf16.msra.mxu1 %v8503_v9  ;;  %7793 = vmatprep.subr.bf16.mxu0 %v8504_v10  ;;  %v80_v9 = vld [vmem:[%s11046_s0 + $0x1d8] sm:$0xff]  ;;  %v8599_v5 = vld [vmem:[%s11045_s1 + $0xda0] sm:$0xff]  }
 0x152   :  { %7815 = vmatprep.subr.bf16.mxu1 %v8505_v11  ;;  %v6734_v10 = vcombine.low %v44_v6, %v80_v9  ;;  %v6735_v11 = vcombine.high %v44_v6, %v80_v9  ;;  %v8600_v6 = vld [vmem:[%s11045_s1 + $0xd58] sm:$0xff]  }
 0x153   :  { %v8603_v9 = vld [vmem:[%s11045_s1 + $0xd98] sm:$0xff]  }
 0x154   :  { %7794 = vmatpush3.bf16.msra.mxu0 %v8506_v12  ;;  %v8552_v12 = vld [vmem:[%s11045_s1 + $0xc78] sm:$0xff]  }
 0x155   :  { %7816 = vmatpush3.bf16.msra.mxu1 %v8507_v13  ;;  %7795 = vmatprep.subr.bf16.mxu0 %v8508_v14  ;;  %v8553_v13 = vld [vmem:[%s11045_s1 + $0xcf8] sm:$0xff]  }
 0x156   :  { %7817 = vmatprep.subr.bf16.mxu1 %v8509_v15  ;;  %v8554_v14 = vld [vmem:[%s11045_s1 + $0xc38] sm:$0xff]  }
 0x157   :  { %v8555_v15 = vld [vmem:[%s11045_s1 + $0xcb8] sm:$0xff]  }
 0x158   :  { %7796 = vmatpush3.bf16.msra.mxu0 %v8510_v16  ;;  %v8556_v16 = vld [vmem:[%s11045_s1 + $0xc70] sm:$0xff]  }
 0x159   :  { %7818 = vmatpush3.bf16.msra.mxu1 %v8511_v17  ;;  %7797 = vmatprep.subr.bf16.mxu0 %v8512_v19  ;;  %v8557_v17 = vld [vmem:[%s11045_s1 + $0xcf0] sm:$0xff]  }
 0x15a   :  { %7819 = vmatprep.subr.bf16.mxu1 %v8513_v20  ;;  %v8558_v19 = vld [vmem:[%s11045_s1 + $0xc30] sm:$0xff]  }
 0x15b   :  { %v8559_v20 = vld [vmem:[%s11045_s1 + $0xcb0] sm:$0xff]  }
 0x15c   :  { %7798 = vmatpush3.bf16.msra.mxu0 %v8514_v21  ;;  %v8560_v21 = vld [vmem:[%s11045_s1 + $0xc68] sm:$0xff]  }
 0x15d   :  { %7820 = vmatpush3.bf16.msra.mxu1 %v8515_v22  ;;  %7799 = vmatprep.subr.bf16.mxu0 %v8516_v23  ;;  %v8561_v22 = vld [vmem:[%s11045_s1 + $0xce8] sm:$0xff]  }
 0x15e   :  { %7821 = vmatprep.subr.bf16.mxu1 %v8517_v24  ;;  %v8562_v23 = vld [vmem:[%s11045_s1 + $0xc28] sm:$0xff]  }
 0x15f   :  { %v8563_v24 = vld [vmem:[%s11045_s1 + $0xca8] sm:$0xff]  }
 0x160   :  { %7800 = vmatpush3.bf16.msra.mxu0 %v8518_v25  ;;  %v8564_v25 = vld [vmem:[%s11045_s1 + $0xc60] sm:$0xff]  }
 0x161   :  { %7822 = vmatpush3.bf16.msra.mxu1 %v8519_v26  ;;  %7829 = vmatprep.subr.bf16.mxu0 %v8520_v35  ;;  %v8565_v26 = vld [vmem:[%s11045_s1 + $0xce0] sm:$0xff]   ;;  %v8574_v35 = vld [vmem:[%s11045_s1 + $0xc10] sm:$0xff]  }
 0x162   :  { %7851 = vmatprep.subr.bf16.mxu1 %v8521_v36  ;;  %v8575_v36 = vld [vmem:[%s11045_s1 + $0xc90] sm:$0xff]  }
 0x163   :  { %5921 = vmatmul.mubr.bf16.vlgmr.msra.gmra.mxu0 %v6728_v31  ;;  %v8570_v31 = vld [vmem:[%s11045_s1 + $0xc18] sm:$0xff]  }
 0x164   :  { %5962 = vmatmul.mubr.bf16.vlgmr.msra.gmra.mxu1 %v6730_v33  ;;  %7830 = vmatpush3.bf16.msra.mxu0 %v8522_v37  ;;  %v8572_v33 = vld [vmem:[%s11045_s1 + $0xc50] sm:$0xff]   ;;  %v8576_v37 = vld [vmem:[%s11045_s1 + $0xc48] sm:$0xff]  }
 0x165   :  { %7852 = vmatpush3.bf16.msra.mxu1 %v8523_v39  ;;  %7831 = vmatprep.subr.bf16.mxu0 %v8524_v40  ;;  %v8577_v39 = vld [vmem:[%s11045_s1 + $0xcc8] sm:$0xff]  }
 0x166   :  { %7853 = vmatprep.subr.bf16.mxu1 %v8525_v41  ;;  %6002 = vmatprep.mubr.bf16.mxu0 %v6733_v8  ;;  %v8578_v40 = vld [vmem:[%s11045_s1 + $0xc08] sm:$0xff]   ;;  %v8602_v8 = vld [vmem:[%s11045_s1 + $0xd18] sm:$0xff]  }
 0x167   :  { %6043 = vmatprep.mubr.bf16.mxu1 %v6735_v11  ;;  %v8579_v41 = vld [vmem:[%s11045_s1 + $0xc88] sm:$0xff]   ;;  %v8605_v11 = vld [vmem:[%s11045_s1 + $0xdd0] sm:$0xff]  }
 0x168   :  { %7832 = vmatpush3.bf16.msra.mxu0 %v8526_v42  ;;  %v8580_v42 = vld [vmem:[%s11045_s1 + $0xc40] sm:$0xff]  }
 0x169   :  { %7854 = vmatpush3.bf16.msra.mxu1 %v8527_v43  ;;  %7833 = vmatprep.subr.bf16.mxu0 %v8528_v44  ;;  %v8581_v43 = vld [vmem:[%s11045_s1 + $0xcc0] sm:$0xff]  }
 0x16a   :  { %7855 = vmatprep.subr.bf16.mxu1 %v8529_v45  ;;  %v8582_v44 = vld [vmem:[%s11045_s1 + $0xc00] sm:$0xff]  }
 0x16b   :  { %v8583_v45 = vld [vmem:[%s11045_s1 + $0xc80] sm:$0xff]  }
 0x16c   :  { %7834 = vmatpush3.bf16.msra.mxu0 %v8530_v46  ;;  %v45_v46 = vld [vmem:[%s11046_s0 + $0xc0] sm:$0xff] }
 0x16d   :  { %7856 = vmatpush3.bf16.msra.mxu1 %v8531_v47  ;;  %7835 = vmatprep.subr.bf16.mxu0 %v8532_v48  ;;  %v81_v47 = vld [vmem:[%s11046_s0 + $0x1e0] sm:$0xff] }
 0x16e   :  { %7857 = vmatprep.subr.bf16.mxu1 %v8533_v49  ;;  %v6736_v48 = vcombine.low %v45_v46, %v81_v47  ;;  %v6737_v49 = vcombine.high %v45_v46, %v81_v47  ;;  %v8630_v46 = vld [vmem:[%s11045_s1 + $0xe20] sm:$0xff]  }
 0x16f   :  { %v8631_v47 = vld [vmem:[%s11045_s1 + $0xea0] sm:$0xff]  }
 0x170   :  { %7836 = vmatpush3.bf16.msra.mxu0 %v8534_v50  ;;  %v46_v50 = vld [vmem:[%s11046_s0 + $0xc8] sm:$0xff] }
 0x171   :  { %7858 = vmatpush3.bf16.msra.mxu1 %v8535_v51  ;;  %7837 = vmatprep.subr.bf16.mxu0 %v8536_v52  ;;  %v82_v51 = vld [vmem:[%s11046_s0 + $0x1e8] sm:$0xff] }
 0x172   :  { %7859 = vmatprep.subr.bf16.mxu1 %v8537_v53  ;;  %v6738_v52 = vcombine.low %v46_v50, %v82_v51  ;;  %v6739_v53 = vcombine.high %v46_v50, %v82_v51  ;;  %v8634_v50 = vld [vmem:[%s11045_s1 + $0xe18] sm:$0xff]  }
 0x173   :  { %v8635_v51 = vld [vmem:[%s11045_s1 + $0xe98] sm:$0xff]  }
 0x174   :  { %7838 = vmatpush3.bf16.msra.mxu0 %v8538_v54  ;;  %v8584_v54 = vld [vmem:[%s11045_s1 + $0xd78] sm:$0xff]  }
 0x175   :  { %7860 = vmatpush3.bf16.msra.mxu1 %v8539_v55  ;;  %7839 = vmatprep.subr.bf16.mxu0 %v8540_v56  ;;  %v8585_v55 = vld [vmem:[%s11045_s1 + $0xdf8] sm:$0xff]  }
 0x176   :  { %7861 = vmatprep.subr.bf16.mxu1 %v8541_v57  ;;  %v8586_v56 = vld [vmem:[%s11045_s1 + $0xd38] sm:$0xff]  }
 0x177   :  { %v8587_v57 = vld [vmem:[%s11045_s1 + $0xdb8] sm:$0xff]  }
 0x178   :  { %7840 = vmatpush3.bf16.msra.mxu0 %v8542_v58  ;;  %v8588_v58 = vld [vmem:[%s11045_s1 + $0xd70] sm:$0xff]  }
 0x179   :  { %7862 = vmatpush3.bf16.msra.mxu1 %v8543_v59  ;;  %7841 = vmatprep.subr.bf16.mxu0 %v8544_v60  ;;  %v8589_v59 = vld [vmem:[%s11045_s1 + $0xdf0] sm:$0xff]  }
 0x17a   :  { %7863 = vmatprep.subr.bf16.mxu1 %v8545_v61  ;;  %v8590_v60 = vld [vmem:[%s11045_s1 + $0xd30] sm:$0xff]  }
 0x17b   :  { %v8591_v61 = vld [vmem:[%s11045_s1 + $0xdb0] sm:$0xff]  }
 0x17c   :  { %7842 = vmatpush3.bf16.msra.mxu0 %v8546_v62  ;;  %v8592_v62 = vld [vmem:[%s11045_s1 + $0xd68] sm:$0xff]  }
 0x17d   :  { %7864 = vmatpush3.bf16.msra.mxu1 %v8547_v63  ;;  %7843 = vmatprep.subr.bf16.mxu0 %v8548_v0  ;;  %v8593_v63 = vld [vmem:[%s11045_s1 + $0xde8] sm:$0xff]  }
 0x17e   :  { %7865 = vmatprep.subr.bf16.mxu1 %v8549_v1  ;;  %v8594_v0 = vld [vmem:[%s11045_s1 + $0xd28] sm:$0xff]  }
 0x17f   :  { %v8595_v1 = vld [vmem:[%s11045_s1 + $0xda8] sm:$0xff]  }
 0x180   :  { %7844 = vmatpush3.bf16.msra.mxu0 %v8550_v2  ;;  %v8596_v2 = vld [vmem:[%s11045_s1 + $0xd60] sm:$0xff]  }
 0x181   :  { %7866 = vmatpush3.bf16.msra.mxu1 %v8551_v3  ;;  %7873 = vmatprep.subr.bf16.mxu0 %v8552_v12  ;;  %v8597_v3 = vld [vmem:[%s11045_s1 + $0xde0] sm:$0xff]   ;;  %v8606_v12 = vld [vmem:[%s11045_s1 + $0xd10] sm:$0xff]  }
 0x182   :  { %7895 = vmatprep.subr.bf16.mxu1 %v8553_v13  ;;  %v8607_v13 = vld [vmem:[%s11045_s1 + $0xd90] sm:$0xff]  }
 0x183   :  { %6003 = vmatmul.mubr.bf16.vlgmr.msra.gmra.mxu0 %v6732_v7  ;;  %v8601_v7 = vld [vmem:[%s11045_s1 + $0xdd8] sm:$0xff]  }
 0x184   :  { %6044 = vmatmul.mubr.bf16.vlgmr.msra.gmra.mxu1 %v6734_v10  ;;  %7874 = vmatpush3.bf16.msra.mxu0 %v8554_v14  ;;  %v8604_v10 = vld [vmem:[%s11045_s1 + $0xd50] sm:$0xff]   ;;  %v8608_v14 = vld [vmem:[%s11045_s1 + $0xd48] sm:$0xff]  }
 0x185   :  { %7896 = vmatpush3.bf16.msra.mxu1 %v8555_v15  ;;  %7875 = vmatprep.subr.bf16.mxu0 %v8556_v16  ;;  %v8609_v15 = vld [vmem:[%s11045_s1 + $0xdc8] sm:$0xff]  }
 0x186   :  { %7897 = vmatprep.subr.bf16.mxu1 %v8557_v17  ;;  %6084 = vmatprep.mubr.bf16.mxu0 %v6737_v49  ;;  %v8610_v16 = vld [vmem:[%s11045_s1 + $0xd08] sm:$0xff]   ;;  %v8633_v49 = vld [vmem:[%s11045_s1 + $0xed8] sm:$0xff]  }
 0x187   :  { %6125 = vmatprep.mubr.bf16.mxu1 %v6739_v53  ;;  %v8611_v17 = vld [vmem:[%s11045_s1 + $0xd88] sm:$0xff]   ;;  %v8637_v53 = vld [vmem:[%s11045_s1 + $0xed0] sm:$0xff]  }
 0x188   :  { %7876 = vmatpush3.bf16.msra.mxu0 %v8558_v19  ;;  %v8612_v19 = vld [vmem:[%s11045_s1 + $0xd40] sm:$0xff]  }
 0x189   :  { %7898 = vmatpush3.bf16.msra.mxu1 %v8559_v20  ;;  %7877 = vmatprep.subr.bf16.mxu0 %v8560_v21  ;;  %v8613_v20 = vld [vmem:[%s11045_s1 + $0xdc0] sm:$0xff]  }
 0x18a   :  { %7899 = vmatprep.subr.bf16.mxu1 %v8561_v22  ;;  %v8614_v21 = vld [vmem:[%s11045_s1 + $0xd00] sm:$0xff]  }
 0x18b   :  { %v8615_v22 = vld [vmem:[%s11045_s1 + $0xd80] sm:$0xff]  }
 0x18c   :  { %7878 = vmatpush3.bf16.msra.mxu0 %v8562_v23  ;;  %v47_v23 = vld [vmem:[%s11046_s0 + $0xd0] sm:$0xff] }
 0x18d   :  { %7900 = vmatpush3.bf16.msra.mxu1 %v8563_v24  ;;  %7879 = vmatprep.subr.bf16.mxu0 %v8564_v25  ;;  %v83_v24 = vld [vmem:[%s11046_s0 + $0x1f0] sm:$0xff]  ;;  %v48_v25 = vld [vmem:[%s11046_s0 + $0xd8] sm:$0xff] }
 0x18e   :  { %7901 = vmatprep.subr.bf16.mxu1 %v8565_v26  ;;  %v84_v26 = vld [vmem:[%s11046_s0 + $0x1f8] sm:$0xff] }
 0x190   :  { %7880 = vmatpush3.bf16.msra.mxu0 %v8566_v27  ;;  %v6740_v27 = vcombine.low %v47_v23, %v83_v24 }
 0x191   :  { %7902 = vmatpush3.bf16.msra.mxu1 %v8567_v28  ;;  %7881 = vmatprep.subr.bf16.mxu0 %v8568_v29  ;;  %v6741_v28 = vcombine.high %v47_v23, %v83_v24  ;;  %v6742_v29 = vcombine.low %v48_v25, %v84_v26  ;;  %v8662_v23 = vld [vmem:[%s11045_s1 + $0xf20] sm:$0xff]  }
 0x192   :  { %7903 = vmatprep.subr.bf16.mxu1 %v8569_v30  ;;  %v6743_v30 = vcombine.high %v48_v25, %v84_v26  ;;  %v8663_v24 = vld [vmem:[%s11045_s1 + $0xfa0] sm:$0xff]   ;;  %v8664_v25 = vld [vmem:[%s11045_s1 + $0xf58] sm:$0xff]  }
 0x193   :  { %v8665_v26 = vld [vmem:[%s11045_s1 + $0xfd8] sm:$0xff]  }
 0x194   :  { %7882 = vmatpush3.bf16.msra.mxu0 %v8570_v31  ;;  %v8616_v31 = vld [vmem:[%s11045_s1 + $0xe78] sm:$0xff]  }
 0x195   :  { %7904 = vmatpush3.bf16.msra.mxu1 %v8571_v32  ;;  %7883 = vmatprep.subr.bf16.mxu0 %v8572_v33  ;;  %v8617_v32 = vld [vmem:[%s11045_s1 + $0xef8] sm:$0xff]  }
 0x196   :  { %7905 = vmatprep.subr.bf16.mxu1 %v8573_v34  ;;  %v8618_v33 = vld [vmem:[%s11045_s1 + $0xe38] sm:$0xff]  }
 0x197   :  { %v8619_v34 = vld [vmem:[%s11045_s1 + $0xeb8] sm:$0xff]  }
 0x198   :  { %7884 = vmatpush3.bf16.msra.mxu0 %v8574_v35  ;;  %v8620_v35 = vld [vmem:[%s11045_s1 + $0xe70] sm:$0xff]  }
 0x199   :  { %7906 = vmatpush3.bf16.msra.mxu1 %v8575_v36  ;;  %7885 = vmatprep.subr.bf16.mxu0 %v8576_v37  ;;  %v8621_v36 = vld [vmem:[%s11045_s1 + $0xef0] sm:$0xff]  }
 0x19a   :  { %7907 = vmatprep.subr.bf16.mxu1 %v8577_v39  ;;  %v8622_v37 = vld [vmem:[%s11045_s1 + $0xe30] sm:$0xff]  }
 0x19b   :  { %v8623_v39 = vld [vmem:[%s11045_s1 + $0xeb0] sm:$0xff]  }
 0x19c   :  { %7886 = vmatpush3.bf16.msra.mxu0 %v8578_v40  ;;  %v8624_v40 = vld [vmem:[%s11045_s1 + $0xe68] sm:$0xff]  }
 0x19d   :  { %7908 = vmatpush3.bf16.msra.mxu1 %v8579_v41  ;;  %7887 = vmatprep.subr.bf16.mxu0 %v8580_v42  ;;  %v8625_v41 = vld [vmem:[%s11045_s1 + $0xee8] sm:$0xff]  }
 0x19e   :  { %7909 = vmatprep.subr.bf16.mxu1 %v8581_v43  ;;  %v8626_v42 = vld [vmem:[%s11045_s1 + $0xe28] sm:$0xff]  }
 0x19f   :  { %v8627_v43 = vld [vmem:[%s11045_s1 + $0xea8] sm:$0xff]  }
 0x1a0   :  { %7888 = vmatpush3.bf16.msra.mxu0 %v8582_v44  ;;  %v8628_v44 = vld [vmem:[%s11045_s1 + $0xe60] sm:$0xff]  }
 0x1a1   :  { %7910 = vmatpush3.bf16.msra.mxu1 %v8583_v45  ;;  %7917 = vmatprep.subr.bf16.mxu0 %v8584_v54  ;;  %v8629_v45 = vld [vmem:[%s11045_s1 + $0xee0] sm:$0xff]   ;;  %v8638_v54 = vld [vmem:[%s11045_s1 + $0xe10] sm:$0xff]  }
 0x1a2   :  { %7939 = vmatprep.subr.bf16.mxu1 %v8585_v55  ;;  %v8639_v55 = vld [vmem:[%s11045_s1 + $0xe90] sm:$0xff]  }
 0x1a3   :  { %6085 = vmatmul.mubr.bf16.vlgmr.msra.gmra.mxu0 %v6736_v48  ;;  %v8632_v48 = vld [vmem:[%s11045_s1 + $0xe58] sm:$0xff]  }
 0x1a4   :  { %6126 = vmatmul.mubr.bf16.vlgmr.msra.gmra.mxu1 %v6738_v52  ;;  %7918 = vmatpush3.bf16.msra.mxu0 %v8586_v56  ;;  %v8636_v52 = vld [vmem:[%s11045_s1 + $0xe50] sm:$0xff]   ;;  %v8640_v56 = vld [vmem:[%s11045_s1 + $0xe48] sm:$0xff]  }
 0x1a5   :  { %7940 = vmatpush3.bf16.msra.mxu1 %v8587_v57  ;;  %7919 = vmatprep.subr.bf16.mxu0 %v8588_v58  ;;  %v8641_v57 = vld [vmem:[%s11045_s1 + $0xec8] sm:$0xff]  }
 0x1a6   :  { %7941 = vmatprep.subr.bf16.mxu1 %v8589_v59  ;;  %6166 = vmatprep.mubr.bf16.mxu0 %v6741_v28  ;;  %v8642_v58 = vld [vmem:[%s11045_s1 + $0xe08] sm:$0xff]   ;;  %v8667_v28 = vld [vmem:[%s11045_s1 + $0xf98] sm:$0xff]  }
 0x1a7   :  { %6207 = vmatprep.mubr.bf16.mxu1 %v6743_v30  ;;  %v8643_v59 = vld [vmem:[%s11045_s1 + $0xe88] sm:$0xff]   ;;  %v8669_v30 = vld [vmem:[%s11045_s1 + $0xfd0] sm:$0xff]  }
 0x1a8   :  { %7920 = vmatpush3.bf16.msra.mxu0 %v8590_v60  ;;  %v8644_v60 = vld [vmem:[%s11045_s1 + $0xe40] sm:$0xff]  }
 0x1a9   :  { %7942 = vmatpush3.bf16.msra.mxu1 %v8591_v61  ;;  %7921 = vmatprep.subr.bf16.mxu0 %v8592_v62  ;;  %v8645_v61 = vld [vmem:[%s11045_s1 + $0xec0] sm:$0xff]  }
 0x1aa   :  { %7943 = vmatprep.subr.bf16.mxu1 %v8593_v63  ;;  %v8646_v62 = vld [vmem:[%s11045_s1 + $0xe00] sm:$0xff]  }
 0x1ab   :  { %v8647_v63 = vld [vmem:[%s11045_s1 + $0xe80] sm:$0xff]  }
 0x1ac   :  { %7922 = vmatpush3.bf16.msra.mxu0 %v8594_v0  ;;  %v49_v0 = vld [vmem:[%s11046_s0 + $0xe0] sm:$0xff] }
 0x1ad   :  { %7944 = vmatpush3.bf16.msra.mxu1 %v8595_v1  ;;  %7923 = vmatprep.subr.bf16.mxu0 %v8596_v2  ;;  %v85_v1 = vld [vmem:[%s11046_s0 + $0x200] sm:$0xff]  ;;  %v50_v2 = vld [vmem:[%s11046_s0 + $0xe8] sm:$0xff] }
 0x1ae   :  { %7945 = vmatprep.subr.bf16.mxu1 %v8597_v3  ;;  %v6744_v3 = vcombine.low %v49_v0, %v85_v1 }
 0x1b0   :  { %7924 = vmatpush3.bf16.msra.mxu0 %v8598_v4  ;;  %v6745_v4 = vcombine.high %v49_v0, %v85_v1  ;;  %v8694_v0 = vld [vmem:[%s11045_s1 + $0x1020] sm:$0xff]  }
 0x1b1   :  { %7946 = vmatpush3.bf16.msra.mxu1 %v8599_v5  ;;  %7925 = vmatprep.subr.bf16.mxu0 %v8600_v6  ;;  %v86_v5 = vld [vmem:[%s11046_s0 + $0x208] sm:$0xff]  ;;  %v8695_v1 = vld [vmem:[%s11045_s1 + $0x10a0] sm:$0xff]  }
 0x1b2   :  { %7947 = vmatprep.subr.bf16.mxu1 %v8601_v7  ;;  %v6746_v6 = vcombine.low %v50_v2, %v86_v5  ;;  %v6747_v7 = vcombine.high %v50_v2, %v86_v5  ;;  %v8696_v2 = vld [vmem:[%s11045_s1 + $0x1058] sm:$0xff]  }
 0x1b3   :  { %v8699_v5 = vld [vmem:[%s11045_s1 + $0x1098] sm:$0xff]  }
 0x1b4   :  { %7926 = vmatpush3.bf16.msra.mxu0 %v8602_v8  ;;  %v8648_v8 = vld [vmem:[%s11045_s1 + $0xf78] sm:$0xff]  }
 0x1b5   :  { %7948 = vmatpush3.bf16.msra.mxu1 %v8603_v9  ;;  %7927 = vmatprep.subr.bf16.mxu0 %v8604_v10  ;;  %v8649_v9 = vld [vmem:[%s11045_s1 + $0xff8] sm:$0xff]  }
 0x1b6   :  { %7949 = vmatprep.subr.bf16.mxu1 %v8605_v11  ;;  %v8650_v10 = vld [vmem:[%s11045_s1 + $0xf38] sm:$0xff]  }
 0x1b7   :  { %v8651_v11 = vld [vmem:[%s11045_s1 + $0xfb8] sm:$0xff]  }
 0x1b8   :  { %7928 = vmatpush3.bf16.msra.mxu0 %v8606_v12  ;;  %v8652_v12 = vld [vmem:[%s11045_s1 + $0xf70] sm:$0xff]  }
 0x1b9   :  { %7950 = vmatpush3.bf16.msra.mxu1 %v8607_v13  ;;  %7929 = vmatprep.subr.bf16.mxu0 %v8608_v14  ;;  %v8653_v13 = vld [vmem:[%s11045_s1 + $0xff0] sm:$0xff]  }
 0x1ba   :  { %7951 = vmatprep.subr.bf16.mxu1 %v8609_v15  ;;  %v8654_v14 = vld [vmem:[%s11045_s1 + $0xf30] sm:$0xff]  }
 0x1bb   :  { %v8655_v15 = vld [vmem:[%s11045_s1 + $0xfb0] sm:$0xff]  }
 0x1bc   :  { %7930 = vmatpush3.bf16.msra.mxu0 %v8610_v16  ;;  %v8656_v16 = vld [vmem:[%s11045_s1 + $0xf68] sm:$0xff]  }
 0x1bd   :  { %7952 = vmatpush3.bf16.msra.mxu1 %v8611_v17  ;;  %7931 = vmatprep.subr.bf16.mxu0 %v8612_v19  ;;  %v8657_v17 = vld [vmem:[%s11045_s1 + $0xfe8] sm:$0xff]  }
 0x1be   :  { %7953 = vmatprep.subr.bf16.mxu1 %v8613_v20  ;;  %v8658_v19 = vld [vmem:[%s11045_s1 + $0xf28] sm:$0xff]  }
 0x1bf   :  { %v8659_v20 = vld [vmem:[%s11045_s1 + $0xfa8] sm:$0xff]  }
 0x1c0   :  { %7932 = vmatpush3.bf16.msra.mxu0 %v8614_v21  ;;  %v8660_v21 = vld [vmem:[%s11045_s1 + $0xf60] sm:$0xff]  }
 0x1c1   :  { %7954 = vmatpush3.bf16.msra.mxu1 %v8615_v22  ;;  %7961 = vmatprep.subr.bf16.mxu0 %v8616_v31  ;;  %v8661_v22 = vld [vmem:[%s11045_s1 + $0xfe0] sm:$0xff]   ;;  %v8670_v31 = vld [vmem:[%s11045_s1 + $0xf10] sm:$0xff]  }
 0x1c2   :  { %7983 = vmatprep.subr.bf16.mxu1 %v8617_v32  ;;  %v8671_v32 = vld [vmem:[%s11045_s1 + $0xf90] sm:$0xff]  }
 0x1c3   :  { %6167 = vmatmul.mubr.bf16.vlgmr.msra.gmra.mxu0 %v6740_v27  ;;  %v8666_v27 = vld [vmem:[%s11045_s1 + $0xf18] sm:$0xff]  }
 0x1c4   :  { %6208 = vmatmul.mubr.bf16.vlgmr.msra.gmra.mxu1 %v6742_v29  ;;  %7962 = vmatpush3.bf16.msra.mxu0 %v8618_v33  ;;  %v8668_v29 = vld [vmem:[%s11045_s1 + $0xf50] sm:$0xff]   ;;  %v8672_v33 = vld [vmem:[%s11045_s1 + $0xf48] sm:$0xff]  }
 0x1c5   :  { %7984 = vmatpush3.bf16.msra.mxu1 %v8619_v34  ;;  %7963 = vmatprep.subr.bf16.mxu0 %v8620_v35  ;;  %v8673_v34 = vld [vmem:[%s11045_s1 + $0xfc8] sm:$0xff]  }
 0x1c6   :  { %7985 = vmatprep.subr.bf16.mxu1 %v8621_v36  ;;  %6248 = vmatprep.mubr.bf16.mxu0 %v6745_v4  ;;  %v8674_v35 = vld [vmem:[%s11045_s1 + $0xf08] sm:$0xff]   ;;  %v8698_v4 = vld [vmem:[%s11045_s1 + $0x1018] sm:$0xff]  }
 0x1c7   :  { %6289 = vmatprep.mubr.bf16.mxu1 %v6747_v7  ;;  %v8675_v36 = vld [vmem:[%s11045_s1 + $0xf88] sm:$0xff]   ;;  %v8701_v7 = vld [vmem:[%s11045_s1 + $0x10d0] sm:$0xff]  }
 0x1c8   :  { %7964 = vmatpush3.bf16.msra.mxu0 %v8622_v37  ;;  %v8676_v37 = vld [vmem:[%s11045_s1 + $0xf40] sm:$0xff]  }
 0x1c9   :  { %7986 = vmatpush3.bf16.msra.mxu1 %v8623_v39  ;;  %7965 = vmatprep.subr.bf16.mxu0 %v8624_v40  ;;  %v8677_v39 = vld [vmem:[%s11045_s1 + $0xfc0] sm:$0xff]  }
 0x1ca   :  { %7987 = vmatprep.subr.bf16.mxu1 %v8625_v41  ;;  %v8678_v40 = vld [vmem:[%s11045_s1 + $0xf00] sm:$0xff]  }
 0x1cb   :  { %v8679_v41 = vld [vmem:[%s11045_s1 + $0xf80] sm:$0xff]  }
 0x1cc   :  { %7966 = vmatpush3.bf16.msra.mxu0 %v8626_v42  ;;  %v51_v42 = vld [vmem:[%s11046_s0 + $0xf0] sm:$0xff] }
 0x1cd   :  { %7988 = vmatpush3.bf16.msra.mxu1 %v8627_v43  ;;  %7967 = vmatprep.subr.bf16.mxu0 %v8628_v44  ;;  %v87_v43 = vld [vmem:[%s11046_s0 + $0x210] sm:$0xff] }
 0x1ce   :  { %7989 = vmatprep.subr.bf16.mxu1 %v8629_v45  ;;  %v6748_v44 = vcombine.low %v51_v42, %v87_v43  ;;  %v6749_v45 = vcombine.high %v51_v42, %v87_v43  ;;  %v8726_v42 = vld [vmem:[%s11045_s1 + $0x1120] sm:$0xff]  }
 0x1cf   :  { %v8727_v43 = vld [vmem:[%s11045_s1 + $0x11a0] sm:$0xff]  }
 0x1d0   :  { %7968 = vmatpush3.bf16.msra.mxu0 %v8630_v46  ;;  %v52_v46 = vld [vmem:[%s11046_s0 + $0xf8] sm:$0xff] }
 0x1d1   :  { %7990 = vmatpush3.bf16.msra.mxu1 %v8631_v47  ;;  %7969 = vmatprep.subr.bf16.mxu0 %v8632_v48  ;;  %v88_v47 = vld [vmem:[%s11046_s0 + $0x218] sm:$0xff] }
 0x1d2   :  { %7991 = vmatprep.subr.bf16.mxu1 %v8633_v49  ;;  %v6750_v48 = vcombine.low %v52_v46, %v88_v47  ;;  %v6751_v49 = vcombine.high %v52_v46, %v88_v47  ;;  %v8730_v46 = vld [vmem:[%s11045_s1 + $0x1118] sm:$0xff]  }
 0x1d3   :  { %v8731_v47 = vld [vmem:[%s11045_s1 + $0x1198] sm:$0xff]  }
 0x1d4   :  { %7970 = vmatpush3.bf16.msra.mxu0 %v8634_v50  ;;  %v8680_v50 = vld [vmem:[%s11045_s1 + $0x1078] sm:$0xff]  }
 0x1d5   :  { %7992 = vmatpush3.bf16.msra.mxu1 %v8635_v51  ;;  %7971 = vmatprep.subr.bf16.mxu0 %v8636_v52  ;;  %v8681_v51 = vld [vmem:[%s11045_s1 + $0x10f8] sm:$0xff]  }
 0x1d6   :  { %7993 = vmatprep.subr.bf16.mxu1 %v8637_v53  ;;  %v8682_v52 = vld [vmem:[%s11045_s1 + $0x1038] sm:$0xff]  }
 0x1d7   :  { %v8683_v53 = vld [vmem:[%s11045_s1 + $0x10b8] sm:$0xff]  }
 0x1d8   :  { %7972 = vmatpush3.bf16.msra.mxu0 %v8638_v54  ;;  %v8684_v54 = vld [vmem:[%s11045_s1 + $0x1070] sm:$0xff]  }
 0x1d9   :  { %7994 = vmatpush3.bf16.msra.mxu1 %v8639_v55  ;;  %7973 = vmatprep.subr.bf16.mxu0 %v8640_v56  ;;  %v8685_v55 = vld [vmem:[%s11045_s1 + $0x10f0] sm:$0xff]  }
 0x1da   :  { %7995 = vmatprep.subr.bf16.mxu1 %v8641_v57  ;;  %v8686_v56 = vld [vmem:[%s11045_s1 + $0x1030] sm:$0xff]  }
 0x1db   :  { %v8687_v57 = vld [vmem:[%s11045_s1 + $0x10b0] sm:$0xff]  }
 0x1dc   :  { %7974 = vmatpush3.bf16.msra.mxu0 %v8642_v58  ;;  %v8688_v58 = vld [vmem:[%s11045_s1 + $0x1068] sm:$0xff]  }
 0x1dd   :  { %7996 = vmatpush3.bf16.msra.mxu1 %v8643_v59  ;;  %7975 = vmatprep.subr.bf16.mxu0 %v8644_v60  ;;  %v8689_v59 = vld [vmem:[%s11045_s1 + $0x10e8] sm:$0xff]  }
 0x1de   :  { %7997 = vmatprep.subr.bf16.mxu1 %v8645_v61  ;;  %v8690_v60 = vld [vmem:[%s11045_s1 + $0x1028] sm:$0xff]  }
 0x1df   :  { %v8691_v61 = vld [vmem:[%s11045_s1 + $0x10a8] sm:$0xff]  }
 0x1e0   :  { %7976 = vmatpush3.bf16.msra.mxu0 %v8646_v62  ;;  %v8692_v62 = vld [vmem:[%s11045_s1 + $0x1060] sm:$0xff]  }
 0x1e1   :  { %7998 = vmatpush3.bf16.msra.mxu1 %v8647_v63  ;;  %8005 = vmatprep.subr.bf16.mxu0 %v8648_v8  ;;  %v8693_v63 = vld [vmem:[%s11045_s1 + $0x10e0] sm:$0xff]   ;;  %v8702_v8 = vld [vmem:[%s11045_s1 + $0x1010] sm:$0xff]  }
 0x1e2   :  { %8027 = vmatprep.subr.bf16.mxu1 %v8649_v9  ;;  %v8703_v9 = vld [vmem:[%s11045_s1 + $0x1090] sm:$0xff]  }
 0x1e3   :  { %6249 = vmatmul.mubr.bf16.vlgmr.msra.gmra.mxu0 %v6744_v3  ;;  %v8697_v3 = vld [vmem:[%s11045_s1 + $0x10d8] sm:$0xff]  }
 0x1e4   :  { %6290 = vmatmul.mubr.bf16.vlgmr.msra.gmra.mxu1 %v6746_v6  ;;  %8006 = vmatpush3.bf16.msra.mxu0 %v8650_v10  ;;  %v8700_v6 = vld [vmem:[%s11045_s1 + $0x1050] sm:$0xff]   ;;  %v8704_v10 = vld [vmem:[%s11045_s1 + $0x1048] sm:$0xff]  }
 0x1e5   :  { %8028 = vmatpush3.bf16.msra.mxu1 %v8651_v11  ;;  %8007 = vmatprep.subr.bf16.mxu0 %v8652_v12  ;;  %v8705_v11 = vld [vmem:[%s11045_s1 + $0x10c8] sm:$0xff]  }
 0x1e6   :  { %8029 = vmatprep.subr.bf16.mxu1 %v8653_v13  ;;  %6330 = vmatprep.mubr.bf16.mxu0 %v6749_v45  ;;  %v8706_v12 = vld [vmem:[%s11045_s1 + $0x1008] sm:$0xff]   ;;  %v8729_v45 = vld [vmem:[%s11045_s1 + $0x11d8] sm:$0xff]  }
 0x1e7   :  { %6371 = vmatprep.mubr.bf16.mxu1 %v6751_v49  ;;  %v8707_v13 = vld [vmem:[%s11045_s1 + $0x1088] sm:$0xff]   ;;  %v8733_v49 = vld [vmem:[%s11045_s1 + $0x11d0] sm:$0xff]  }
 0x1e8   :  { %8008 = vmatpush3.bf16.msra.mxu0 %v8654_v14  ;;  %v8708_v14 = vld [vmem:[%s11045_s1 + $0x1040] sm:$0xff]  }
 0x1e9   :  { %8030 = vmatpush3.bf16.msra.mxu1 %v8655_v15  ;;  %8009 = vmatprep.subr.bf16.mxu0 %v8656_v16  ;;  %v8709_v15 = vld [vmem:[%s11045_s1 + $0x10c0] sm:$0xff]  }
 0x1ea   :  { %8031 = vmatprep.subr.bf16.mxu1 %v8657_v17  ;;  %v8710_v16 = vld [vmem:[%s11045_s1 + $0x1000] sm:$0xff]  }
 0x1eb   :  { %v8711_v17 = vld [vmem:[%s11045_s1 + $0x1080] sm:$0xff]  }
 0x1ec   :  { %8010 = vmatpush3.bf16.msra.mxu0 %v8658_v19  ;;  %v53_v19 = vld [vmem:[%s11046_s0 + $0x100] sm:$0xff] }
 0x1ed   :  { %8032 = vmatpush3.bf16.msra.mxu1 %v8659_v20  ;;  %8011 = vmatprep.subr.bf16.mxu0 %v8660_v21  ;;  %v89_v20 = vld [vmem:[%s11046_s0 + $0x220] sm:$0xff]  ;;  %v54_v21 = vld [vmem:[%s11046_s0 + $0x108] sm:$0xff] }
 0x1ee   :  { %8033 = vmatprep.subr.bf16.mxu1 %v8661_v22  ;;  %v90_v22 = vld [vmem:[%s11046_s0 + $0x228] sm:$0xff] }
 0x1f0   :  { %8012 = vmatpush3.bf16.msra.mxu0 %v8662_v23  ;;  %v6752_v23 = vcombine.low %v53_v19, %v89_v20 }
 0x1f1   :  { %8034 = vmatpush3.bf16.msra.mxu1 %v8663_v24  ;;  %8013 = vmatprep.subr.bf16.mxu0 %v8664_v25  ;;  %v6753_v24 = vcombine.high %v53_v19, %v89_v20  ;;  %v6754_v25 = vcombine.low %v54_v21, %v90_v22 }
 0x1f2   :  { %8035 = vmatprep.subr.bf16.mxu1 %v8665_v26  ;;  %v6755_v26 = vcombine.high %v54_v21, %v90_v22 }
 0x1f4   :  { %8014 = vmatpush3.bf16.msra.mxu0 %v8666_v27  ;;  %v8712_v27 = vld [vmem:[%s11045_s1 + $0x1178] sm:$0xff]  }
 0x1f5   :  { %8036 = vmatpush3.bf16.msra.mxu1 %v8667_v28  ;;  %8015 = vmatprep.subr.bf16.mxu0 %v8668_v29  ;;  %v8713_v28 = vld [vmem:[%s11045_s1 + $0x11f8] sm:$0xff]  }
 0x1f6   :  { %8037 = vmatprep.subr.bf16.mxu1 %v8669_v30  ;;  %v8714_v29 = vld [vmem:[%s11045_s1 + $0x1138] sm:$0xff]  }
 0x1f7   :  { %v8715_v30 = vld [vmem:[%s11045_s1 + $0x11b8] sm:$0xff]  }
 0x1f8   :  { %8016 = vmatpush3.bf16.msra.mxu0 %v8670_v31  ;;  %v8716_v31 = vld [vmem:[%s11045_s1 + $0x1170] sm:$0xff]  }
 0x1f9   :  { %8038 = vmatpush3.bf16.msra.mxu1 %v8671_v32  ;;  %8017 = vmatprep.subr.bf16.mxu0 %v8672_v33  ;;  %v8717_v32 = vld [vmem:[%s11045_s1 + $0x11f0] sm:$0xff]  }
 0x1fa   :  { %8039 = vmatprep.subr.bf16.mxu1 %v8673_v34  ;;  %v8718_v33 = vld [vmem:[%s11045_s1 + $0x1130] sm:$0xff]  }
 0x1fb   :  { %v8719_v34 = vld [vmem:[%s11045_s1 + $0x11b0] sm:$0xff]  }
 0x1fc   :  { %8018 = vmatpush3.bf16.msra.mxu0 %v8674_v35  ;;  %v8720_v35 = vld [vmem:[%s11045_s1 + $0x1168] sm:$0xff]  }
 0x1fd   :  { %8040 = vmatpush3.bf16.msra.mxu1 %v8675_v36  ;;  %8019 = vmatprep.subr.bf16.mxu0 %v8676_v37  ;;  %v8721_v36 = vld [vmem:[%s11045_s1 + $0x11e8] sm:$0xff]  }
 0x1fe   :  { %8041 = vmatprep.subr.bf16.mxu1 %v8677_v39  ;;  %v8722_v37 = vld [vmem:[%s11045_s1 + $0x1128] sm:$0xff]  }
 0x1ff   :  { %v8723_v39 = vld [vmem:[%s11045_s1 + $0x11a8] sm:$0xff]  }
 0x200   :  { %8020 = vmatpush3.bf16.msra.mxu0 %v8678_v40  ;;  %v8724_v40 = vld [vmem:[%s11045_s1 + $0x1160] sm:$0xff]  }
 0x201   :  { %8042 = vmatpush3.bf16.msra.mxu1 %v8679_v41  ;;  %8049 = vmatprep.subr.bf16.mxu0 %v8680_v50  ;;  %v8725_v41 = vld [vmem:[%s11045_s1 + $0x11e0] sm:$0xff]   ;;  %v8734_v50 = vld [vmem:[%s11045_s1 + $0x1110] sm:$0xff]  }
 0x202   :  { %8071 = vmatprep.subr.bf16.mxu1 %v8681_v51  ;;  %v8735_v51 = vld [vmem:[%s11045_s1 + $0x1190] sm:$0xff]  }
 0x203   :  { %6331 = vmatmul.mubr.bf16.vlgmr.msra.gmra.mxu0 %v6748_v44  ;;  %v8728_v44 = vld [vmem:[%s11045_s1 + $0x1158] sm:$0xff]  }
 0x204   :  { %6372 = vmatmul.mubr.bf16.vlgmr.msra.gmra.mxu1 %v6750_v48  ;;  %8050 = vmatpush3.bf16.msra.mxu0 %v8682_v52  ;;  %v8732_v48 = vld [vmem:[%s11045_s1 + $0x1150] sm:$0xff]   ;;  %v10716_v52 = vpop.f32.mrf.mxu0 }
 0x205   :  { %8072 = vmatpush3.bf16.msra.mxu1 %v8683_v53  ;;  %8051 = vmatprep.subr.bf16.mxu0 %v8684_v54  ;;  %v8736_v53 = vld [vmem:[%s11045_s1 + $0x1148] sm:$0xff]  }
 0x206   :  { %8073 = vmatprep.subr.bf16.mxu1 %v8685_v55  ;;  %6412 = vmatprep.mubr.bf16.mxu0 %v6753_v24  ;;  %v8737_v54 = vld [vmem:[%s11045_s1 + $0x11c8] sm:$0xff]  }
 0x207   :  { %6453 = vmatprep.mubr.bf16.mxu1 %v6755_v26  ;;  %v8738_v55 = vld [vmem:[%s11045_s1 + $0x1108] sm:$0xff]  }
 0x208   :  { %8052 = vmatpush3.bf16.msra.mxu0 %v8686_v56  ;;  %v10727_v56 = vpop.f32.mrf.mxu1 }
 0x209   :  { %8074 = vmatpush3.bf16.msra.mxu1 %v8687_v57  ;;  %8053 = vmatprep.subr.bf16.mxu0 %v8688_v58  ;;  %v8739_v57 = vld [vmem:[%s11045_s1 + $0x1188] sm:$0xff]   ;;  %v10732_v58 = vpop.f32.mrf.mxu0 }
 0x20a   :  { %8075 = vmatprep.subr.bf16.mxu1 %v8689_v59  ;;  %v8740_v59 = vld [vmem:[%s11045_s1 + $0x1140] sm:$0xff]  }
 0x20c   :  { %8054 = vmatpush3.bf16.msra.mxu0 %v8690_v60  ;;  %v8741_v60 = vld [vmem:[%s11045_s1 + $0x11c0] sm:$0xff]  }
 0x20d   :  { %8076 = vmatpush3.bf16.msra.mxu1 %v8691_v61  ;;  %8055 = vmatprep.subr.bf16.mxu0 %v8692_v62  ;;  %v10740_v61 = vpop.f32.mrf.mxu0  ;;  %v8742_v62 = vld [vmem:[%s11045_s1 + $0x1100] sm:$0xff]  }
 0x20e   :  { %8077 = vmatprep.subr.bf16.mxu1 %v8693_v63  ;;  %v10745_v63 = vpop.f32.mrf.mxu1 }
 0x210   :  { %8056 = vmatpush3.bf16.msra.mxu0 %v8694_v0  ;;  %v8743_v0 = vld [vmem:[%s11045_s1 + $0x1180] sm:$0xff]  }
 0x211   :  { %8078 = vmatpush3.bf16.msra.mxu1 %v8695_v1  ;;  %8057 = vmatprep.subr.bf16.mxu0 %v8696_v2  ;;  %v55_v1 = vld [vmem:[%s11046_s0 + $0x110] sm:$0xff] }
 0x212   :  { %8079 = vmatprep.subr.bf16.mxu1 %v8697_v3  ;;  %v91_v2 = vld [vmem:[%s11046_s0 + $0x230] sm:$0xff]  ;;  %v56_v3 = vld [vmem:[%s11046_s0 + $0x118] sm:$0xff] }
 0x214   :  { %8058 = vmatpush3.bf16.msra.mxu0 %v8698_v4  ;;  %v10759_v4 = vpop.f32.mrf.mxu1 }
 0x215   :  { %8080 = vmatpush3.bf16.msra.mxu1 %v8699_v5  ;;  %8059 = vmatprep.subr.bf16.mxu0 %v8700_v6  ;;  %v6756_v5 = vcombine.low %v55_v1, %v91_v2  ;;  %v6757_v6 = vcombine.high %v55_v1, %v91_v2 }
 0x216   :  { %8081 = vmatprep.subr.bf16.mxu1 %v8701_v7  ;;  %v92_v7 = vld [vmem:[%s11046_s0 + $0x238] sm:$0xff] }
 0x218   :  { %8060 = vmatpush3.bf16.msra.mxu0 %v8702_v8  ;;  %v10764_v8 = vpop.f32.mrf.mxu0 }
 0x219   :  { %8082 = vmatpush3.bf16.msra.mxu1 %v8703_v9  ;;  %8061 = vmatprep.subr.bf16.mxu0 %v8704_v10  ;;  %v6758_v9 = vcombine.low %v56_v3, %v92_v7  ;;  %v6759_v10 = vcombine.high %v56_v3, %v92_v7  ;;  %v8750_v3 = vld [vmem:[%s11048_s3 + $0x8] sm:$0xff]   ;;  %v8751_v7 = vld [vmem:[%s11048_s3] sm:$0xff]  }
 0x21a   :  { %8083 = vmatprep.subr.bf16.mxu1 %v8705_v11  ;;  %v10766_v11 = vpop.f32.mrf.mxu1 }
 0x21c   :  { %8062 = vmatpush3.bf16.msra.mxu0 %v8706_v12  ;;  %v10768_v12 = vpop.f32.mrf.mxu0 }
 0x21d   :  { %8084 = vmatpush3.bf16.msra.mxu1 %v8707_v13  ;;  %8063 = vmatprep.subr.bf16.mxu0 %v8708_v14  ;;  %v10770_v13 = vpop.f32.mrf.mxu1 }
 0x21e   :  { %8085 = vmatprep.subr.bf16.mxu1 %v8709_v15  ;;  %v10772_v14 = vpop.f32.mrf.mxu0 }
 0x220   :  { %8064 = vmatpush3.bf16.msra.mxu0 %v8710_v16  ;;  %v10774_v15 = vpop.f32.mrf.mxu0  ;;  %v10776_v16 = vpop.f32.mrf.mxu1 }
 0x221   :  { %8086 = vmatpush3.bf16.msra.mxu1 %v8711_v17  ;;  %8093 = vmatprep.subr.bf16.mxu0 %v8712_v27 }
 0x222   :  { %8115 = vmatprep.subr.bf16.mxu1 %v8713_v28  ;;  %v10778_v17 = vpop.f32.mrf.mxu1  ;;  %v10780_v19 = vpop.f32.mrf.mxu0 }
 0x223   :  { %6413 = vmatmul.mubr.bf16.vlgmr.msra.gmra.mxu0 %v6752_v23 }
 0x224   :  { %6454 = vmatmul.mubr.bf16.vlgmr.msra.gmra.mxu1 %v6754_v25  ;;  %8094 = vmatpush3.bf16.msra.mxu0 %v8714_v29  ;;  %v10782_v20 = vpop.f32.mrf.mxu1  ;;  %v10784_v21 = vpop.f32.mrf.mxu0 }
 0x225   :  { %8116 = vmatpush3.bf16.msra.mxu1 %v8715_v30  ;;  %8095 = vmatprep.subr.bf16.mxu0 %v8716_v31 }
 0x226   :  { %8117 = vmatprep.subr.bf16.mxu1 %v8717_v32  ;;  %6494 = vmatprep.mubr.bf16.mxu0 %v6757_v6  ;;  %v10786_v22 = vpop.f32.mrf.mxu1  ;;  %v10788_v23 = vpop.f32.mrf.mxu0 }
 0x227   :  { %6535 = vmatprep.mubr.bf16.mxu1 %v6759_v10 }
 0x228   :  { %8096 = vmatpush3.bf16.msra.mxu0 %v8718_v33  ;;  %v10790_v24 = vpop.f32.mrf.mxu0  ;;  %v10792_v25 = vpop.f32.mrf.mxu1 }
 0x229   :  { %8118 = vmatpush3.bf16.msra.mxu1 %v8719_v34  ;;  %8097 = vmatprep.subr.bf16.mxu0 %v8720_v35 }
 0x22a   :  { %8119 = vmatprep.subr.bf16.mxu1 %v8721_v36  ;;  %v10794_v26 = vpop.f32.mrf.mxu1  ;;  %v10796_v27 = vpop.f32.mrf.mxu0 }
 0x22c   :  { %8098 = vmatpush3.bf16.msra.mxu0 %v8722_v37  ;;  %v10798_v28 = vpop.f32.mrf.mxu1  ;;  %v10800_v29 = vpop.f32.mrf.mxu0  ;;  %v8760_v37 = vmov 0.0  }
 0x22d   :  { %8120 = vmatpush3.bf16.msra.mxu1 %v8723_v39  ;;  %8099 = vmatprep.subr.bf16.mxu0 %v8724_v40  ;;  %v8744_v39 = vld [vmem:[%s11048_s3 + $0x38] sm:$0xff]  }
 0x22e   :  { %8121 = vmatprep.subr.bf16.mxu1 %v8725_v41  ;;  %v10802_v30 = vpop.f32.mrf.mxu1  ;;  %v10804_v31 = vpop.f32.mrf.mxu0  ;;  %v8745_v41 = vld [vmem:[%s11048_s3 + $0x30] sm:$0xff]  }
 0x230   :  { %8100 = vmatpush3.bf16.msra.mxu0 %v8726_v42  ;;  %v10806_v32 = vpop.f32.mrf.mxu0  ;;  %v10808_v33 = vpop.f32.mrf.mxu1 }
 0x231   :  { %8122 = vmatpush3.bf16.msra.mxu1 %v8727_v43  ;;  %8101 = vmatprep.subr.bf16.mxu0 %v8728_v44  ;;  %v8746_v44 = vld [vmem:[%s11048_s3 + $0x28] sm:$0xff]  }
 0x232   :  { %8123 = vmatprep.subr.bf16.mxu1 %v8729_v45  ;;  %v10810_v34 = vpop.f32.mrf.mxu1  ;;  %v10812_v35 = vpop.f32.mrf.mxu0 }
 0x234   :  { %8102 = vmatpush3.bf16.msra.mxu0 %v8730_v46  ;;  %v10814_v36 = vpop.f32.mrf.mxu1  ;;  %v10819_v40 = vpop.f32.mrf.mxu0 }
 0x235   :  { %8124 = vmatpush3.bf16.msra.mxu1 %v8731_v47  ;;  %8103 = vmatprep.subr.bf16.mxu0 %v8732_v48  ;;  %v8747_v48 = vld [vmem:[%s11048_s3 + $0x20] sm:$0xff]  }
 0x236   :  { %8125 = vmatprep.subr.bf16.mxu1 %v8733_v49  ;;  %v10824_v42 = vpop.f32.mrf.mxu1  ;;  %v10826_v43 = vpop.f32.mrf.mxu0 }
 0x238   :  { %8104 = vmatpush3.bf16.msra.mxu0 %v8734_v50  ;;  %v10831_v45 = vpop.f32.mrf.mxu0  ;;  %v10833_v46 = vpop.f32.mrf.mxu1 }
 0x239   :  { %8126 = vmatpush3.bf16.msra.mxu1 %v8735_v51  ;;  %8105 = vmatprep.subr.bf16.mxu0 %v8736_v53 }
 0x23a   :  { %8127 = vmatprep.subr.bf16.mxu1 %v8737_v54  ;;  %v10835_v47 = vpop.f32.mrf.mxu1  ;;  %v10840_v49 = vpop.f32.mrf.mxu0 }
 0x23c   :  { %8106 = vmatpush3.bf16.msra.mxu0 %v8738_v55  ;;  %v10842_v50 = vpop.f32.mrf.mxu1  ;;  %v10844_v51 = vpop.f32.mrf.mxu0 }
 0x23d   :  { %8128 = vmatpush3.bf16.msra.mxu1 %v8739_v57  ;;  %8107 = vmatprep.subr.bf16.mxu0 %v8740_v59  ;;  %v8748_v59 = vld [vmem:[%s11048_s3 + $0x18] sm:$0xff]  }
 0x23e   :  { %8129 = vmatprep.subr.bf16.mxu1 %v8741_v60  ;;  %v10846_v53 = vpop.f32.mrf.mxu1  ;;  %v10848_v54 = vpop.f32.mrf.mxu0 }
 0x240   :  { %8108 = vmatpush3.bf16.msra.mxu0 %v8742_v62  ;;  %v10850_v55 = vpop.f32.mrf.mxu0  ;;  %v10852_v57 = vpop.f32.mrf.mxu1 }
 0x241   :  { %8130 = vmatpush3.bf16.msra.mxu1 %v8743_v0  ;;  %8146 = vmatprep.subr.bf16.mxu0 %v8760_v37  ;;  %v8749_v0 = vld [vmem:[%s11048_s3 + $0x10] sm:$0xff]  }
 0x242   :  { %v10857_v60 = vpop.f32.mrf.mxu1  ;;  %v10859_v62 = vpop.f32.mrf.mxu0 }
 0x243   :  { %6495 = vmatmul.mubr.bf16.vlgmr.msra.gmra.mxu0 %v6756_v5 }
 0x244   :  { %6536 = vmatmul.mubr.bf16.vlgmr.msra.gmra.mxu1 %v6758_v9  ;;  %8147 = vmatpush3.bf16.msra.mxu0 %v8744_v39  ;;  %v10864_v1 = vpop.f32.mrf.mxu1  ;;  %v10866_v2 = vpop.f32.mrf.mxu0 }
 0x245   :  { %8148 = vmatprep.subr.bf16.mxu0 %v8760_v37  ;;  %8162 = vmatprep.mubr.msk.bf16.mxu0 %vm8761_vm0, %v8760_v37 }
 0x246   :  { %v10871_v5 = vpop.f32.mrf.mxu1  ;;  %v10873_v6 = vpop.f32.mrf.mxu0 }
 0x247   :  { %11051 = vst [vmem:[#allocation2_spill] sm:$0xff] %v10871_v5 }
 0x248   :  { %8149 = vmatpush3.bf16.msra.mxu0 %v8745_v41  ;;  %v10878_v9 = vpop.f32.mrf.mxu0  ;;  %v10880_v10 = vpop.f32.mrf.mxu1 }
 0x249   :  { %8150 = vmatprep.subr.bf16.mxu0 %v8760_v37  ;;  %11052 = vst [vmem:[#allocation3_spill] sm:$0xff] %v10880_v10 }
 0x24a   :  { %v10882_v39 = vpop.f32.mrf.mxu1  ;;  %v10884_v41 = vpop.f32.mrf.mxu0 }
 0x24b   :  { %11053 = vst [vmem:[#allocation4_spill] sm:$0xff] %v10882_v39  ;;  %11054 = vst [vmem:[#allocation5_spill] sm:$0xff] %v10884_v41 }
 0x24c   :  { %8151 = vmatpush3.bf16.msra.mxu0 %v8746_v44  ;;  %v10886_v44 = vpop.f32.mrf.mxu1 }
 0x24d   :  { %8152 = vmatprep.subr.bf16.mxu0 %v8760_v37  ;;  %11055 = vst [vmem:[#allocation6_spill] sm:$0xff] %v10886_v44 }
 0x250   :  { %8153 = vmatpush3.bf16.msra.mxu0 %v8747_v48  ;;  %v10888_v48 = vpop.f32.mrf.mxu0 }
 0x251   :  { %8154 = vmatprep.subr.bf16.mxu0 %v8760_v37  ;;  %11056 = vst [vmem:[#allocation7_spill] sm:$0xff] %v10888_v48 }
 0x254   :  { %8155 = vmatpush3.bf16.msra.mxu0 %v8748_v59  ;;  %v10890_v59 = vpop.f32.mrf.mxu1 }
 0x255   :  { %8156 = vmatprep.subr.bf16.mxu0 %v8760_v37  ;;  %11057 = vst [vmem:[#allocation8_spill] sm:$0xff] %v10890_v59  ;;  %v7454_v59 = vadd.f32 %v10732_v58, %v10716_v52  ;;  %v7498_v52 = vadd.f32 %v10772_v14, %v10768_v12 }
 0x256   :  { %v10896_v5 = vpop.f32.mrf.mxu1 }
 0x257   :  { %11059 = vst [vmem:[#allocation10_spill] sm:$0xff] %v10896_v5 }
 0x258   :  { %8157 = vmatpush3.bf16.msra.mxu0 %v8749_v0  ;;  %v10892_v0 = vpop.f32.mrf.mxu0  ;;  %v10898_v10 = vpop.f32.mrf.mxu1 }
 0x259   :  { %8158 = vmatprep.subr.bf16.mxu0 %v8760_v37  ;;  %11060 = vst [vmem:[#allocation11_spill] sm:$0xff] %v10898_v10  ;;  %v7495_v10 = vadd.f32 %v10764_v8, %v10740_v61 }
 0x25c   :  { %8159 = vmatpush3.bf16.msra.mxu0 %v8750_v3  ;;  %v10894_v3 = vpop.f32.mrf.mxu0 }
 0x25d   :  { %8160 = vmatprep.subr.bf16.mxu0 %v8760_v37  ;;  %11058 = vst [vmem:[#allocation9_spill] sm:$0xff] %v10894_v3  ;;  %v10902_v37 = vpop.f32.mrf.mxu1 }
 0x25f   :  { %v10906_v41 = vpop.f32.mrf.mxu1 }
 0x260   :  { %8161 = vmatpush3.bf16.msra.mxu0 %v8751_v7  ;;  %v10900_v7 = vpop.f32.mrf.mxu0  ;;  %11063 = vst [vmem:[#allocation14_spill] sm:$0xff] %v10906_v41  ;;  %v7476_v41 = vadd.f32 %v10745_v63, %v10727_v56 }
 0x261   :  { %11061 = vst [vmem:[#allocation12_spill] sm:$0xff] %v10900_v7  ;;  %v10914_v3 = vpop.f32.mrf.mxu1 }
 0x262   :  { %v10904_v39 = vpop.f32.mrf.mxu0  ;;  %11066 = vst [vmem:[#allocation17_spill] sm:$0xff] %v10914_v3 }
 0x263   :  { %11062 = vst [vmem:[#allocation13_spill] sm:$0xff] %v10904_v39  ;;  %v10918_v5 = vpop.f32.mrf.mxu1  ;;  %v5270_v39 = vadd.f32 %v7454_v59, %v9685_v38 }
 0x264   :  { %v10908_v44 = vpop.f32.mrf.mxu0  ;;  %11067 = vst [vmem:[#allocation18_spill] sm:$0xff] %v10918_v5  ;;  %v7539_v5 = vadd.f32 %v10780_v19, %v10774_v15  ;;  %v7583_v15 = vadd.f32 %v10796_v27, %v10790_v24  ;;  %v7627_v24 = vadd.f32 %v10812_v35, %v10806_v32  ;;  %v7671_v35 = vadd.f32 %v10840_v49, %v10831_v45 }
 0x265   :  { %11064 = vst [vmem:[#allocation15_spill] sm:$0xff] %v10908_v44  ;;  %v5349_v44 = vadd.f32 %v7495_v10, %v9784_v18  ;;  %v10930_v58 = vpop.f32.mrf.mxu1  ;;  %v5311_v8 = vadd.f32 %v7476_v41, %v5270_v39  ;;  %v7520_v18 = vadd.f32 %v10776_v16, %v10770_v13  ;;  %v7564_v16 = vadd.f32 %v10792_v25, %v10786_v22 }
 0x266   :  { %v10910_v48 = vpop.f32.mrf.mxu0  ;;  %v7608_v22 = vadd.f32 %v10808_v33, %v10802_v30  ;;  %v7652_v33 = vadd.f32 %v10833_v46, %v10824_v42  ;;  %v7715_v49 = vadd.f32 %v10859_v62, %v10850_v55  ;;  %v7696_v42 = vadd.f32 %v10852_v57, %v10846_v53  ;;  %v11071_v57 = vld [vmem:[#allocation4_spill] sm:$0xff] }
 0x267   :  { %11065 = vst [vmem:[#allocation16_spill] sm:$0xff] %v10910_v48  ;;  %v7517_v48 = vadd.f32 %v10766_v11, %v10759_v4  ;;  %v5352_v59 = vadd.f32 %v7498_v52, %v5311_v8  ;;  %v10936_v3 = vpop.f32.mrf.mxu1  ;;  %v7561_v4 = vadd.f32 %v10782_v20, %v10778_v17  ;;  %v7542_v11 = vadd.f32 %v10788_v23, %v10784_v21 }
 0x268   :  { %v10920_v7 = vpop.f32.mrf.mxu0  ;;  %v7605_v20 = vadd.f32 %v10798_v28, %v10794_v26  ;;  %v7586_v21 = vadd.f32 %v10804_v31, %v10800_v29  ;;  %v7649_v26 = vadd.f32 %v10814_v36, %v10810_v34  ;;  %v7630_v28 = vadd.f32 %v10826_v43, %v10819_v40 }
 0x269   :  { %v5390_v38 = vadd.f32 %v7517_v48, %v5349_v44  ;;  %v5393_v14 = vadd.f32 %v7520_v18, %v5352_v59  ;;  %v10950_v19 = vpop.f32.mrf.mxu1  ;;  %v7693_v36 = vadd.f32 %v10842_v50, %v10835_v47  ;;  %v7674_v40 = vadd.f32 %v10848_v54, %v10844_v51  ;;  %v11068_v54 = vld [vmem:[#allocation5_spill] sm:$0xff] }
 0x26a   :  { %v10932_v61 = vpop.f32.mrf.mxu0  ;;  %v7737_v47 = vadd.f32 %v10864_v1, %v10857_v60  ;;  %v7718_v50 = vadd.f32 %v10873_v6, %v10866_v2  ;;  %v11073_v60 = vld [vmem:[#allocation7_spill] sm:$0xff] }
 0x26b   :  { %v5431_v63 = vadd.f32 %v7539_v5, %v5390_v38  ;;  %v5434_v39 = vadd.f32 %v7542_v11, %v5393_v14  ;;  %v10952_v41 = vpop.f32.mrf.mxu1  ;;  %v7759_v14 = vadd.f32 %v11068_v54, %v10878_v9  ;;  %v7762_v1 = vadd.f32 %v10892_v0, %v11073_v60  ;;  %v11083_v54 = vld [vmem:[#allocation17_spill] sm:$0xff] }
 0x26c   :  { %v10938_v56 = vpop.f32.mrf.mxu0 }
 0x26d   :  { %v5472_v10 = vadd.f32 %v7561_v4, %v5431_v63  ;;  %v5475_v23 = vadd.f32 %v7564_v16, %v5434_v39  ;;  %v10964_v27 = vpop.f32.mrf.mxu1  ;;  %v11069_v16 = vld [vmem:[#allocation2_spill] sm:$0xff] }
 0x26e   :  { %v10946_v12 = vpop.f32.mrf.mxu0 }
 0x26f   :  { %v5513_v17 = vadd.f32 %v7583_v15, %v5472_v10  ;;  %v5516_v48 = vadd.f32 %v7586_v21, %v5475_v23  ;;  %v10974_v29 = vpop.f32.mrf.mxu1  ;;  %v11072_v21 = vld [vmem:[#allocation6_spill] sm:$0xff] }
 0x270   :  { %v10954_v13 = vpop.f32.mrf.mxu0  ;;  %v7781_v23 = vadd.f32 %v11072_v21, %v11071_v57 }
 0x271   :  { %v5554_v44 = vadd.f32 %v7605_v20, %v5513_v17  ;;  %v5557_v32 = vadd.f32 %v7608_v22, %v5516_v48  ;;  %v10982_v30 = vpop.f32.mrf.mxu1  ;;  %v11070_v17 = vld [vmem:[#allocation3_spill] sm:$0xff] }
 0x272   :  { %v10966_v5 = vpop.f32.mrf.mxu0  ;;  %v7740_v20 = vadd.f32 %v11070_v17, %v11069_v16  ;;  %v7850_v16 = vadd.f32 %v10938_v56, %v10932_v61 }
 0x273   :  { %v5595_v25 = vadd.f32 %v7627_v24, %v5554_v44  ;;  %v5598_v38 = vadd.f32 %v7630_v28, %v5557_v32  ;;  %v11074_v24 = vld [vmem:[#allocation9_spill] sm:$0xff]  ;;  %v11075_v44 = vld [vmem:[#allocation12_spill] sm:$0xff]  ;;  %v11077_v32 = vld [vmem:[#allocation10_spill] sm:$0xff] }
 0x274   :  { %v10976_v31 = vpop.f32.mrf.mxu0  ;;  %v7803_v9 = vadd.f32 %v11075_v44, %v11074_v24  ;;  %v11076_v28 = vld [vmem:[#allocation8_spill] sm:$0xff] }
 0x275   :  { %v5636_v8 = vadd.f32 %v7649_v26, %v5595_v25  ;;  %v5639_v45 = vadd.f32 %v7652_v33, %v5598_v38  ;;  %v11078_v38 = vld [vmem:[#allocation11_spill] sm:$0xff]  ;;  %v7894_v61 = vadd.f32 %v10976_v31, %v10966_v5 }
 0x276   :  { %v7825_v33 = vadd.f32 %v10902_v37, %v11078_v38 }
 0x277   :  { %v5677_v34 = vadd.f32 %v7671_v35, %v5636_v8  ;;  %v5680_v63 = vadd.f32 %v7674_v40, %v5639_v45  ;;  %v7784_v35 = vadd.f32 %v11077_v32, %v11076_v28 }
 0x279   :  { %v5718_v18 = vadd.f32 %v7693_v36, %v5677_v34  ;;  %v5721_v51 = vadd.f32 %v7696_v42, %v5680_v63  ;;  %v11079_v34 = vld [vmem:[#allocation13_spill] sm:$0xff]  ;;  %v11080_v36 = vld [vmem:[#allocation15_spill] sm:$0xff] }
 0x27a   :  { %v7806_v40 = vadd.f32 %v11080_v36, %v11079_v34 }
 0x27b   :  { %v5759_v46 = vadd.f32 %v7715_v49, %v5718_v18  ;;  %v5762_v10 = vadd.f32 %v7718_v50, %v5721_v51  ;;  %v11081_v18 = vld [vmem:[#allocation16_spill] sm:$0xff]  ;;  %v11082_v51 = vld [vmem:[#allocation14_spill] sm:$0xff] }
 0x27c   :  { %v7847_v63 = vadd.f32 %v10920_v7, %v11081_v18 }
 0x27d   :  { %v5800_v62 = vadd.f32 %v7737_v47, %v5759_v46  ;;  %v5803_v6 = vadd.f32 %v7740_v20, %v5762_v10  ;;  %v11084_v10 = vld [vmem:[#allocation18_spill] sm:$0xff] }
 0x27e   :  { %v7869_v37 = vadd.f32 %v10930_v58, %v11084_v10  ;;  %v7913_v58 = vadd.f32 %v10964_v27, %v10952_v41 }
 0x27f   :  { %v5841_v53 = vadd.f32 %v7759_v14, %v5800_v62  ;;  %v5844_v26 = vadd.f32 %v7762_v1, %v5803_v6  ;;  %v7828_v14 = vadd.f32 %v11083_v54, %v11082_v51  ;;  %v7872_v1 = vadd.f32 %v10950_v19, %v10936_v3 }
 0x281   :  { %v5882_v25 = vadd.f32 %v7781_v23, %v5841_v53  ;;  %v5885_v49 = vadd.f32 %v7784_v35, %v5844_v26  ;;  %v7891_v53 = vadd.f32 %v10954_v13, %v10946_v12 }
 0x283   :  { %v10980_v52 = vpop.f32.mrf.mxu0  ;;  %v5923_v8 = vadd.f32 %v7803_v9, %v5882_v25  ;;  %v5926_v46 = vadd.f32 %v7806_v40, %v5885_v49  ;;  %v7916_v25 = vadd.f32 %v10982_v30, %v10974_v29 }
 0x284   :  { %v10990_v43 = vpop.f32.mrf.mxu1 }
 0x285   :  { %v7934_v59 = vpop.f32.mrf.mxu0  ;;  %v5964_v42 = vadd.f32 %v7825_v33, %v5923_v8  ;;  %v5967_v20 = vadd.f32 %v7828_v14, %v5926_v46 }
 0x286   :  { %v7956_v4 = vpop.f32.mrf.mxu1  ;;  %v7935_v24 = vadd.f32 %v7934_v59, %v10980_v52 }
 0x287   :  { %v7936_v11 = vpop.f32.mrf.mxu0  ;;  %v6005_v62 = vadd.f32 %v7847_v63, %v5964_v42  ;;  %v6008_v21 = vadd.f32 %v7850_v16, %v5967_v20  ;;  %v7957_v3 = vadd.f32 %v7956_v4, %v10990_v43 }
 0x288   :  { %v7958_v15 = vpop.f32.mrf.mxu1 }
 0x289   :  { %v7937_v55 = vpop.f32.mrf.mxu0  ;;  %v6046_v57 = vadd.f32 %v7869_v37, %v6005_v62  ;;  %v6049_v56 = vadd.f32 %v7872_v1, %v6008_v21 }
 0x28a   :  { %v7959_v2 = vpop.f32.mrf.mxu1  ;;  %v7938_v19 = vadd.f32 %v7937_v55, %v7936_v11 }
 0x28b   :  { %v6087_v6 = vadd.f32 %v7891_v53, %v6046_v57  ;;  %v6090_v9 = vadd.f32 %v7894_v61, %v6049_v56  ;;  %v7960_v52 = vadd.f32 %v7959_v2, %v7958_v15 }
 0x28d   :  { %v6128_v13 = vadd.f32 %v7913_v58, %v6087_v6  ;;  %v6131_v41 = vadd.f32 %v7916_v25, %v6090_v9  ;;  %v7336_v9 = vld [vmem:[%s11049_s4] ss:$0 sm:$0xff] }
 0x28f   :  { %v6169_v26 = vadd.f32 %v7935_v24, %v6128_v13  ;;  %v6172_v31 = vadd.f32 %v7938_v19, %v6131_v41 }
 0x291   :  { %v6210_v5 = vadd.f32 %v7957_v3, %v6169_v26  ;;  %v6213_v40 = vadd.f32 %v7960_v52, %v6172_v31 }
 0x2a3   :  { %v7977_v39 = vpop.f32.mrf.mxu0 }
 0x2a4   :  { %v7999_v48 = vpop.f32.mrf.mxu1 }
 0x2a5   :  { %v7978_v22 = vpop.f32.mrf.mxu0 }
 0x2a6   :  { %v8000_v0 = vpop.f32.mrf.mxu1  ;;  %v7979_v27 = vadd.f32 %v7978_v22, %v7977_v39 }
 0x2a7   :  { %v7980_v45 = vpop.f32.mrf.mxu0  ;;  %v8001_v38 = vadd.f32 %v8000_v0, %v7999_v48 }
 0x2a8   :  { %v8002_v47 = vpop.f32.mrf.mxu1  ;;  %v6251_v59 = vadd.f32 %v7979_v27, %v6210_v5 }
 0x2a9   :  { %v7981_v50 = vpop.f32.mrf.mxu0 }
 0x2aa   :  { %v8003_v7 = vpop.f32.mrf.mxu1  ;;  %v7982_v33 = vadd.f32 %v7981_v50, %v7980_v45  ;;  %v6292_v30 = vadd.f32 %v8001_v38, %v6251_v59 }
 0x2ab   :  { %v8004_v11 = vadd.f32 %v8003_v7, %v8002_v47 }
 0x2ac   :  { %v6254_v49 = vadd.f32 %v7982_v33, %v6213_v40 }
 0x2ae   :  { %v6295_v22 = vadd.f32 %v8004_v11, %v6254_v49 }
 0x2c3   :  { %v8021_v17 = vpop.f32.mrf.mxu0 }
 0x2c4   :  { %v8043_v23 = vpop.f32.mrf.mxu1 }
 0x2c5   :  { %v8022_v60 = vpop.f32.mrf.mxu0 }
 0x2c6   :  { %v8044_v44 = vpop.f32.mrf.mxu1  ;;  %v8023_v29 = vadd.f32 %v8022_v60, %v8021_v17 }
 0x2c7   :  { %v8024_v12 = vpop.f32.mrf.mxu0  ;;  %v8045_v18 = vadd.f32 %v8044_v44, %v8043_v23 }
 0x2c8   :  { %v8046_v28 = vpop.f32.mrf.mxu1  ;;  %v6333_v55 = vadd.f32 %v8023_v29, %v6292_v30 }
 0x2c9   :  { %v8025_v32 = vpop.f32.mrf.mxu0 }
 0x2ca   :  { %v8047_v8 = vpop.f32.mrf.mxu1  ;;  %v8026_v39 = vadd.f32 %v8025_v32, %v8024_v12  ;;  %v6374_v15 = vadd.f32 %v8045_v18, %v6333_v55 }
 0x2cb   :  { %v8048_v48 = vadd.f32 %v8047_v8, %v8046_v28 }
 0x2cc   :  { %v6336_v2 = vadd.f32 %v8026_v39, %v6295_v22 }
 0x2ce   :  { %v6377_v14 = vadd.f32 %v8048_v48, %v6336_v2 }
 0x2e3   :  { %v8065_v35 = vpop.f32.mrf.mxu0 }
 0x2e4   :  { %v8087_v34 = vpop.f32.mrf.mxu1 }
 0x2e5   :  { %v8066_v36 = vpop.f32.mrf.mxu0 }
 0x2e6   :  { %v8088_v43 = vpop.f32.mrf.mxu1  ;;  %v8067_v63 = vadd.f32 %v8066_v36, %v8065_v35 }
 0x2e7   :  { %v8068_v4 = vpop.f32.mrf.mxu0  ;;  %v8089_v45 = vadd.f32 %v8088_v43, %v8087_v34 }
 0x2e8   :  { %v8090_v42 = vpop.f32.mrf.mxu1  ;;  %v6415_v0 = vadd.f32 %v8067_v63, %v6374_v15 }
 0x2e9   :  { %v8069_v46 = vpop.f32.mrf.mxu0 }
 0x2ea   :  { %v8070_v50 = vadd.f32 %v8069_v46, %v8068_v4  ;;  %v8091_v51 = vpop.f32.mrf.mxu1  ;;  %v6456_v37 = vadd.f32 %v8089_v45, %v6415_v0 }
 0x2eb   :  { %v8092_v53 = vadd.f32 %v8091_v51, %v8090_v42 }
 0x2ec   :  { %v6418_v47 = vadd.f32 %v8070_v50, %v6377_v14 }
 0x2ee   :  { %v6459_v23 = vadd.f32 %v8092_v53, %v6418_v47 }
 0x303   :  { %v8109_v54 = vpop.f32.mrf.mxu0 }
 0x304   :  { %v8131_v62 = vpop.f32.mrf.mxu1 }
 0x305   :  { %v8110_v10 = vpop.f32.mrf.mxu0 }
 0x306   :  { %v8111_v16 = vadd.f32 %v8110_v10, %v8109_v54  ;;  %v8132_v17 = vpop.f32.mrf.mxu1 }
 0x307   :  { %v8112_v20 = vpop.f32.mrf.mxu0  ;;  %v8133_v60 = vadd.f32 %v8132_v17, %v8131_v62 }
 0x308   :  { %v6497_v7 = vadd.f32 %v8111_v16, %v6456_v37  ;;  %v8134_v57 = vpop.f32.mrf.mxu1 }
 0x309   :  { %v8113_v21 = vpop.f32.mrf.mxu0 }
 0x30a   :  { %v8114_v1 = vadd.f32 %v8113_v21, %v8112_v20  ;;  %v8135_v6 = vpop.f32.mrf.mxu1  ;;  %v6538_v58 = vadd.f32 %v8133_v60, %v6497_v7 }
 0x30b   :  { %v8136_v56 = vadd.f32 %v8135_v6, %v8134_v57 }
 0x30c   :  { %v6500_v61 = vadd.f32 %v8114_v1, %v6459_v23  ;;  %v6544_v44 = vmax.f32 %v6538_v58, 0.0 }
 0x30e   :  { %v6541_v24 = vadd.f32 %v8136_v56, %v6500_v61 }
 0x310   :  { %v6545_v12 = vmax.f32 %v6541_v24, 0.0 }
 0x312   :  { %v6546_v13 = vpack.c.bf16 %v6545_v12, %v6544_v44 }
 0x314   :  { %8163 = vmatmul.mubr.bf16.vlgmr.msra.gmra.mxu0 %v6546_v13 }
 0x3d4   :  { %v6652_v25 = vpop.f32.mrf.mxu0 }
 0x3d5   :  { %v6653_v26 = vadd.f32 %v7336_v9, %v6652_v25 }
 0x3d6   :  { %v8164_v3 = vpop.f32.mrf.mxu0 }
 0x3d7   :  { %6659 = vmax.xlane.f32.xlu0 %v6653_v26 }
 0x3d8   :  { %v6655_v19 = vpop.f32.mrf.mxu0 }
 0x3d9   :  { %v6656_v28 = vadd.f32 %v7336_v9, %v6655_v19 }
 0x3da   :  { %v8165_v32 = vpop.f32.mrf.mxu0 }
 0x3db   :  { %6661 = vmax.xlane.f32.xlu0 %v6656_v28 }
 0x460   :  { %v6660_v41 = vpop.xlane.xlu0 %6659 }
 0x461   :  { %v6663_v27 = vsub.f32 %v6653_v26, %v6660_v41 }
 0x463   :  { %v6665_v35 = vmul.f32 1.442695, %v6663_v27 }
 0x464   :  { %v6662_v5 = vpop.xlane.xlu0 %6661 }
 0x465   :  { %8752 = vpow2.f32 %v6665_v35  ;;  %v6664_v31 = vsub.f32 %v6656_v28, %v6662_v5 }
 0x467   :  { %v6667_v8 = vmul.f32 1.442695, %v6664_v31 }
 0x469   :  { %8754 = vpow2.f32 %v6667_v8 }
 0x472   :  { %v8753_v52 = vpop.eup %8752 }
 0x473   :  { %6669 = vadd.xlane.f32.xlu1 %v8753_v52 }
 0x476   :  { %v8755_v59 = vpop.eup %8754 }
 0x477   :  { %6671 = vadd.xlane.f32.xlu1 %v8755_v59 }
 0x4fc   :  { %v6670_v38 = vpop.xlane.xlu1 %6669 }
 0x4fd   :  { %8756 = vlog2.f32 %v6670_v38 }
 0x500   :  { %v6672_v33 = vpop.xlane.xlu1 %6671 }
 0x501   :  { %8758 = vlog2.f32 %v6672_v33 }
 0x50a   :  { %v8757_v34 = vpop.eup %8756 }
 0x50b   :  { %v6674_v36 = vmul.f32 0.6931472, %v8757_v34 }
 0x50d   :  { %v6677_v40 = vadd.f32 %v6674_v36, %v6660_v41 }
 0x50e   :  { %v8759_v29 = vpop.eup %8758 }
 0x50f   :  { %v6679_v30 = vsub.f32 %v6653_v26, %v6677_v40  ;;  %v6676_v49 = vmul.f32 0.6931472, %v8759_v29 }
 0x511   :  { %6681 = vst [vmem:[%s11050_s5] sm:$0xff] %v6679_v30  ;;  %v6678_v43 = vadd.f32 %v6676_v49, %v6662_v5 }
 0x513   :  { %v6680_v4 = vsub.f32 %v6656_v28, %v6678_v43 }
 0x515   :  { %6682 = vst [vmem:[%s11050_s5 + $0x8] sm:$0xff] %v6680_v4 }

</bundles_post_ra>
